<compile_context>
chip_gen: v7x
topology: tpu7x:2x2x1
jax: 0.10.0
libtpu: 0.0.40
codegen_flags: <defaults>
</compile_context>

<pallas_src>
import math

import jax
import jax.numpy as jnp
from jax import lax
from jax.experimental import pallas as pl
from jax.experimental.pallas import tpu as pltpu

# Module constants (from the PyTorch source)
CONTEXT_LEN = 32
D_MODEL = 512
NUM_HEADS = 8
HEAD_DIM = D_MODEL // NUM_HEADS  # 64


def _fused_attention_kernel(x_ref, wqkv_ref, o_ref):
    """Single grid step; batch folded into the matmul M dim.

    x_ref    : (B, T, D)           VMEM, bf16
    wqkv_ref : (D, 3*H*HEAD_DIM)   VMEM, bf16  packed [Q_all | K_all | V_all]
    o_ref    : (B, T, H*HEAD_DIM)  VMEM, f32   (lane-dense for H=8: 512 lanes)
    """
    B, T, D = x_ref.shape
    n_out = o_ref.shape[-1]          # H * HEAD_DIM
    hd = HEAD_DIM
    H = n_out // hd
    nh = n_out                       # width of each of the Q / K / V slabs

    # --- Fused QKV projection for all heads: ONE bf16 MXU matmul, f32 acc. ---
    x2d = x_ref[...].reshape(B * T, D)                       # leading-dim collapse
    qkv = jnp.dot(x2d, wqkv_ref[...],
                  preferred_element_type=jnp.float32)        # (B*T, 3*nh) f32
    qkv = qkv.reshape(B, T, 3 * nh)

    # --- Causal additive bias: one 2-D iota compare, hoisted out of the head
    #     loop together with its batch broadcast (JAX does not CSE broadcasts).
    row = lax.broadcasted_iota(jnp.int32, (T, T), 0)
    col = lax.broadcasted_iota(jnp.int32, (T, T), 1)
    bias = jnp.where(col <= row, 0.0, -1e30).astype(jnp.float32)   # (T, T)
    bias_b = jnp.broadcast_to(bias, (B, T, T))                     # (B, T, T)

    scale = 1.0 / math.sqrt(hd)

    outs = []
    for h in range(H):  # static unroll; all slices below are static lane slices
        q = qkv[:, :, 0 * nh + h * hd: 0 * nh + (h + 1) * hd].astype(jnp.bfloat16)
        k = qkv[:, :, 1 * nh + h * hd: 1 * nh + (h + 1) * hd].astype(jnp.bfloat16)
        v = qkv[:, :, 2 * nh + h * hd: 2 * nh + (h + 1) * hd].astype(jnp.bfloat16)

        # Scores: bf16 operands on the MXU, f32 accumulation, contract head dim
        # of both operands directly (no k.T materialization).
        s = lax.dot_general(q, k, (((2,), (2,)), ((0,), (0,))),
                            preferred_element_type=jnp.float32)    # (B, T, T)
        s = s * scale + bias_b

        # Numerically stable softmax in f32; reciprocal on the EUP slot.
        m = jnp.max(s, axis=-1, keepdims=True)
        p = jnp.exp(s - m)
        p = p * pl.reciprocal(jnp.sum(p, axis=-1, keepdims=True), approx=True)

        # Attention-weighted sum of values: bf16 operands, f32 accumulation.
        out_h = lax.dot_general(p.astype(jnp.bfloat16), v,
                                (((2,), (1,)), ((0,), (0,))),
                                preferred_element_type=jnp.float32)  # (B, T, hd)
        outs.append(out_h)

    # Single lane-dense store of all heads at once (unmasked vst for H=8).
    o_ref[...] = jnp.concatenate(outs, axis=-1).astype(o_ref.dtype)


def prepare_qkv_weights(wqs, wks, wvs):
    """Parameter-prep time (hoisted out of the forward hot path).

    wqs/wks/wvs: sequences of per-head (D, HEAD_DIM) f32 weights (pre-transposed,
    i.e. the module computes x @ W).  Returns the fused bf16 (D, 3*H*HEAD_DIM)
    weight packed as [Q_all | K_all | V_all]."""
    wq_all = jnp.concatenate(list(wqs), axis=1)
    wk_all = jnp.concatenate(list(wks), axis=1)
    wv_all = jnp.concatenate(list(wvs), axis=1)
    return jnp.concatenate([wq_all, wk_all, wv_all], axis=1).astype(jnp.bfloat16)


def fused_attention_forward(x, wqkv_bf16):
    """x: (B, T, D) f32; wqkv_bf16: (D, 3*H*HEAD_DIM) bf16 from prepare_qkv_weights.

    Returns (B, T, H*HEAD_DIM) f32; columns [h*64:(h+1)*64] are exactly the
    PyTorch Attention.forward output for head h's weights."""
    B, T, D = x.shape
    n3 = wqkv_bf16.shape[1]
    n_out = n3 // 3
    H = n_out // HEAD_DIM

    # Only the activation cast stays per call (halves the x DMA bytes).
    x_bf = x.astype(jnp.bfloat16)

    cost = pl.CostEstimate(
        flops=2 * B * T * D * n3 + 4 * B * H * T * T * HEAD_DIM,
        transcendentals=B * H * T * T,
        bytes_accessed=B * T * D * 2 + D * n3 * 2 + B * T * n_out * 4,
    )

    # Single grid step on one TensorCore: at this size a megacore split over
    # batch costs more (per-step overhead + duplicated weight DMA) than the
    # sub-microsecond compute it would parallelize.
    return pl.pallas_call(
        _fused_attention_kernel,
        out_shape=jax.ShapeDtypeStruct((B, T, n_out), x.dtype),
        grid_spec=pltpu.PrefetchScalarGridSpec(
            num_scalar_prefetch=0,
            grid=(1,),
            in_specs=[pl.BlockSpec((B, T, D), lambda i: (0, 0, 0)),
                      pl.BlockSpec((D, n3), lambda i: (0, 0))],
            out_specs=pl.BlockSpec((B, T, n_out), lambda i: (0, 0, 0)),
        ),
        compiler_params=pltpu.CompilerParams(
            dimension_semantics=("arbitrary",),
        ),
        cost_estimate=cost,
    )(x_bf, wqkv_bf16)


def attention_forward(x, wq, wk, wv, *, wqkv_bf16=None):
    """Exact equivalent of the PyTorch Attention.forward (single head).

    Returns (B, T, HEAD_DIM) f32.  Pass a precomputed `wqkv_bf16`
    (= prepare_qkv_weights([wq], [wk], [wv])) to keep weight fusion out of the
    per-call path."""
    if wqkv_bf16 is None:
        wqkv_bf16 = prepare_qkv_weights([wq], [wk], [wv])
    return fused_attention_forward(x, wqkv_bf16)


def attention_reference(x, wq, wk, wv):
    """Plain-JAX f32 reference mirroring the PyTorch forward exactly."""
    T = x.shape[1]
    q = x @ wq
    k = x @ wk
    v = x @ wv
    scores = (q @ jnp.swapaxes(k, -1, -2)) / math.sqrt(HEAD_DIM)
    mask = jnp.tril(jnp.ones((T, T), dtype=bool))
    scores = jnp.where(mask, scores, -jnp.inf)
    p = jax.nn.softmax(scores, axis=-1)
    return p @ v


if __name__ == "__main__":
    key = jax.random.PRNGKey(0)
    B, T = 2, CONTEXT_LEN  # full context length of 32

    keys = jax.random.split(key, 1 + 3 * NUM_HEADS)
    x = jax.random.normal(keys[0], (B, T, D_MODEL), dtype=jnp.float32)

    # Deterministic Kaiming-uniform-like init, weights pre-transposed as (D, hd).
    bound = 1.0 / math.sqrt(D_MODEL)
    wqs, wks, wvs = [], [], []
    for h in range(NUM_HEADS):
        wqs.append(jax.random.uniform(keys[1 + 3 * h], (D_MODEL, HEAD_DIM),
                                      jnp.float32, -bound, bound))
        wks.append(jax.random.uniform(keys[2 + 3 * h], (D_MODEL, HEAD_DIM),
                                      jnp.float32, -bound, bound))
        wvs.append(jax.random.uniform(keys[3 + 3 * h], (D_MODEL, HEAD_DIM),
                                      jnp.float32, -bound, bound))

    # --- Fused 8-head path (one pallas_call, lane-dense (B, T, 512) output). ---
    wqkv = prepare_qkv_weights(wqs, wks, wvs)          # done once, not per call
    out = fused_attention_forward(x, wqkv)
    out = jax.block_until_ready(out)
    assert out.shape == (B, T, NUM_HEADS * HEAD_DIM)

    # Tolerance reflects the intentional bf16 operands (f32 accumulation) in the
    # projection, score, and PV matmuls; softmax itself stays f32.
    for h in range(NUM_HEADS):
        ref_h = attention_reference(x, wqs[h], wks[h], wvs[h])
        got_h = out[..., h * HEAD_DIM:(h + 1) * HEAD_DIM]
        assert jnp.allclose(got_h, ref_h, atol=3e-2, rtol=3e-2), \
            f"fused path mismatch vs reference at head {h}"

    # --- Single-head module semantics (PyTorch Attention.forward, head 0). ---
    w1 = prepare_qkv_weights([wqs[0]], [wks[0]], [wvs[0]])
    out1 = attention_forward(x, wqs[0], wks[0], wvs[0], wqkv_bf16=w1)
    out1 = jax.block_until_ready(out1)
    assert out1.shape == (B, T, HEAD_DIM)
    assert jnp.allclose(out1, attention_reference(x, wqs[0], wks[0], wvs[0]),
                        atol=3e-2, rtol=3e-2), "single-head mismatch vs reference"

    print("KERNEL_OK")
</pallas_src>

<mosaic_0001>
module attributes {stable_mosaic.version = 11 : i64} {
  func.func @_fused_attention_kernel(%arg0: i32, %arg1: memref<2x32x512xbf16, #tpu.memory_space<vmem>>, %arg2: memref<512x1536xbf16, #tpu.memory_space<vmem>>, %arg3: memref<2x32x512xf32, #tpu.memory_space<vmem>>) attributes {dimension_semantics = [#tpu.dimension_semantics<arbitrary>], iteration_bounds = array<i64: 1>, scalar_prefetch = 0 : i64, scratch_operands = 0 : i64, tpu.core_type = #tpu.core_type<tc>, window_params = [{pipeline_mode = #tpu.pipeline_mode<synchronous>, transform_indices = @transform_0, window_bounds = array<i64: 2, 32, 512>}, {pipeline_mode = #tpu.pipeline_mode<synchronous>, transform_indices = @transform_1, window_bounds = array<i64: 512, 1536>}, {pipeline_mode = #tpu.pipeline_mode<synchronous>, transform_indices = @transform_2, window_bounds = array<i64: 2, 32, 512>}]} {
    %c0 = arith.constant 0 : index
    %c0_0 = arith.constant 0 : index
    %c0_1 = arith.constant 0 : index
    %0 = vector.load %arg1[%c0, %c0_0, %c0_1] : memref<2x32x512xbf16, #tpu.memory_space<vmem>>, vector<2x32x512xbf16>
    %1 = vector.shape_cast %0 : vector<2x32x512xbf16> to vector<64x512xbf16>
    %c0_2 = arith.constant 0 : index
    %c0_3 = arith.constant 0 : index
    %2 = vector.load %arg2[%c0_2, %c0_3] : memref<512x1536xbf16, #tpu.memory_space<vmem>>, vector<512x1536xbf16>
    %cst = arith.constant dense<0.000000e+00> : vector<64x1536xf32>
    %3 = tpu.matmul %1, %2, %cst {dimension_numbers = #tpu.dot_dimension_numbers<[1], [0], [0], [1], [0, 0, 1, 1], [], []>} : vector<64x512xbf16>, vector<512x1536xbf16>, vector<64x1536xf32> -> vector<64x1536xf32>
    %4 = vector.shape_cast %3 : vector<64x1536xf32> to vector<2x32x1536xf32>
    %5 = tpu.iota {dimensions = array<i32: 0>} : vector<32x32xi32>
    %6 = tpu.iota {dimensions = array<i32: 1>} : vector<32x32xi32>
    %7 = arith.cmpi sle, %6, %5 : vector<32x32xi32>
    %cst_4 = arith.constant 0.000000e+00 : f32
    %cst_5 = arith.constant -1.000000e+30 : f32
    %8 = vector.broadcast %cst_4 : f32 to vector<32x32xf32>
    %9 = vector.broadcast %cst_5 : f32 to vector<32x32xf32>
    %10 = arith.select %7, %8, %9 : vector<32x32xi1>, vector<32x32xf32>
    %11 = vector.shape_cast %10 : vector<32x32xf32> to vector<1x32x32xf32>
    %12 = vector.broadcast %11 : vector<1x32x32xf32> to vector<2x32x32xf32>
    %13 = vector.extract_strided_slice %4 {offsets = [0, 0, 0], sizes = [2, 32, 64], strides = [1, 1, 1]} : vector<2x32x1536xf32> to vector<2x32x64xf32>
    %14 = arith.truncf %13 : vector<2x32x64xf32> to vector<2x32x64xbf16>
    %15 = vector.extract_strided_slice %4 {offsets = [0, 0, 512], sizes = [2, 32, 64], strides = [1, 1, 1]} : vector<2x32x1536xf32> to vector<2x32x64xf32>
    %16 = arith.truncf %15 : vector<2x32x64xf32> to vector<2x32x64xbf16>
    %17 = vector.extract_strided_slice %4 {offsets = [0, 0, 1024], sizes = [2, 32, 64], strides = [1, 1, 1]} : vector<2x32x1536xf32> to vector<2x32x64xf32>
    %18 = arith.truncf %17 : vector<2x32x64xf32> to vector<2x32x64xbf16>
    %cst_6 = arith.constant dense<0.000000e+00> : vector<2x32x32xf32>
    %19 = tpu.matmul %14, %16, %cst_6 {dimension_numbers = #tpu.dot_dimension_numbers<[2], [2], [1], [1], [0, 0, 0, 1, 1, 1], [0], [0]>} : vector<2x32x64xbf16>, vector<2x32x64xbf16>, vector<2x32x32xf32> -> vector<2x32x32xf32>
    %cst_7 = arith.constant 1.250000e-01 : f32
    %20 = vector.broadcast %cst_7 : f32 to vector<2x32x32xf32>
    %21 = arith.mulf %19, %20 : vector<2x32x32xf32>
    %22 = arith.addf %21, %12 : vector<2x32x32xf32>
    %cst_8 = arith.constant dense<0xFF800000> : vector<2x32xf32>
    %23 = vector.multi_reduction <maximumf>, %22, %cst_8 [2] : vector<2x32x32xf32> to vector<2x32xf32>
    %24 = vector.shape_cast %23 : vector<2x32xf32> to vector<2x32x1xf32>
    %25 = vector.broadcast %24 : vector<2x32x1xf32> to vector<2x32x32xf32>
    %26 = arith.subf %22, %25 : vector<2x32x32xf32>
    %27 = math.exp %26 : vector<2x32x32xf32>
    %cst_9 = arith.constant dense<0.000000e+00> : vector<2x32xf32>
    %28 = vector.multi_reduction <add>, %27, %cst_9 [2] : vector<2x32x32xf32> to vector<2x32xf32>
    %29 = vector.shape_cast %28 : vector<2x32xf32> to vector<2x32x1xf32>
    %30 = tpu.reciprocal %29 {approx = true} : vector<2x32x1xf32> -> vector<2x32x1xf32>
    %31 = vector.broadcast %30 : vector<2x32x1xf32> to vector<2x32x32xf32>
    %32 = arith.mulf %27, %31 : vector<2x32x32xf32>
    %33 = arith.truncf %32 : vector<2x32x32xf32> to vector<2x32x32xbf16>
    %cst_10 = arith.constant dense<0.000000e+00> : vector<2x32x64xf32>
    %34 = tpu.matmul %33, %18, %cst_10 {dimension_numbers = #tpu.dot_dimension_numbers<[2], [1], [1], [2], [0, 0, 0, 1, 1, 2], [0], [0]>} : vector<2x32x32xbf16>, vector<2x32x64xbf16>, vector<2x32x64xf32> -> vector<2x32x64xf32>
    %35 = vector.extract_strided_slice %4 {offsets = [0, 0, 64], sizes = [2, 32, 64], strides = [1, 1, 1]} : vector<2x32x1536xf32> to vector<2x32x64xf32>
    %36 = arith.truncf %35 : vector<2x32x64xf32> to vector<2x32x64xbf16>
    %37 = vector.extract_strided_slice %4 {offsets = [0, 0, 576], sizes = [2, 32, 64], strides = [1, 1, 1]} : vector<2x32x1536xf32> to vector<2x32x64xf32>
    %38 = arith.truncf %37 : vector<2x32x64xf32> to vector<2x32x64xbf16>
    %39 = vector.extract_strided_slice %4 {offsets = [0, 0, 1088], sizes = [2, 32, 64], strides = [1, 1, 1]} : vector<2x32x1536xf32> to vector<2x32x64xf32>
    %40 = arith.truncf %39 : vector<2x32x64xf32> to vector<2x32x64xbf16>
    %cst_11 = arith.constant dense<0.000000e+00> : vector<2x32x32xf32>
    %41 = tpu.matmul %36, %38, %cst_11 {dimension_numbers = #tpu.dot_dimension_numbers<[2], [2], [1], [1], [0, 0, 0, 1, 1, 1], [0], [0]>} : vector<2x32x64xbf16>, vector<2x32x64xbf16>, vector<2x32x32xf32> -> vector<2x32x32xf32>
    %cst_12 = arith.constant 1.250000e-01 : f32
    %42 = vector.broadcast %cst_12 : f32 to vector<2x32x32xf32>
    %43 = arith.mulf %41, %42 : vector<2x32x32xf32>
    %44 = arith.addf %43, %12 : vector<2x32x32xf32>
    %cst_13 = arith.constant dense<0xFF800000> : vector<2x32xf32>
    %45 = vector.multi_reduction <maximumf>, %44, %cst_13 [2] : vector<2x32x32xf32> to vector<2x32xf32>
    %46 = vector.shape_cast %45 : vector<2x32xf32> to vector<2x32x1xf32>
    %47 = vector.broadcast %46 : vector<2x32x1xf32> to vector<2x32x32xf32>
    %48 = arith.subf %44, %47 : vector<2x32x32xf32>
    %49 = math.exp %48 : vector<2x32x32xf32>
    %cst_14 = arith.constant dense<0.000000e+00> : vector<2x32xf32>
    %50 = vector.multi_reduction <add>, %49, %cst_14 [2] : vector<2x32x32xf32> to vector<2x32xf32>
    %51 = vector.shape_cast %50 : vector<2x32xf32> to vector<2x32x1xf32>
    %52 = tpu.reciprocal %51 {approx = true} : vector<2x32x1xf32> -> vector<2x32x1xf32>
    %53 = vector.broadcast %52 : vector<2x32x1xf32> to vector<2x32x32xf32>
    %54 = arith.mulf %49, %53 : vector<2x32x32xf32>
    %55 = arith.truncf %54 : vector<2x32x32xf32> to vector<2x32x32xbf16>
    %cst_15 = arith.constant dense<0.000000e+00> : vector<2x32x64xf32>
    %56 = tpu.matmul %55, %40, %cst_15 {dimension_numbers = #tpu.dot_dimension_numbers<[2], [1], [1], [2], [0, 0, 0, 1, 1, 2], [0], [0]>} : vector<2x32x32xbf16>, vector<2x32x64xbf16>, vector<2x32x64xf32> -> vector<2x32x64xf32>
    %57 = vector.extract_strided_slice %4 {offsets = [0, 0, 128], sizes = [2, 32, 64], strides = [1, 1, 1]} : vector<2x32x1536xf32> to vector<2x32x64xf32>
    %58 = arith.truncf %57 : vector<2x32x64xf32> to vector<2x32x64xbf16>
    %59 = vector.extract_strided_slice %4 {offsets = [0, 0, 640], sizes = [2, 32, 64], strides = [1, 1, 1]} : vector<2x32x1536xf32> to vector<2x32x64xf32>
    %60 = arith.truncf %59 : vector<2x32x64xf32> to vector<2x32x64xbf16>
    %61 = vector.extract_strided_slice %4 {offsets = [0, 0, 1152], sizes = [2, 32, 64], strides = [1, 1, 1]} : vector<2x32x1536xf32> to vector<2x32x64xf32>
    %62 = arith.truncf %61 : vector<2x32x64xf32> to vector<2x32x64xbf16>
    %cst_16 = arith.constant dense<0.000000e+00> : vector<2x32x32xf32>
    %63 = tpu.matmul %58, %60, %cst_16 {dimension_numbers = #tpu.dot_dimension_numbers<[2], [2], [1], [1], [0, 0, 0, 1, 1, 1], [0], [0]>} : vector<2x32x64xbf16>, vector<2x32x64xbf16>, vector<2x32x32xf32> -> vector<2x32x32xf32>
    %cst_17 = arith.constant 1.250000e-01 : f32
    %64 = vector.broadcast %cst_17 : f32 to vector<2x32x32xf32>
    %65 = arith.mulf %63, %64 : vector<2x32x32xf32>
    %66 = arith.addf %65, %12 : vector<2x32x32xf32>
    %cst_18 = arith.constant dense<0xFF800000> : vector<2x32xf32>
    %67 = vector.multi_reduction <maximumf>, %66, %cst_18 [2] : vector<2x32x32xf32> to vector<2x32xf32>
    %68 = vector.shape_cast %67 : vector<2x32xf32> to vector<2x32x1xf32>
    %69 = vector.broadcast %68 : vector<2x32x1xf32> to vector<2x32x32xf32>
    %70 = arith.subf %66, %69 : vector<2x32x32xf32>
    %71 = math.exp %70 : vector<2x32x32xf32>
    %cst_19 = arith.constant dense<0.000000e+00> : vector<2x32xf32>
    %72 = vector.multi_reduction <add>, %71, %cst_19 [2] : vector<2x32x32xf32> to vector<2x32xf32>
    %73 = vector.shape_cast %72 : vector<2x32xf32> to vector<2x32x1xf32>
    %74 = tpu.reciprocal %73 {approx = true} : vector<2x32x1xf32> -> vector<2x32x1xf32>
    %75 = vector.broadcast %74 : vector<2x32x1xf32> to vector<2x32x32xf32>
    %76 = arith.mulf %71, %75 : vector<2x32x32xf32>
    %77 = arith.truncf %76 : vector<2x32x32xf32> to vector<2x32x32xbf16>
    %cst_20 = arith.constant dense<0.000000e+00> : vector<2x32x64xf32>
    %78 = tpu.matmul %77, %62, %cst_20 {dimension_numbers = #tpu.dot_dimension_numbers<[2], [1], [1], [2], [0, 0, 0, 1, 1, 2], [0], [0]>} : vector<2x32x32xbf16>, vector<2x32x64xbf16>, vector<2x32x64xf32> -> vector<2x32x64xf32>
    %79 = vector.extract_strided_slice %4 {offsets = [0, 0, 192], sizes = [2, 32, 64], strides = [1, 1, 1]} : vector<2x32x1536xf32> to vector<2x32x64xf32>
    %80 = arith.truncf %79 : vector<2x32x64xf32> to vector<2x32x64xbf16>
    %81 = vector.extract_strided_slice %4 {offsets = [0, 0, 704], sizes = [2, 32, 64], strides = [1, 1, 1]} : vector<2x32x1536xf32> to vector<2x32x64xf32>
    %82 = arith.truncf %81 : vector<2x32x64xf32> to vector<2x32x64xbf16>
    %83 = vector.extract_strided_slice %4 {offsets = [0, 0, 1216], sizes = [2, 32, 64], strides = [1, 1, 1]} : vector<2x32x1536xf32> to vector<2x32x64xf32>
    %84 = arith.truncf %83 : vector<2x32x64xf32> to vector<2x32x64xbf16>
    %cst_21 = arith.constant dense<0.000000e+00> : vector<2x32x32xf32>
    %85 = tpu.matmul %80, %82, %cst_21 {dimension_numbers = #tpu.dot_dimension_numbers<[2], [2], [1], [1], [0, 0, 0, 1, 1, 1], [0], [0]>} : vector<2x32x64xbf16>, vector<2x32x64xbf16>, vector<2x32x32xf32> -> vector<2x32x32xf32>
    %cst_22 = arith.constant 1.250000e-01 : f32
    %86 = vector.broadcast %cst_22 : f32 to vector<2x32x32xf32>
    %87 = arith.mulf %85, %86 : vector<2x32x32xf32>
    %88 = arith.addf %87, %12 : vector<2x32x32xf32>
    %cst_23 = arith.constant dense<0xFF800000> : vector<2x32xf32>
    %89 = vector.multi_reduction <maximumf>, %88, %cst_23 [2] : vector<2x32x32xf32> to vector<2x32xf32>
    %90 = vector.shape_cast %89 : vector<2x32xf32> to vector<2x32x1xf32>
    %91 = vector.broadcast %90 : vector<2x32x1xf32> to vector<2x32x32xf32>
    %92 = arith.subf %88, %91 : vector<2x32x32xf32>
    %93 = math.exp %92 : vector<2x32x32xf32>
    %cst_24 = arith.constant dense<0.000000e+00> : vector<2x32xf32>
    %94 = vector.multi_reduction <add>, %93, %cst_24 [2] : vector<2x32x32xf32> to vector<2x32xf32>
    %95 = vector.shape_cast %94 : vector<2x32xf32> to vector<2x32x1xf32>
    %96 = tpu.reciprocal %95 {approx = true} : vector<2x32x1xf32> -> vector<2x32x1xf32>
    %97 = vector.broadcast %96 : vector<2x32x1xf32> to vector<2x32x32xf32>
    %98 = arith.mulf %93, %97 : vector<2x32x32xf32>
    %99 = arith.truncf %98 : vector<2x32x32xf32> to vector<2x32x32xbf16>
    %cst_25 = arith.constant dense<0.000000e+00> : vector<2x32x64xf32>
    %100 = tpu.matmul %99, %84, %cst_25 {dimension_numbers = #tpu.dot_dimension_numbers<[2], [1], [1], [2], [0, 0, 0, 1, 1, 2], [0], [0]>} : vector<2x32x32xbf16>, vector<2x32x64xbf16>, vector<2x32x64xf32> -> vector<2x32x64xf32>
    %101 = vector.extract_strided_slice %4 {offsets = [0, 0, 256], sizes = [2, 32, 64], strides = [1, 1, 1]} : vector<2x32x1536xf32> to vector<2x32x64xf32>
    %102 = arith.truncf %101 : vector<2x32x64xf32> to vector<2x32x64xbf16>
    %103 = vector.extract_strided_slice %4 {offsets = [0, 0, 768], sizes = [2, 32, 64], strides = [1, 1, 1]} : vector<2x32x1536xf32> to vector<2x32x64xf32>
    %104 = arith.truncf %103 : vector<2x32x64xf32> to vector<2x32x64xbf16>
    %105 = vector.extract_strided_slice %4 {offsets = [0, 0, 1280], sizes = [2, 32, 64], strides = [1, 1, 1]} : vector<2x32x1536xf32> to vector<2x32x64xf32>
    %106 = arith.truncf %105 : vector<2x32x64xf32> to vector<2x32x64xbf16>
    %cst_26 = arith.constant dense<0.000000e+00> : vector<2x32x32xf32>
    %107 = tpu.matmul %102, %104, %cst_26 {dimension_numbers = #tpu.dot_dimension_numbers<[2], [2], [1], [1], [0, 0, 0, 1, 1, 1], [0], [0]>} : vector<2x32x64xbf16>, vector<2x32x64xbf16>, vector<2x32x32xf32> -> vector<2x32x32xf32>
    %cst_27 = arith.constant 1.250000e-01 : f32
    %108 = vector.broadcast %cst_27 : f32 to vector<2x32x32xf32>
    %109 = arith.mulf %107, %108 : vector<2x32x32xf32>
    %110 = arith.addf %109, %12 : vector<2x32x32xf32>
    %cst_28 = arith.constant dense<0xFF800000> : vector<2x32xf32>
    %111 = vector.multi_reduction <maximumf>, %110, %cst_28 [2] : vector<2x32x32xf32> to vector<2x32xf32>
    %112 = vector.shape_cast %111 : vector<2x32xf32> to vector<2x32x1xf32>
    %113 = vector.broadcast %112 : vector<2x32x1xf32> to vector<2x32x32xf32>
    %114 = arith.subf %110, %113 : vector<2x32x32xf32>
    %115 = math.exp %114 : vector<2x32x32xf32>
    %cst_29 = arith.constant dense<0.000000e+00> : vector<2x32xf32>
    %116 = vector.multi_reduction <add>, %115, %cst_29 [2] : vector<2x32x32xf32> to vector<2x32xf32>
    %117 = vector.shape_cast %116 : vector<2x32xf32> to vector<2x32x1xf32>
    %118 = tpu.reciprocal %117 {approx = true} : vector<2x32x1xf32> -> vector<2x32x1xf32>
    %119 = vector.broadcast %118 : vector<2x32x1xf32> to vector<2x32x32xf32>
    %120 = arith.mulf %115, %119 : vector<2x32x32xf32>
    %121 = arith.truncf %120 : vector<2x32x32xf32> to vector<2x32x32xbf16>
    %cst_30 = arith.constant dense<0.000000e+00> : vector<2x32x64xf32>
    %122 = tpu.matmul %121, %106, %cst_30 {dimension_numbers = #tpu.dot_dimension_numbers<[2], [1], [1], [2], [0, 0, 0, 1, 1, 2], [0], [0]>} : vector<2x32x32xbf16>, vector<2x32x64xbf16>, vector<2x32x64xf32> -> vector<2x32x64xf32>
    %123 = vector.extract_strided_slice %4 {offsets = [0, 0, 320], sizes = [2, 32, 64], strides = [1, 1, 1]} : vector<2x32x1536xf32> to vector<2x32x64xf32>
    %124 = arith.truncf %123 : vector<2x32x64xf32> to vector<2x32x64xbf16>
    %125 = vector.extract_strided_slice %4 {offsets = [0, 0, 832], sizes = [2, 32, 64], strides = [1, 1, 1]} : vector<2x32x1536xf32> to vector<2x32x64xf32>
    %126 = arith.truncf %125 : vector<2x32x64xf32> to vector<2x32x64xbf16>
    %127 = vector.extract_strided_slice %4 {offsets = [0, 0, 1344], sizes = [2, 32, 64], strides = [1, 1, 1]} : vector<2x32x1536xf32> to vector<2x32x64xf32>
    %128 = arith.truncf %127 : vector<2x32x64xf32> to vector<2x32x64xbf16>
    %cst_31 = arith.constant dense<0.000000e+00> : vector<2x32x32xf32>
    %129 = tpu.matmul %124, %126, %cst_31 {dimension_numbers = #tpu.dot_dimension_numbers<[2], [2], [1], [1], [0, 0, 0, 1, 1, 1], [0], [0]>} : vector<2x32x64xbf16>, vector<2x32x64xbf16>, vector<2x32x32xf32> -> vector<2x32x32xf32>
    %cst_32 = arith.constant 1.250000e-01 : f32
    %130 = vector.broadcast %cst_32 : f32 to vector<2x32x32xf32>
    %131 = arith.mulf %129, %130 : vector<2x32x32xf32>
    %132 = arith.addf %131, %12 : vector<2x32x32xf32>
    %cst_33 = arith.constant dense<0xFF800000> : vector<2x32xf32>
    %133 = vector.multi_reduction <maximumf>, %132, %cst_33 [2] : vector<2x32x32xf32> to vector<2x32xf32>
    %134 = vector.shape_cast %133 : vector<2x32xf32> to vector<2x32x1xf32>
    %135 = vector.broadcast %134 : vector<2x32x1xf32> to vector<2x32x32xf32>
    %136 = arith.subf %132, %135 : vector<2x32x32xf32>
    %137 = math.exp %136 : vector<2x32x32xf32>
    %cst_34 = arith.constant dense<0.000000e+00> : vector<2x32xf32>
    %138 = vector.multi_reduction <add>, %137, %cst_34 [2] : vector<2x32x32xf32> to vector<2x32xf32>
    %139 = vector.shape_cast %138 : vector<2x32xf32> to vector<2x32x1xf32>
    %140 = tpu.reciprocal %139 {approx = true} : vector<2x32x1xf32> -> vector<2x32x1xf32>
    %141 = vector.broadcast %140 : vector<2x32x1xf32> to vector<2x32x32xf32>
    %142 = arith.mulf %137, %141 : vector<2x32x32xf32>
    %143 = arith.truncf %142 : vector<2x32x32xf32> to vector<2x32x32xbf16>
    %cst_35 = arith.constant dense<0.000000e+00> : vector<2x32x64xf32>
    %144 = tpu.matmul %143, %128, %cst_35 {dimension_numbers = #tpu.dot_dimension_numbers<[2], [1], [1], [2], [0, 0, 0, 1, 1, 2], [0], [0]>} : vector<2x32x32xbf16>, vector<2x32x64xbf16>, vector<2x32x64xf32> -> vector<2x32x64xf32>
    %145 = vector.extract_strided_slice %4 {offsets = [0, 0, 384], sizes = [2, 32, 64], strides = [1, 1, 1]} : vector<2x32x1536xf32> to vector<2x32x64xf32>
    %146 = arith.truncf %145 : vector<2x32x64xf32> to vector<2x32x64xbf16>
    %147 = vector.extract_strided_slice %4 {offsets = [0, 0, 896], sizes = [2, 32, 64], strides = [1, 1, 1]} : vector<2x32x1536xf32> to vector<2x32x64xf32>
    %148 = arith.truncf %147 : vector<2x32x64xf32> to vector<2x32x64xbf16>
    %149 = vector.extract_strided_slice %4 {offsets = [0, 0, 1408], sizes = [2, 32, 64], strides = [1, 1, 1]} : vector<2x32x1536xf32> to vector<2x32x64xf32>
    %150 = arith.truncf %149 : vector<2x32x64xf32> to vector<2x32x64xbf16>
    %cst_36 = arith.constant dense<0.000000e+00> : vector<2x32x32xf32>
    %151 = tpu.matmul %146, %148, %cst_36 {dimension_numbers = #tpu.dot_dimension_numbers<[2], [2], [1], [1], [0, 0, 0, 1, 1, 1], [0], [0]>} : vector<2x32x64xbf16>, vector<2x32x64xbf16>, vector<2x32x32xf32> -> vector<2x32x32xf32>
    %cst_37 = arith.constant 1.250000e-01 : f32
    %152 = vector.broadcast %cst_37 : f32 to vector<2x32x32xf32>
    %153 = arith.mulf %151, %152 : vector<2x32x32xf32>
    %154 = arith.addf %153, %12 : vector<2x32x32xf32>
    %cst_38 = arith.constant dense<0xFF800000> : vector<2x32xf32>
    %155 = vector.multi_reduction <maximumf>, %154, %cst_38 [2] : vector<2x32x32xf32> to vector<2x32xf32>
    %156 = vector.shape_cast %155 : vector<2x32xf32> to vector<2x32x1xf32>
    %157 = vector.broadcast %156 : vector<2x32x1xf32> to vector<2x32x32xf32>
    %158 = arith.subf %154, %157 : vector<2x32x32xf32>
    %159 = math.exp %158 : vector<2x32x32xf32>
    %cst_39 = arith.constant dense<0.000000e+00> : vector<2x32xf32>
    %160 = vector.multi_reduction <add>, %159, %cst_39 [2] : vector<2x32x32xf32> to vector<2x32xf32>
    %161 = vector.shape_cast %160 : vector<2x32xf32> to vector<2x32x1xf32>
    %162 = tpu.reciprocal %161 {approx = true} : vector<2x32x1xf32> -> vector<2x32x1xf32>
    %163 = vector.broadcast %162 : vector<2x32x1xf32> to vector<2x32x32xf32>
    %164 = arith.mulf %159, %163 : vector<2x32x32xf32>
    %165 = arith.truncf %164 : vector<2x32x32xf32> to vector<2x32x32xbf16>
    %cst_40 = arith.constant dense<0.000000e+00> : vector<2x32x64xf32>
    %166 = tpu.matmul %165, %150, %cst_40 {dimension_numbers = #tpu.dot_dimension_numbers<[2], [1], [1], [2], [0, 0, 0, 1, 1, 2], [0], [0]>} : vector<2x32x32xbf16>, vector<2x32x64xbf16>, vector<2x32x64xf32> -> vector<2x32x64xf32>
    %167 = vector.extract_strided_slice %4 {offsets = [0, 0, 448], sizes = [2, 32, 64], strides = [1, 1, 1]} : vector<2x32x1536xf32> to vector<2x32x64xf32>
    %168 = arith.truncf %167 : vector<2x32x64xf32> to vector<2x32x64xbf16>
    %169 = vector.extract_strided_slice %4 {offsets = [0, 0, 960], sizes = [2, 32, 64], strides = [1, 1, 1]} : vector<2x32x1536xf32> to vector<2x32x64xf32>
    %170 = arith.truncf %169 : vector<2x32x64xf32> to vector<2x32x64xbf16>
    %171 = vector.extract_strided_slice %4 {offsets = [0, 0, 1472], sizes = [2, 32, 64], strides = [1, 1, 1]} : vector<2x32x1536xf32> to vector<2x32x64xf32>
    %172 = arith.truncf %171 : vector<2x32x64xf32> to vector<2x32x64xbf16>
    %cst_41 = arith.constant dense<0.000000e+00> : vector<2x32x32xf32>
    %173 = tpu.matmul %168, %170, %cst_41 {dimension_numbers = #tpu.dot_dimension_numbers<[2], [2], [1], [1], [0, 0, 0, 1, 1, 1], [0], [0]>} : vector<2x32x64xbf16>, vector<2x32x64xbf16>, vector<2x32x32xf32> -> vector<2x32x32xf32>
    %cst_42 = arith.constant 1.250000e-01 : f32
    %174 = vector.broadcast %cst_42 : f32 to vector<2x32x32xf32>
    %175 = arith.mulf %173, %174 : vector<2x32x32xf32>
    %176 = arith.addf %175, %12 : vector<2x32x32xf32>
    %cst_43 = arith.constant dense<0xFF800000> : vector<2x32xf32>
    %177 = vector.multi_reduction <maximumf>, %176, %cst_43 [2] : vector<2x32x32xf32> to vector<2x32xf32>
    %178 = vector.shape_cast %177 : vector<2x32xf32> to vector<2x32x1xf32>
    %179 = vector.broadcast %178 : vector<2x32x1xf32> to vector<2x32x32xf32>
    %180 = arith.subf %176, %179 : vector<2x32x32xf32>
    %181 = math.exp %180 : vector<2x32x32xf32>
    %cst_44 = arith.constant dense<0.000000e+00> : vector<2x32xf32>
    %182 = vector.multi_reduction <add>, %181, %cst_44 [2] : vector<2x32x32xf32> to vector<2x32xf32>
    %183 = vector.shape_cast %182 : vector<2x32xf32> to vector<2x32x1xf32>
    %184 = tpu.reciprocal %183 {approx = true} : vector<2x32x1xf32> -> vector<2x32x1xf32>
    %185 = vector.broadcast %184 : vector<2x32x1xf32> to vector<2x32x32xf32>
    %186 = arith.mulf %181, %185 : vector<2x32x32xf32>
    %187 = arith.truncf %186 : vector<2x32x32xf32> to vector<2x32x32xbf16>
    %cst_45 = arith.constant dense<0.000000e+00> : vector<2x32x64xf32>
    %188 = tpu.matmul %187, %172, %cst_45 {dimension_numbers = #tpu.dot_dimension_numbers<[2], [1], [1], [2], [0, 0, 0, 1, 1, 2], [0], [0]>} : vector<2x32x32xbf16>, vector<2x32x64xbf16>, vector<2x32x64xf32> -> vector<2x32x64xf32>
    %189 = tpu.concatenate %34, %56, %78, %100, %122, %144, %166, %188 in 2 : vector<2x32x64xf32>, vector<2x32x64xf32>, vector<2x32x64xf32>, vector<2x32x64xf32>, vector<2x32x64xf32>, vector<2x32x64xf32>, vector<2x32x64xf32>, vector<2x32x64xf32> -> vector<2x32x512xf32>
    %c0_46 = arith.constant 0 : index
    %c0_47 = arith.constant 0 : index
    %c0_48 = arith.constant 0 : index
    %190 = vector.load %arg3[%c0_46, %c0_47, %c0_48] : memref<2x32x512xf32, #tpu.memory_space<vmem>>, vector<2x32x512xf32>
    tpu.vector_store %arg3[%c0_46, %c0_47, %c0_48], %189 {strides = array<i32>} : memref<2x32x512xf32, #tpu.memory_space<vmem>>, vector<2x32x512xf32>,
    return
  }
  func.func @transform_0(%arg0: i32) -> (i32, i32, i32) {
    %c0_i32 = arith.constant 0 : i32
    %c0_i32_0 = arith.constant 0 : i32
    %c0_i32_1 = arith.constant 0 : i32
    %c0_i32_2 = arith.constant 0 : i32
    return %c0_i32, %c0_i32_0, %c0_i32_1 : i32, i32, i32
  }
  func.func @transform_1(%arg0: i32) -> (i32, i32) {
    %c0_i32 = arith.constant 0 : i32
    %c0_i32_0 = arith.constant 0 : i32
    %c0_i32_1 = arith.constant 0 : i32
    return %c0_i32, %c0_i32_0 : i32, i32
  }
  func.func @transform_2(%arg0: i32) -> (i32, i32, i32) {
    %c0_i32 = arith.constant 0 : i32
    %c0_i32_0 = arith.constant 0 : i32
    %c0_i32_1 = arith.constant 0 : i32
    %c0_i32_2 = arith.constant 0 : i32
    return %c0_i32, %c0_i32_0, %c0_i32_1 : i32, i32, i32
  }
}

</mosaic_0001>

<bundles_post_ra>
// kernel: tpu_custom_call.1
= control target key start
LH: loop header
LB: loop body
LE: loop exit
PB: predicated region body
PF: predicated region fallthrough
CT: control target
= control target key end

     0   :  { %7 = vsyncpa [#allocation3], 0  ;;  %s9545_s0 = inlined_call_operand.hbm [shape: bf16[2,32,512], index: 0, kind: input, shape index: {}]   ;;  %s9546_s1 = inlined_call_operand.hbm [shape: bf16[512,1536], index: 1, kind: input, shape index: {}]   ;;  %s9547_s2 = inlined_call_operand.hbm [shape: f32[2,32,512], index: 2, kind: output, shape index: {}]  }
   0x1   :  { %8 = vsyncpa [#allocation6], 0 }
   0x2   :  { %9 = vsyncpa [#allocation4], 0  ;;  %s8403_s9 = smov [#allocation2]   ;;  %s8331_s13 = scalar_lea.hbm %s9545_s0, 2048 }
   0x3   :  { %s15_s10 = sshll.u32 %s8403_s9, 4  ;;  %p8332_p0 = scmp.ne.s32.totalorder %s9545_s0, %s8331_s13  ;;  %s16_s10 = int_to_ptr.vmem [resolvable:$true] %s15_s10 }
   0x4   :  { %p8335_p1 = scmp.lt.u32.totalorder %s8331_s13, %s9545_s0 }
   0x6   :  { %p8337_p2 = pnand %p8335_p1, %p8332_p0 }
   0x8   :  { %8340 = shalt.err (!%p8337_p2)
}
   0x9   :  { %s8341_s18 = scalar_lea.vmem %s16_s10, 2048  ;;  %p8346_p4 = scmp.lt.s32.totalorder %s16_s10, %s16_s10 }
   0xa   :  { %p8342_p3 = scmp.ne.s32.totalorder %s16_s10, %s8341_s18  ;;  %p8347_p5 = scmp.lt.s32.totalorder %s8341_s18, %s8341_s18 }
   0xc   :  { %p8348_p6 = por %p8347_p5, %p8346_p4 }
   0xe   :  { %p8349_p7 = pnand %p8348_p6, %p8342_p3 }
  0x10   :  { %8352 = shalt.err (!%p8349_p7)
}
  0x11   :  { %s8404_s19 = smov 256   ;;  %s8405_s20 = smov 16  }
  0x12   :  { %21 = dma.hbm_to_vmem [thread:$0]  %s9545_s0, 2048, %s16_s10, [#allocation3], %s8404_s19, %s8404_s19, %s8405_s20  }
  0x13   :  { %s8406_s23 = smov [#allocation5]   ;;  %s8353_s27 = scalar_lea.hbm %s9546_s1, 49152 }
  0x14   :  { %s27_s24 = sshll.u32 %s8406_s23, 4  ;;  %p8354_p8 = scmp.ne.s32.totalorder %s9546_s1, %s8353_s27  ;;  %s28_s24 = int_to_ptr.vmem [resolvable:$true] %s27_s24 }
  0x15   :  { %p8357_p9 = scmp.lt.u32.totalorder %s8353_s27, %s9546_s1 }
  0x17   :  { %p8359_p10 = pnand %p8357_p9, %p8354_p8 }
  0x19   :  { %8362 = shalt.err (!%p8359_p10)
}
  0x1a   :  { %s8363_s4 = scalar_lea.vmem %s28_s24, 49152  ;;  %p8368_p12 = scmp.lt.s32.totalorder %s28_s24, %s28_s24 }
  0x1b   :  { %p8364_p11 = scmp.ne.s32.totalorder %s28_s24, %s8363_s4  ;;  %p8369_p13 = scmp.lt.s32.totalorder %s8363_s4, %s8363_s4 }
  0x1d   :  { %p8370_p0 = por %p8369_p13, %p8368_p12 }
  0x1f   :  { %p8371_p1 = pnand %p8370_p0, %p8364_p11 }
  0x21   :  { %8374 = shalt.err (!%p8371_p1)
}
  0x22   :  { %s8407_s0 = smov 768   ;;  %s8408_s5 = smov 48  }
  0x23   :  { %33 = dma.hbm_to_vmem [thread:$0]  %s9546_s1, 49152, %s28_s24, [#allocation6], %s8407_s0, %s8407_s0, %s8408_s5  }
  0x24   :  { %8397 = dma.done.wait [#allocation3], 2048  }
  0x25   :  { %8398 = vsyncadd [#allocation3], 4294965248 }
  0x26   :  { %8399 = dma.done.wait [#allocation6], 49152  }
  0x27   :  { %8400 = vsyncadd [#allocation6], 4294918144  ;;  %v7459_v0 = vld [vmem:[#allocation5 + $0x4] ss:$48 sps:$4 sm:$0xff]   ;;  %v7461_v1 = vld [vmem:[#allocation5 + $0xc] ss:$48 sps:$4 sm:$0xff]  }
  0x28   :  { %2441 = vmatprep.subr.bf16.mxu0 %v7459_v0  ;;  %v7463_v2 = vld [vmem:[#allocation5] ss:$48 sps:$4 sm:$0xff]   ;;  %v7464_v3 = vld [vmem:[#allocation5 + $0x8] ss:$48 sps:$4 sm:$0xff]   ;;  %2587 = vmatprep.subr.bf16.mxu1 %v7461_v1  ;;  %v7465_v4 = vld [vmem:[#allocation5 + $0x64] ss:$48 sps:$4 sm:$0xff]  }
  0x29   :  { %2442 = vmatpush1.bf16.msra.mxu0 %v7463_v2  ;;  %2588 = vmatpush1.bf16.msra.mxu1 %v7464_v3  ;;  %v7467_v5 = vld [vmem:[#allocation5 + $0x6c] ss:$48 sps:$4 sm:$0xff]   ;;  %v7469_v6 = vld [vmem:[#allocation5 + $0x60] ss:$48 sps:$4 sm:$0xff]   ;;  %v7470_v7 = vld [vmem:[#allocation5 + $0x68] ss:$48 sps:$4 sm:$0xff]  }
  0x2a   :  { %2443 = vmatprep.subr.bf16.mxu0 %v7465_v4  ;;  %2589 = vmatprep.subr.bf16.mxu1 %v7467_v5  ;;  %v7471_v8 = vld [vmem:[#allocation5 + $0xc4] ss:$48 sps:$4 sm:$0xff]   ;;  %v7473_v9 = vld [vmem:[#allocation5 + $0xcc] ss:$48 sps:$4 sm:$0xff]   ;;  %v7475_v10 = vld [vmem:[#allocation5 + $0xc0] ss:$48 sps:$4 sm:$0xff]  }
  0x2b   :  { %v7476_v11 = vld [vmem:[#allocation5 + $0xc8] ss:$48 sps:$4 sm:$0xff]   ;;  %v7477_v12 = vld [vmem:[#allocation5 + $0x124] ss:$48 sps:$4 sm:$0xff]   ;;  %v7479_v13 = vld [vmem:[#allocation5 + $0x12c] ss:$48 sps:$4 sm:$0xff]  }
  0x2c   :  { %v7481_v14 = vld [vmem:[#allocation5 + $0x120] ss:$48 sps:$4 sm:$0xff]   ;;  %v7482_v15 = vld [vmem:[#allocation5 + $0x128] ss:$48 sps:$4 sm:$0xff]   ;;  %v7483_v16 = vld [vmem:[#allocation5 + $0x184] ss:$48 sps:$4 sm:$0xff]  }
  0x2d   :  { %2444 = vmatpush1.bf16.msra.mxu0 %v7469_v6  ;;  %2590 = vmatpush1.bf16.msra.mxu1 %v7470_v7  ;;  %v7485_v17 = vld [vmem:[#allocation5 + $0x18c] ss:$48 sps:$4 sm:$0xff]   ;;  %v7487_v18 = vld [vmem:[#allocation5 + $0x180] ss:$48 sps:$4 sm:$0xff]   ;;  %v7488_v19 = vld [vmem:[#allocation5 + $0x188] ss:$48 sps:$4 sm:$0xff]  }
  0x2e   :  { %2445 = vmatprep.subr.bf16.mxu0 %v7471_v8  ;;  %2591 = vmatprep.subr.bf16.mxu1 %v7473_v9  ;;  %v7489_v20 = vld [vmem:[#allocation5 + $0x1e4] ss:$48 sps:$4 sm:$0xff]   ;;  %v7491_v21 = vld [vmem:[#allocation5 + $0x1ec] ss:$48 sps:$4 sm:$0xff]   ;;  %v7493_v22 = vld [vmem:[#allocation5 + $0x1e0] ss:$48 sps:$4 sm:$0xff]  }
  0x2f   :  { %v7494_v23 = vld [vmem:[#allocation5 + $0x1e8] ss:$48 sps:$4 sm:$0xff]   ;;  %v7495_v24 = vld [vmem:[#allocation5 + $0x244] ss:$48 sps:$4 sm:$0xff]   ;;  %v7497_v25 = vld [vmem:[#allocation5 + $0x24c] ss:$48 sps:$4 sm:$0xff]  }
  0x30   :  { %v7499_v26 = vld [vmem:[#allocation5 + $0x240] ss:$48 sps:$4 sm:$0xff]   ;;  %v7500_v27 = vld [vmem:[#allocation5 + $0x248] ss:$48 sps:$4 sm:$0xff]   ;;  %v7501_v28 = vld [vmem:[#allocation5 + $0x2a4] ss:$48 sps:$4 sm:$0xff]  }
  0x31   :  { %2446 = vmatpush1.bf16.msra.mxu0 %v7475_v10  ;;  %2592 = vmatpush1.bf16.msra.mxu1 %v7476_v11  ;;  %v7503_v29 = vld [vmem:[#allocation5 + $0x2ac] ss:$48 sps:$4 sm:$0xff]   ;;  %v7505_v30 = vld [vmem:[#allocation5 + $0x2a0] ss:$48 sps:$4 sm:$0xff]   ;;  %v7506_v31 = vld [vmem:[#allocation5 + $0x2a8] ss:$48 sps:$4 sm:$0xff]  }
  0x32   :  { %2447 = vmatprep.subr.bf16.mxu0 %v7477_v12  ;;  %2593 = vmatprep.subr.bf16.mxu1 %v7479_v13  ;;  %v7507_v32 = vld [vmem:[#allocation5 + $0x304] ss:$48 sps:$4 sm:$0xff]   ;;  %v7509_v33 = vld [vmem:[#allocation5 + $0x30c] ss:$48 sps:$4 sm:$0xff]   ;;  %v7511_v34 = vld [vmem:[#allocation5 + $0x300] ss:$48 sps:$4 sm:$0xff]  }
  0x33   :  { %v7512_v35 = vld [vmem:[#allocation5 + $0x308] ss:$48 sps:$4 sm:$0xff]   ;;  %v7513_v36 = vld [vmem:[#allocation5 + $0x364] ss:$48 sps:$4 sm:$0xff]   ;;  %v7515_v37 = vld [vmem:[#allocation5 + $0x36c] ss:$48 sps:$4 sm:$0xff]  }
  0x34   :  { %v7517_v38 = vld [vmem:[#allocation5 + $0x360] ss:$48 sps:$4 sm:$0xff]   ;;  %v7518_v39 = vld [vmem:[#allocation5 + $0x368] ss:$48 sps:$4 sm:$0xff]   ;;  %v7519_v40 = vld [vmem:[#allocation5 + $0x3c4] ss:$48 sps:$4 sm:$0xff]  }
  0x35   :  { %2448 = vmatpush1.bf16.msra.mxu0 %v7481_v14  ;;  %2594 = vmatpush1.bf16.msra.mxu1 %v7482_v15  ;;  %v7521_v41 = vld [vmem:[#allocation5 + $0x3cc] ss:$48 sps:$4 sm:$0xff]   ;;  %v7523_v42 = vld [vmem:[#allocation5 + $0x3c0] ss:$48 sps:$4 sm:$0xff]   ;;  %v7524_v43 = vld [vmem:[#allocation5 + $0x3c8] ss:$48 sps:$4 sm:$0xff]  }
  0x36   :  { %2449 = vmatprep.subr.bf16.mxu0 %v7483_v16  ;;  %2595 = vmatprep.subr.bf16.mxu1 %v7485_v17  ;;  %v7525_v44 = vld [vmem:[#allocation5 + $0x424] ss:$48 sps:$4 sm:$0xff]   ;;  %v7527_v45 = vld [vmem:[#allocation5 + $0x42c] ss:$48 sps:$4 sm:$0xff]   ;;  %v7529_v46 = vld [vmem:[#allocation5 + $0x420] ss:$48 sps:$4 sm:$0xff]  }
  0x37   :  { %v8453_v47 = vld [vmem:[#allocation2 + $0x4] ss:$16 sps:$4 sm:$0xff]   ;;  %v7530_v48 = vld [vmem:[#allocation5 + $0x428] ss:$48 sps:$4 sm:$0xff]   ;;  %v7533_v50 = vld [vmem:[#allocation5 + $0x48c] ss:$48 sps:$4 sm:$0xff]  }
  0x38   :  { %v7531_v49 = vld [vmem:[#allocation5 + $0x484] ss:$48 sps:$4 sm:$0xff]   ;;  %2473 = vmatprep.mubr.bf16.mxu0 %v8453_v47  ;;  %2619 = vmatprep.mubr.bf16.mxu1 %v8453_v47  ;;  %v7535_v51 = vld [vmem:[#allocation5 + $0x480] ss:$48 sps:$4 sm:$0xff]   ;;  %v7536_v52 = vld [vmem:[#allocation5 + $0x488] ss:$48 sps:$4 sm:$0xff]  }
  0x39   :  { %2450 = vmatpush1.bf16.msra.mxu0 %v7487_v18  ;;  %2596 = vmatpush1.bf16.msra.mxu1 %v7488_v19  ;;  %v7537_v53 = vld [vmem:[#allocation5 + $0x4e4] ss:$48 sps:$4 sm:$0xff]   ;;  %v7539_v54 = vld [vmem:[#allocation5 + $0x4ec] ss:$48 sps:$4 sm:$0xff]   ;;  %v7541_v55 = vld [vmem:[#allocation5 + $0x4e0] ss:$48 sps:$4 sm:$0xff]  }
  0x3a   :  { %2451 = vmatprep.subr.bf16.mxu0 %v7489_v20  ;;  %2597 = vmatprep.subr.bf16.mxu1 %v7491_v21  ;;  %v7542_v56 = vld [vmem:[#allocation5 + $0x4e8] ss:$48 sps:$4 sm:$0xff]   ;;  %v7543_v57 = vld [vmem:[#allocation5 + $0x544] ss:$48 sps:$4 sm:$0xff]   ;;  %v7545_v58 = vld [vmem:[#allocation5 + $0x54c] ss:$48 sps:$4 sm:$0xff]  }
  0x3b   :  { %v7547_v59 = vld [vmem:[#allocation5 + $0x540] ss:$48 sps:$4 sm:$0xff]   ;;  %v7548_v60 = vld [vmem:[#allocation5 + $0x548] ss:$48 sps:$4 sm:$0xff]   ;;  %v7549_v61 = vld [vmem:[#allocation5 + $0x5a4] ss:$48 sps:$4 sm:$0xff]  }
  0x3c   :  { %v7551_v62 = vld [vmem:[#allocation5 + $0x5ac] ss:$48 sps:$4 sm:$0xff]   ;;  %v7553_v63 = vld [vmem:[#allocation5 + $0x5a0] ss:$48 sps:$4 sm:$0xff]   ;;  %v7554_v0 = vld [vmem:[#allocation5 + $0x5a8] ss:$48 sps:$4 sm:$0xff]  }
  0x3d   :  { %2452 = vmatpush1.bf16.msra.mxu0 %v7493_v22  ;;  %2598 = vmatpush1.bf16.msra.mxu1 %v7494_v23  ;;  %v7559_v1 = vld [vmem:[#allocation5 + $0x604] ss:$48 sps:$4 sm:$0xff]   ;;  %v7562_v2 = vld [vmem:[#allocation5 + $0x60c] ss:$48 sps:$4 sm:$0xff]   ;;  %v7557_v3 = vld [vmem:[#allocation5 + $0x600] ss:$48 sps:$4 sm:$0xff]  }
  0x3e   :  { %2453 = vmatprep.subr.bf16.mxu0 %v7495_v24  ;;  %2599 = vmatprep.subr.bf16.mxu1 %v7497_v25  ;;  %v7560_v4 = vld [vmem:[#allocation5 + $0x608] ss:$48 sps:$4 sm:$0xff]   ;;  %v8457_v5 = vld [vmem:[#allocation2] ss:$16 sps:$4 sm:$0xff]   ;;  %v7566_v6 = vld [vmem:[#allocation5 + $0x664] ss:$48 sps:$4 sm:$0xff]  }
  0x3f   :  { %v7569_v7 = vld [vmem:[#allocation5 + $0x66c] ss:$48 sps:$4 sm:$0xff]   ;;  %v7564_v8 = vld [vmem:[#allocation5 + $0x660] ss:$48 sps:$4 sm:$0xff]   ;;  %v7567_v9 = vld [vmem:[#allocation5 + $0x668] ss:$48 sps:$4 sm:$0xff]  }
  0x40   :  { %v7572_v10 = vld [vmem:[#allocation5 + $0x6c4] ss:$48 sps:$4 sm:$0xff]   ;;  %v7575_v11 = vld [vmem:[#allocation5 + $0x6cc] ss:$48 sps:$4 sm:$0xff]   ;;  %v7570_v12 = vld [vmem:[#allocation5 + $0x6c0] ss:$48 sps:$4 sm:$0xff]  }
  0x41   :  { %2454 = vmatpush1.bf16.msra.mxu0 %v7499_v26  ;;  %2600 = vmatpush1.bf16.msra.mxu1 %v7500_v27  ;;  %v7573_v13 = vld [vmem:[#allocation5 + $0x6c8] ss:$48 sps:$4 sm:$0xff]   ;;  %v8461_v14 = vld [vmem:[#allocation2 + $0x24] ss:$16 sps:$4 sm:$0xff]   ;;  %v8463_v15 = vld [vmem:[#allocation2 + $0x20] ss:$16 sps:$4 sm:$0xff]  }
  0x42   :  { %2455 = vmatprep.subr.bf16.mxu0 %v7501_v28  ;;  %2601 = vmatprep.subr.bf16.mxu1 %v7503_v29  ;;  %v7578_v16 = vld [vmem:[#allocation5 + $0x724] ss:$48 sps:$4 sm:$0xff]   ;;  %v7581_v17 = vld [vmem:[#allocation5 + $0x72c] ss:$48 sps:$4 sm:$0xff]   ;;  %v7576_v18 = vld [vmem:[#allocation5 + $0x720] ss:$48 sps:$4 sm:$0xff]  }
  0x43   :  { %v7579_v19 = vld [vmem:[#allocation5 + $0x728] ss:$48 sps:$4 sm:$0xff]   ;;  %v7584_v20 = vld [vmem:[#allocation5 + $0x784] ss:$48 sps:$4 sm:$0xff]   ;;  %v7587_v21 = vld [vmem:[#allocation5 + $0x78c] ss:$48 sps:$4 sm:$0xff]  }
  0x44   :  { %v7582_v22 = vld [vmem:[#allocation5 + $0x780] ss:$48 sps:$4 sm:$0xff]   ;;  %v8469_v23 = vld [vmem:[#allocation2 + $0x44] ss:$16 sps:$4 sm:$0xff]   ;;  %v7585_v24 = vld [vmem:[#allocation5 + $0x788] ss:$48 sps:$4 sm:$0xff]  }
  0x45   :  { %2456 = vmatpush1.bf16.msra.mxu0 %v7505_v30  ;;  %2602 = vmatpush1.bf16.msra.mxu1 %v7506_v31  ;;  %v8471_v25 = vld [vmem:[#allocation2 + $0x40] ss:$16 sps:$4 sm:$0xff]   ;;  %v7590_v26 = vld [vmem:[#allocation5 + $0x7e4] ss:$48 sps:$4 sm:$0xff]   ;;  %v7593_v27 = vld [vmem:[#allocation5 + $0x7ec] ss:$48 sps:$4 sm:$0xff]  }
  0x46   :  { %2457 = vmatprep.subr.bf16.mxu0 %v7507_v32  ;;  %2603 = vmatprep.subr.bf16.mxu1 %v7509_v33  ;;  %v7588_v28 = vld [vmem:[#allocation5 + $0x7e0] ss:$48 sps:$4 sm:$0xff]   ;;  %v7591_v29 = vld [vmem:[#allocation5 + $0x7e8] ss:$48 sps:$4 sm:$0xff]   ;;  %v7596_v30 = vld [vmem:[#allocation5 + $0x844] ss:$48 sps:$4 sm:$0xff]  }
  0x47   :  { %v8477_v31 = vld [vmem:[#allocation2 + $0x64] ss:$16 sps:$4 sm:$0xff]   ;;  %v7599_v32 = vld [vmem:[#allocation5 + $0x84c] ss:$48 sps:$4 sm:$0xff]   ;;  %v7594_v33 = vld [vmem:[#allocation5 + $0x840] ss:$48 sps:$4 sm:$0xff]  }
  0x48   :  { %vm3344_vm0 = vcmask 523264   ;;  %vm3483_vm4 = vcmask 261120   ;;  %s8410_s1 = smov 64   ;;  %s8411_s8 = smov [#allocation7]  }
  0x49   :  { %2458 = vmatpush1.bf16.msra.mxu0 %v7511_v34  ;;  %2604 = vmatpush1.bf16.msra.mxu1 %v7512_v35  ;;  %v7597_v34 = vld [vmem:[#allocation5 + $0x848] ss:$48 sps:$4 sm:$0xff]   ;;  %v8481_v35 = vld [vmem:[#allocation2 + $0x60] ss:$16 sps:$4 sm:$0xff]   ;;  %s6459_s9 = sshll.u32 %s8411_s8, 4  ;;  %s6460_s9 = int_to_ptr.vmem [resolvable:$true] %s6459_s9 }
  0x4a   :  { %2459 = vmatprep.subr.bf16.mxu0 %v7513_v36  ;;  %2605 = vmatprep.subr.bf16.mxu1 %v7515_v37  ;;  %v7602_v36 = vld [vmem:[#allocation5 + $0x8a4] ss:$48 sps:$4 sm:$0xff]   ;;  %v7605_v37 = vld [vmem:[#allocation5 + $0x8ac] ss:$48 sps:$4 sm:$0xff]   ;;  %s8375_s10 = scalar_lea.vmem %s6460_s9, 4096  ;;  %p8380_p3 = scmp.lt.s32.totalorder %s6460_s9, %s6460_s9 }
  0x4b   :  { %p8376_p2 = scmp.ne.s32.totalorder %s6460_s9, %s8375_s10  ;;  %p8381_p4 = scmp.lt.s32.totalorder %s8375_s10, %s8375_s10 }
  0x4d   :  { %2460 = vmatpush1.bf16.msra.mxu0 %v7517_v38  ;;  %2606 = vmatpush1.bf16.msra.mxu1 %v7518_v39  ;;  %v7600_v38 = vld [vmem:[#allocation5 + $0x8a0] ss:$48 sps:$4 sm:$0xff]   ;;  %v7603_v39 = vld [vmem:[#allocation5 + $0x8a8] ss:$48 sps:$4 sm:$0xff]   ;;  %p8382_p5 = por %p8381_p4, %p8380_p3 }
  0x4e   :  { %2461 = vmatprep.subr.bf16.mxu0 %v7519_v40  ;;  %2607 = vmatprep.subr.bf16.mxu1 %v7521_v41  ;;  %v8485_v40 = vld [vmem:[#allocation2 + $0xc] ss:$16 sps:$4 sm:$0xff]   ;;  %v7608_v41 = vld [vmem:[#allocation5 + $0x904] ss:$48 sps:$4 sm:$0xff]  }
  0x4f   :  { %p8383_p6 = pnand %p8382_p5, %p8376_p2 }
  0x51   :  { %2462 = vmatpush1.bf16.msra.mxu0 %v7523_v42  ;;  %2608 = vmatpush1.bf16.msra.mxu1 %v7524_v43  ;;  %v7611_v42 = vld [vmem:[#allocation5 + $0x90c] ss:$48 sps:$4 sm:$0xff]   ;;  %v7606_v43 = vld [vmem:[#allocation5 + $0x900] ss:$48 sps:$4 sm:$0xff]  }
  0x52   :  { %2463 = vmatprep.subr.bf16.mxu0 %v7525_v44  ;;  %2609 = vmatprep.subr.bf16.mxu1 %v7527_v45  ;;  %v7609_v44 = vld [vmem:[#allocation5 + $0x908] ss:$48 sps:$4 sm:$0xff]   ;;  %v7614_v45 = vld [vmem:[#allocation5 + $0x964] ss:$48 sps:$4 sm:$0xff]  }
  0x55   :  { %2464 = vmatpush1.bf16.msra.mxu0 %v7529_v46  ;;  %2610 = vmatpush1.bf16.msra.mxu1 %v7530_v48  ;;  %v7617_v46 = vld [vmem:[#allocation5 + $0x96c] ss:$48 sps:$4 sm:$0xff]   ;;  %v7612_v48 = vld [vmem:[#allocation5 + $0x960] ss:$48 sps:$4 sm:$0xff]  }
  0x56   :  { %2465 = vmatprep.subr.bf16.mxu0 %v7531_v49  ;;  %2611 = vmatprep.subr.bf16.mxu1 %v7533_v50  ;;  %v7615_v49 = vld [vmem:[#allocation5 + $0x968] ss:$48 sps:$4 sm:$0xff]   ;;  %v7623_v50 = vld [vmem:[#allocation5 + $0x9c4] ss:$48 sps:$4 sm:$0xff]  }
  0x59   :  { %2466 = vmatpush1.bf16.msra.mxu0 %v7535_v51  ;;  %2612 = vmatpush1.bf16.msra.mxu1 %v7536_v52  ;;  %v7626_v51 = vld [vmem:[#allocation5 + $0x9cc] ss:$48 sps:$4 sm:$0xff]   ;;  %v7621_v52 = vld [vmem:[#allocation5 + $0x9c0] ss:$48 sps:$4 sm:$0xff]  }
  0x5a   :  { %2467 = vmatprep.subr.bf16.mxu0 %v7537_v53  ;;  %2613 = vmatprep.subr.bf16.mxu1 %v7539_v54  ;;  %v7624_v53 = vld [vmem:[#allocation5 + $0x9c8] ss:$48 sps:$4 sm:$0xff]   ;;  %v7629_v54 = vld [vmem:[#allocation5 + $0xa24] ss:$48 sps:$4 sm:$0xff]  }
  0x5d   :  { %2468 = vmatpush1.bf16.msra.mxu0 %v7541_v55  ;;  %2614 = vmatpush1.bf16.msra.mxu1 %v7542_v56  ;;  %v7632_v55 = vld [vmem:[#allocation5 + $0xa2c] ss:$48 sps:$4 sm:$0xff]   ;;  %v7627_v56 = vld [vmem:[#allocation5 + $0xa20] ss:$48 sps:$4 sm:$0xff]  }
  0x5e   :  { %2469 = vmatprep.subr.bf16.mxu0 %v7543_v57  ;;  %2615 = vmatprep.subr.bf16.mxu1 %v7545_v58  ;;  %v7630_v57 = vld [vmem:[#allocation5 + $0xa28] ss:$48 sps:$4 sm:$0xff]   ;;  %v7638_v58 = vld [vmem:[#allocation5 + $0xa84] ss:$48 sps:$4 sm:$0xff]  }
  0x61   :  { %2470 = vmatpush1.bf16.msra.mxu0 %v7547_v59  ;;  %2616 = vmatpush1.bf16.msra.mxu1 %v7548_v60  ;;  %v7641_v59 = vld [vmem:[#allocation5 + $0xa8c] ss:$48 sps:$4 sm:$0xff]   ;;  %v7636_v60 = vld [vmem:[#allocation5 + $0xa80] ss:$48 sps:$4 sm:$0xff]  }
  0x62   :  { %2471 = vmatprep.subr.bf16.mxu0 %v7549_v61  ;;  %2617 = vmatprep.subr.bf16.mxu1 %v7551_v62  ;;  %v7639_v61 = vld [vmem:[#allocation5 + $0xa88] ss:$48 sps:$4 sm:$0xff]   ;;  %v7644_v62 = vld [vmem:[#allocation5 + $0xae4] ss:$48 sps:$4 sm:$0xff]  }
  0x65   :  { %2472 = vmatpush1.bf16.msra.mxu0 %v7553_v63  ;;  %2618 = vmatpush1.bf16.msra.mxu1 %v7554_v0  ;;  %v7647_v63 = vld [vmem:[#allocation5 + $0xaec] ss:$48 sps:$4 sm:$0xff]   ;;  %v7642_v0 = vld [vmem:[#allocation5 + $0xae0] ss:$48 sps:$4 sm:$0xff]  }
  0x66   :  { %2514 = vmatprep.subr.bf16.mxu0 %v7559_v1  ;;  %2660 = vmatprep.subr.bf16.mxu1 %v7562_v2  ;;  %v7645_v1 = vld [vmem:[#allocation5 + $0xae8] ss:$48 sps:$4 sm:$0xff]   ;;  %v7653_v2 = vld [vmem:[#allocation5 + $0xb44] ss:$48 sps:$4 sm:$0xff]  }
  0x68   :  { %2474 = vmatmul.mubr.bf16.vlgmr.msra.gmra.mrb[0].mxu0 %v8457_v5  ;;  %2620 = vmatmul.mubr.bf16.vlgmr.msra.gmra.mrb[0].mxu1 %v8457_v5 }
  0x69   :  { %2515 = vmatpush1.bf16.msra.mxu0 %v7557_v3  ;;  %2661 = vmatpush1.bf16.msra.mxu1 %v7560_v4  ;;  %v7656_v3 = vld [vmem:[#allocation5 + $0xb4c] ss:$48 sps:$4 sm:$0xff]   ;;  %v7651_v4 = vld [vmem:[#allocation5 + $0xb40] ss:$48 sps:$4 sm:$0xff]  }
  0x6a   :  { %2516 = vmatprep.subr.bf16.mxu0 %v7566_v6  ;;  %2662 = vmatprep.subr.bf16.mxu1 %v7569_v7  ;;  %v7654_v6 = vld [vmem:[#allocation5 + $0xb48] ss:$48 sps:$4 sm:$0xff]   ;;  %v7659_v7 = vld [vmem:[#allocation5 + $0xba4] ss:$48 sps:$4 sm:$0xff]  }
  0x6b   :  { %2483 = vmatprep.mubr.bf16.mxu0 %v8461_v14  ;;  %2629 = vmatprep.mubr.bf16.mxu1 %v8461_v14 }
  0x6d   :  { %2517 = vmatpush1.bf16.msra.mxu0 %v7564_v8  ;;  %2663 = vmatpush1.bf16.msra.mxu1 %v7567_v9  ;;  %v7662_v8 = vld [vmem:[#allocation5 + $0xbac] ss:$48 sps:$4 sm:$0xff]   ;;  %v7657_v9 = vld [vmem:[#allocation5 + $0xba0] ss:$48 sps:$4 sm:$0xff]  }
  0x6e   :  { %2518 = vmatprep.subr.bf16.mxu0 %v7572_v10  ;;  %2664 = vmatprep.subr.bf16.mxu1 %v7575_v11  ;;  %v7660_v10 = vld [vmem:[#allocation5 + $0xba8] ss:$48 sps:$4 sm:$0xff]   ;;  %v7668_v11 = vld [vmem:[#allocation5 + $0x14] ss:$48 sps:$4 sm:$0xff]  }
  0x70   :  { %2484 = vmatmul.mubr.bf16.gmra.mrb[4].mxu0 %v8463_v15  ;;  %2630 = vmatmul.mubr.bf16.gmra.mrb[4].mxu1 %v8463_v15 }
  0x71   :  { %2519 = vmatpush1.bf16.msra.mxu0 %v7570_v12  ;;  %2665 = vmatpush1.bf16.msra.mxu1 %v7573_v13  ;;  %v7671_v12 = vld [vmem:[#allocation5 + $0x1c] ss:$48 sps:$4 sm:$0xff]   ;;  %v8489_v13 = vld [vmem:[#allocation2 + $0x8] ss:$16 sps:$4 sm:$0xff]  }
  0x72   :  { %2520 = vmatprep.subr.bf16.mxu0 %v7578_v16  ;;  %2666 = vmatprep.subr.bf16.mxu1 %v7581_v17  ;;  %v7666_v16 = vld [vmem:[#allocation5 + $0x10] ss:$48 sps:$4 sm:$0xff]   ;;  %v7669_v17 = vld [vmem:[#allocation5 + $0x18] ss:$48 sps:$4 sm:$0xff]  }
  0x73   :  { %2493 = vmatprep.mubr.bf16.mxu0 %v8469_v23  ;;  %2639 = vmatprep.mubr.bf16.mxu1 %v8469_v23 }
  0x75   :  { %2521 = vmatpush1.bf16.msra.mxu0 %v7576_v18  ;;  %2667 = vmatpush1.bf16.msra.mxu1 %v7579_v19  ;;  %v7674_v18 = vld [vmem:[#allocation5 + $0x74] ss:$48 sps:$4 sm:$0xff]   ;;  %v7677_v19 = vld [vmem:[#allocation5 + $0x7c] ss:$48 sps:$4 sm:$0xff]  }
  0x76   :  { %2522 = vmatprep.subr.bf16.mxu0 %v7584_v20  ;;  %2668 = vmatprep.subr.bf16.mxu1 %v7587_v21  ;;  %v8491_v20 = vld [vmem:[#allocation2 + $0x2c] ss:$16 sps:$4 sm:$0xff]   ;;  %v7672_v21 = vld [vmem:[#allocation5 + $0x70] ss:$48 sps:$4 sm:$0xff]  }
  0x78   :  { %2494 = vmatmul.mubr.bf16.gmra.mrb[8].mxu0 %v8471_v25  ;;  %2640 = vmatmul.mubr.bf16.gmra.mrb[8].mxu1 %v8471_v25 }
  0x79   :  { %2523 = vmatpush1.bf16.msra.mxu0 %v7582_v22  ;;  %2669 = vmatpush1.bf16.msra.mxu1 %v7585_v24  ;;  %v7675_v22 = vld [vmem:[#allocation5 + $0x78] ss:$48 sps:$4 sm:$0xff]   ;;  %v7683_v24 = vld [vmem:[#allocation5 + $0xd4] ss:$48 sps:$4 sm:$0xff]  }
  0x7a   :  { %2524 = vmatprep.subr.bf16.mxu0 %v7590_v26  ;;  %2670 = vmatprep.subr.bf16.mxu1 %v7593_v27  ;;  %v7686_v26 = vld [vmem:[#allocation5 + $0xdc] ss:$48 sps:$4 sm:$0xff]   ;;  %v8496_v27 = vld [vmem:[#allocation2 + $0x28] ss:$16 sps:$4 sm:$0xff]  }
  0x7b   :  { %2503 = vmatprep.mubr.bf16.mxu0 %v8477_v31  ;;  %2649 = vmatprep.mubr.bf16.mxu1 %v8477_v31 }
  0x7d   :  { %2525 = vmatpush1.bf16.msra.mxu0 %v7588_v28  ;;  %2671 = vmatpush1.bf16.msra.mxu1 %v7591_v29  ;;  %v7681_v28 = vld [vmem:[#allocation5 + $0xd0] ss:$48 sps:$4 sm:$0xff]   ;;  %v7684_v29 = vld [vmem:[#allocation5 + $0xd8] ss:$48 sps:$4 sm:$0xff]  }
  0x7e   :  { %2526 = vmatprep.subr.bf16.mxu0 %v7596_v30  ;;  %2672 = vmatprep.subr.bf16.mxu1 %v7599_v32  ;;  %v7689_v30 = vld [vmem:[#allocation5 + $0x134] ss:$48 sps:$4 sm:$0xff]   ;;  %v7692_v32 = vld [vmem:[#allocation5 + $0x13c] ss:$48 sps:$4 sm:$0xff]  }
  0x80   :  { %2504 = vmatmul.mubr.bf16.gmra.mrb[12].mxu0 %v8481_v35  ;;  %2650 = vmatmul.mubr.bf16.gmra.mrb[12].mxu1 %v8481_v35 }
  0x81   :  { %2527 = vmatpush1.bf16.msra.mxu0 %v7594_v33  ;;  %2673 = vmatpush1.bf16.msra.mxu1 %v7597_v34  ;;  %v8499_v33 = vld [vmem:[#allocation2 + $0x4c] ss:$16 sps:$4 sm:$0xff]   ;;  %v7687_v34 = vld [vmem:[#allocation5 + $0x130] ss:$48 sps:$4 sm:$0xff]  }
  0x82   :  { %2528 = vmatprep.subr.bf16.mxu0 %v7602_v36  ;;  %2674 = vmatprep.subr.bf16.mxu1 %v7605_v37  ;;  %v7690_v36 = vld [vmem:[#allocation5 + $0x138] ss:$48 sps:$4 sm:$0xff]   ;;  %v7698_v37 = vld [vmem:[#allocation5 + $0x194] ss:$48 sps:$4 sm:$0xff]  }
  0x83   :  { %2546 = vmatprep.mubr.bf16.mxu0 %v8485_v40  ;;  %2692 = vmatprep.mubr.bf16.mxu1 %v8485_v40 }
  0x85   :  { %2529 = vmatpush1.bf16.msra.mxu0 %v7600_v38  ;;  %2675 = vmatpush1.bf16.msra.mxu1 %v7603_v39  ;;  %v7701_v38 = vld [vmem:[#allocation5 + $0x19c] ss:$48 sps:$4 sm:$0xff]   ;;  %v8504_v39 = vld [vmem:[#allocation2 + $0x48] ss:$16 sps:$4 sm:$0xff]  }
  0x86   :  { %2530 = vmatprep.subr.bf16.mxu0 %v7608_v41  ;;  %2676 = vmatprep.subr.bf16.mxu1 %v7611_v42  ;;  %v7696_v41 = vld [vmem:[#allocation5 + $0x190] ss:$48 sps:$4 sm:$0xff]   ;;  %v7699_v42 = vld [vmem:[#allocation5 + $0x198] ss:$48 sps:$4 sm:$0xff]  }
  0x89   :  { %2531 = vmatpush1.bf16.msra.mxu0 %v7606_v43  ;;  %2677 = vmatpush1.bf16.msra.mxu1 %v7609_v44  ;;  %v7704_v43 = vld [vmem:[#allocation5 + $0x1f4] ss:$48 sps:$4 sm:$0xff]   ;;  %v7707_v44 = vld [vmem:[#allocation5 + $0x1fc] ss:$48 sps:$4 sm:$0xff]  }
  0x8a   :  { %2532 = vmatprep.subr.bf16.mxu0 %v7614_v45  ;;  %2678 = vmatprep.subr.bf16.mxu1 %v7617_v46  ;;  %v8507_v45 = vld [vmem:[#allocation2 + $0x6c] ss:$16 sps:$4 sm:$0xff]   ;;  %v7702_v46 = vld [vmem:[#allocation5 + $0x1f0] ss:$48 sps:$4 sm:$0xff]  }
  0x8d   :  { %2533 = vmatpush1.bf16.msra.mxu0 %v7612_v48  ;;  %2679 = vmatpush1.bf16.msra.mxu1 %v7615_v49  ;;  %v7705_v48 = vld [vmem:[#allocation5 + $0x1f8] ss:$48 sps:$4 sm:$0xff]   ;;  %v7713_v49 = vld [vmem:[#allocation5 + $0x254] ss:$48 sps:$4 sm:$0xff]  }
  0x8e   :  { %2534 = vmatprep.subr.bf16.mxu0 %v7623_v50  ;;  %2680 = vmatprep.subr.bf16.mxu1 %v7626_v51  ;;  %v7716_v50 = vld [vmem:[#allocation5 + $0x25c] ss:$48 sps:$4 sm:$0xff]   ;;  %v8512_v51 = vld [vmem:[#allocation2 + $0x68] ss:$16 sps:$4 sm:$0xff]  }
  0x91   :  { %2535 = vmatpush1.bf16.msra.mxu0 %v7621_v52  ;;  %2681 = vmatpush1.bf16.msra.mxu1 %v7624_v53  ;;  %v7711_v52 = vld [vmem:[#allocation5 + $0x250] ss:$48 sps:$4 sm:$0xff]   ;;  %v7714_v53 = vld [vmem:[#allocation5 + $0x258] ss:$48 sps:$4 sm:$0xff]  }
  0x92   :  { %2536 = vmatprep.subr.bf16.mxu0 %v7629_v54  ;;  %2682 = vmatprep.subr.bf16.mxu1 %v7632_v55  ;;  %v7719_v54 = vld [vmem:[#allocation5 + $0x2b4] ss:$48 sps:$4 sm:$0xff]   ;;  %v7722_v55 = vld [vmem:[#allocation5 + $0x2bc] ss:$48 sps:$4 sm:$0xff]  }
  0x95   :  { %2537 = vmatpush1.bf16.msra.mxu0 %v7627_v56  ;;  %2683 = vmatpush1.bf16.msra.mxu1 %v7630_v57  ;;  %v7717_v56 = vld [vmem:[#allocation5 + $0x2b0] ss:$48 sps:$4 sm:$0xff]   ;;  %v7720_v57 = vld [vmem:[#allocation5 + $0x2b8] ss:$48 sps:$4 sm:$0xff]  }
  0x96   :  { %2538 = vmatprep.subr.bf16.mxu0 %v7638_v58  ;;  %2684 = vmatprep.subr.bf16.mxu1 %v7641_v59  ;;  %v7725_v58 = vld [vmem:[#allocation5 + $0x314] ss:$48 sps:$4 sm:$0xff]   ;;  %v7728_v59 = vld [vmem:[#allocation5 + $0x31c] ss:$48 sps:$4 sm:$0xff]  }
  0x99   :  { %2539 = vmatpush1.bf16.msra.mxu0 %v7636_v60  ;;  %2685 = vmatpush1.bf16.msra.mxu1 %v7639_v61  ;;  %v7723_v60 = vld [vmem:[#allocation5 + $0x310] ss:$48 sps:$4 sm:$0xff]   ;;  %v7726_v61 = vld [vmem:[#allocation5 + $0x318] ss:$48 sps:$4 sm:$0xff]  }
  0x9a   :  { %2540 = vmatprep.subr.bf16.mxu0 %v7644_v62  ;;  %2686 = vmatprep.subr.bf16.mxu1 %v7647_v63  ;;  %v7731_v62 = vld [vmem:[#allocation5 + $0x374] ss:$48 sps:$4 sm:$0xff]   ;;  %v7734_v63 = vld [vmem:[#allocation5 + $0x37c] ss:$48 sps:$4 sm:$0xff]  }
  0x9d   :  { %2541 = vmatpush1.bf16.msra.mxu0 %v7642_v0  ;;  %2687 = vmatpush1.bf16.msra.mxu1 %v7645_v1  ;;  %v7729_v0 = vld [vmem:[#allocation5 + $0x370] ss:$48 sps:$4 sm:$0xff]   ;;  %v7732_v1 = vld [vmem:[#allocation5 + $0x378] ss:$48 sps:$4 sm:$0xff]  }
  0x9e   :  { %2542 = vmatprep.subr.bf16.mxu0 %v7653_v2  ;;  %2688 = vmatprep.subr.bf16.mxu1 %v7656_v3  ;;  %v7737_v2 = vld [vmem:[#allocation5 + $0x3d4] ss:$48 sps:$4 sm:$0xff]   ;;  %v7740_v3 = vld [vmem:[#allocation5 + $0x3dc] ss:$48 sps:$4 sm:$0xff]  }
  0xa1   :  { %2543 = vmatpush1.bf16.msra.mxu0 %v7651_v4  ;;  %2689 = vmatpush1.bf16.msra.mxu1 %v7654_v6  ;;  %v7735_v4 = vld [vmem:[#allocation5 + $0x3d0] ss:$48 sps:$4 sm:$0xff]   ;;  %v7738_v6 = vld [vmem:[#allocation5 + $0x3d8] ss:$48 sps:$4 sm:$0xff]  }
  0xa2   :  { %2544 = vmatprep.subr.bf16.mxu0 %v7659_v7  ;;  %2690 = vmatprep.subr.bf16.mxu1 %v7662_v8  ;;  %v7746_v7 = vld [vmem:[#allocation5 + $0x43c] ss:$48 sps:$4 sm:$0xff]   ;;  %v7741_v8 = vld [vmem:[#allocation5 + $0x430] ss:$48 sps:$4 sm:$0xff]  }
  0xa5   :  { %2545 = vmatpush1.bf16.msra.mxu0 %v7657_v9  ;;  %2691 = vmatpush1.bf16.msra.mxu1 %v7660_v10  ;;  %v7744_v9 = vld [vmem:[#allocation5 + $0x438] ss:$48 sps:$4 sm:$0xff]   ;;  %v7749_v10 = vld [vmem:[#allocation5 + $0x494] ss:$48 sps:$4 sm:$0xff]  }
  0xa6   :  { %2733 = vmatprep.subr.bf16.mxu0 %v7668_v11  ;;  %2879 = vmatprep.subr.bf16.mxu1 %v7671_v12  ;;  %v7752_v11 = vld [vmem:[#allocation5 + $0x49c] ss:$48 sps:$4 sm:$0xff]   ;;  %v7747_v12 = vld [vmem:[#allocation5 + $0x490] ss:$48 sps:$4 sm:$0xff]  }
  0xa8   :  { %2547 = vmatmul.mubr.bf16.vlgmr.msra.gmra.mrb[0].mxu0 %v8489_v13  ;;  %2693 = vmatmul.mubr.bf16.vlgmr.msra.gmra.mrb[0].mxu1 %v8489_v13 }
  0xa9   :  { %2734 = vmatpush1.bf16.msra.mxu0 %v7666_v16  ;;  %2880 = vmatpush1.bf16.msra.mxu1 %v7669_v17  ;;  %v7750_v16 = vld [vmem:[#allocation5 + $0x498] ss:$48 sps:$4 sm:$0xff]   ;;  %v7755_v17 = vld [vmem:[#allocation5 + $0x4f4] ss:$48 sps:$4 sm:$0xff]  }
  0xaa   :  { %2735 = vmatprep.subr.bf16.mxu0 %v7674_v18  ;;  %2881 = vmatprep.subr.bf16.mxu1 %v7677_v19  ;;  %v7758_v18 = vld [vmem:[#allocation5 + $0x4fc] ss:$48 sps:$4 sm:$0xff]   ;;  %v7753_v19 = vld [vmem:[#allocation5 + $0x4f0] ss:$48 sps:$4 sm:$0xff]  }
  0xab   :  { %2556 = vmatprep.mubr.bf16.mxu0 %v8491_v20  ;;  %2702 = vmatprep.mubr.bf16.mxu1 %v8491_v20 }
  0xad   :  { %2736 = vmatpush1.bf16.msra.mxu0 %v7672_v21  ;;  %2882 = vmatpush1.bf16.msra.mxu1 %v7675_v22  ;;  %v7756_v21 = vld [vmem:[#allocation5 + $0x4f8] ss:$48 sps:$4 sm:$0xff]   ;;  %v7761_v22 = vld [vmem:[#allocation5 + $0x554] ss:$48 sps:$4 sm:$0xff]  }
  0xae   :  { %2737 = vmatprep.subr.bf16.mxu0 %v7683_v24  ;;  %2883 = vmatprep.subr.bf16.mxu1 %v7686_v26  ;;  %v7764_v24 = vld [vmem:[#allocation5 + $0x55c] ss:$48 sps:$4 sm:$0xff]   ;;  %v7759_v26 = vld [vmem:[#allocation5 + $0x550] ss:$48 sps:$4 sm:$0xff]  }
  0xb0   :  { %2557 = vmatmul.mubr.bf16.gmra.mrb[4].mxu0 %v8496_v27  ;;  %2703 = vmatmul.mubr.bf16.gmra.mrb[4].mxu1 %v8496_v27 }
  0xb1   :  { %2738 = vmatpush1.bf16.msra.mxu0 %v7681_v28  ;;  %2884 = vmatpush1.bf16.msra.mxu1 %v7684_v29  ;;  %v7762_v28 = vld [vmem:[#allocation5 + $0x558] ss:$48 sps:$4 sm:$0xff]   ;;  %v7767_v29 = vld [vmem:[#allocation5 + $0x5b4] ss:$48 sps:$4 sm:$0xff]  }
  0xb2   :  { %2739 = vmatprep.subr.bf16.mxu0 %v7689_v30  ;;  %2885 = vmatprep.subr.bf16.mxu1 %v7692_v32  ;;  %v7770_v30 = vld [vmem:[#allocation5 + $0x5bc] ss:$48 sps:$4 sm:$0xff]   ;;  %v7765_v32 = vld [vmem:[#allocation5 + $0x5b0] ss:$48 sps:$4 sm:$0xff]  }
  0xb3   :  { %2566 = vmatprep.mubr.bf16.mxu0 %v8499_v33  ;;  %2712 = vmatprep.mubr.bf16.mxu1 %v8499_v33 }
  0xb5   :  { %2740 = vmatpush1.bf16.msra.mxu0 %v7687_v34  ;;  %2886 = vmatpush1.bf16.msra.mxu1 %v7690_v36  ;;  %v7768_v34 = vld [vmem:[#allocation5 + $0x5b8] ss:$48 sps:$4 sm:$0xff]   ;;  %v7773_v36 = vld [vmem:[#allocation5 + $0x614] ss:$48 sps:$4 sm:$0xff]  }
  0xb6   :  { %2741 = vmatprep.subr.bf16.mxu0 %v7698_v37  ;;  %2887 = vmatprep.subr.bf16.mxu1 %v7701_v38  ;;  %v7776_v37 = vld [vmem:[#allocation5 + $0x61c] ss:$48 sps:$4 sm:$0xff]   ;;  %v7771_v38 = vld [vmem:[#allocation5 + $0x610] ss:$48 sps:$4 sm:$0xff]  }
  0xb8   :  { %2567 = vmatmul.mubr.bf16.gmra.mrb[8].mxu0 %v8504_v39  ;;  %2713 = vmatmul.mubr.bf16.gmra.mrb[8].mxu1 %v8504_v39 }
  0xb9   :  { %2742 = vmatpush1.bf16.msra.mxu0 %v7696_v41  ;;  %2888 = vmatpush1.bf16.msra.mxu1 %v7699_v42  ;;  %v7774_v41 = vld [vmem:[#allocation5 + $0x618] ss:$48 sps:$4 sm:$0xff]   ;;  %v7779_v42 = vld [vmem:[#allocation5 + $0x674] ss:$48 sps:$4 sm:$0xff]  }
  0xba   :  { %2743 = vmatprep.subr.bf16.mxu0 %v7704_v43  ;;  %2889 = vmatprep.subr.bf16.mxu1 %v7707_v44  ;;  %v7782_v43 = vld [vmem:[#allocation5 + $0x67c] ss:$48 sps:$4 sm:$0xff]   ;;  %v7777_v44 = vld [vmem:[#allocation5 + $0x670] ss:$48 sps:$4 sm:$0xff]  }
  0xbb   :  { %2576 = vmatprep.mubr.bf16.mxu0 %v8507_v45  ;;  %2722 = vmatprep.mubr.bf16.mxu1 %v8507_v45 }
  0xbd   :  { %2744 = vmatpush1.bf16.msra.mxu0 %v7702_v46  ;;  %2890 = vmatpush1.bf16.msra.mxu1 %v7705_v48  ;;  %v7780_v46 = vld [vmem:[#allocation5 + $0x678] ss:$48 sps:$4 sm:$0xff]   ;;  %v7785_v48 = vld [vmem:[#allocation5 + $0x6d4] ss:$48 sps:$4 sm:$0xff]  }
  0xbe   :  { %2745 = vmatprep.subr.bf16.mxu0 %v7713_v49  ;;  %2891 = vmatprep.subr.bf16.mxu1 %v7716_v50  ;;  %v7788_v49 = vld [vmem:[#allocation5 + $0x6dc] ss:$48 sps:$4 sm:$0xff]   ;;  %v7783_v50 = vld [vmem:[#allocation5 + $0x6d0] ss:$48 sps:$4 sm:$0xff]  }
  0xc0   :  { %2577 = vmatmul.mubr.bf16.gmra.mrb[12].mxu0 %v8512_v51  ;;  %2723 = vmatmul.mubr.bf16.gmra.mrb[12].mxu1 %v8512_v51 }
  0xc1   :  { %2746 = vmatpush1.bf16.msra.mxu0 %v7711_v52  ;;  %2892 = vmatpush1.bf16.msra.mxu1 %v7714_v53  ;;  %v7786_v52 = vld [vmem:[#allocation5 + $0x6d8] ss:$48 sps:$4 sm:$0xff]   ;;  %v7791_v53 = vld [vmem:[#allocation5 + $0x734] ss:$48 sps:$4 sm:$0xff]  }
  0xc2   :  { %2747 = vmatprep.subr.bf16.mxu0 %v7719_v54  ;;  %2893 = vmatprep.subr.bf16.mxu1 %v7722_v55  ;;  %v7789_v54 = vld [vmem:[#allocation5 + $0x730] ss:$48 sps:$4 sm:$0xff]   ;;  %v7792_v55 = vld [vmem:[#allocation5 + $0x738] ss:$48 sps:$4 sm:$0xff]  }
  0xc3   :  { %2765 = vmatprep.mubr.bf16.mxu0 %v8453_v47  ;;  %2911 = vmatprep.mubr.bf16.mxu1 %v8453_v47  ;;  %v7743_v47 = vld [vmem:[#allocation5 + $0x434] ss:$48 sps:$4 sm:$0xff]  }
  0xc5   :  { %2748 = vmatpush1.bf16.msra.mxu0 %v7717_v56  ;;  %2894 = vmatpush1.bf16.msra.mxu1 %v7720_v57  ;;  %v7797_v56 = vld [vmem:[#allocation5 + $0x794] ss:$48 sps:$4 sm:$0xff]   ;;  %v7795_v57 = vld [vmem:[#allocation5 + $0x790] ss:$48 sps:$4 sm:$0xff]  }
  0xc6   :  { %2749 = vmatprep.subr.bf16.mxu0 %v7725_v58  ;;  %2895 = vmatprep.subr.bf16.mxu1 %v7728_v59  ;;  %v7798_v58 = vld [vmem:[#allocation5 + $0x798] ss:$48 sps:$4 sm:$0xff]   ;;  %v7803_v59 = vld [vmem:[#allocation5 + $0x7f4] ss:$48 sps:$4 sm:$0xff]  }
  0xc9   :  { %2750 = vmatpush1.bf16.msra.mxu0 %v7723_v60  ;;  %2896 = vmatpush1.bf16.msra.mxu1 %v7726_v61  ;;  %v7806_v60 = vld [vmem:[#allocation5 + $0x7fc] ss:$48 sps:$4 sm:$0xff]   ;;  %v7801_v61 = vld [vmem:[#allocation5 + $0x7f0] ss:$48 sps:$4 sm:$0xff]  }
  0xca   :  { %2751 = vmatprep.subr.bf16.mxu0 %v7731_v62  ;;  %2897 = vmatprep.subr.bf16.mxu1 %v7734_v63  ;;  %v7809_v62 = vld [vmem:[#allocation5 + $0x854] ss:$48 sps:$4 sm:$0xff]   ;;  %v7807_v63 = vld [vmem:[#allocation5 + $0x850] ss:$48 sps:$4 sm:$0xff]  }
  0xcd   :  { %2752 = vmatpush1.bf16.msra.mxu0 %v7729_v0  ;;  %2898 = vmatpush1.bf16.msra.mxu1 %v7732_v1  ;;  %v7810_v0 = vld [vmem:[#allocation5 + $0x858] ss:$48 sps:$4 sm:$0xff]   ;;  %v7815_v1 = vld [vmem:[#allocation5 + $0x8b4] ss:$48 sps:$4 sm:$0xff]  }
  0xce   :  { %2753 = vmatprep.subr.bf16.mxu0 %v7737_v2  ;;  %2899 = vmatprep.subr.bf16.mxu1 %v7740_v3  ;;  %v7818_v2 = vld [vmem:[#allocation5 + $0x8bc] ss:$48 sps:$4 sm:$0xff]   ;;  %v7813_v3 = vld [vmem:[#allocation5 + $0x8b0] ss:$48 sps:$4 sm:$0xff]  }
  0xd1   :  { %2754 = vmatpush1.bf16.msra.mxu0 %v7735_v4  ;;  %2900 = vmatpush1.bf16.msra.mxu1 %v7738_v6  ;;  %v7821_v4 = vld [vmem:[#allocation5 + $0x914] ss:$48 sps:$4 sm:$0xff]   ;;  %v7819_v6 = vld [vmem:[#allocation5 + $0x910] ss:$48 sps:$4 sm:$0xff]  }
  0xd2   :  { %2755 = vmatprep.subr.bf16.mxu0 %v7743_v47  ;;  %2901 = vmatprep.subr.bf16.mxu1 %v7746_v7  ;;  %v7822_v47 = vld [vmem:[#allocation5 + $0x918] ss:$48 sps:$4 sm:$0xff]   ;;  %v7827_v7 = vld [vmem:[#allocation5 + $0x974] ss:$48 sps:$4 sm:$0xff]  }
  0xd5   :  { %2756 = vmatpush1.bf16.msra.mxu0 %v7741_v8  ;;  %2902 = vmatpush1.bf16.msra.mxu1 %v7744_v9  ;;  %v7830_v8 = vld [vmem:[#allocation5 + $0x97c] ss:$48 sps:$4 sm:$0xff]   ;;  %v7825_v9 = vld [vmem:[#allocation5 + $0x970] ss:$48 sps:$4 sm:$0xff]  }
  0xd6   :  { %2757 = vmatprep.subr.bf16.mxu0 %v7749_v10  ;;  %2903 = vmatprep.subr.bf16.mxu1 %v7752_v11  ;;  %v7833_v10 = vld [vmem:[#allocation5 + $0x9d4] ss:$48 sps:$4 sm:$0xff]   ;;  %v7836_v11 = vld [vmem:[#allocation5 + $0x9dc] ss:$48 sps:$4 sm:$0xff]  }
  0xd9   :  { %2758 = vmatpush1.bf16.msra.mxu0 %v7747_v12  ;;  %2904 = vmatpush1.bf16.msra.mxu1 %v7750_v16  ;;  %v7831_v12 = vld [vmem:[#allocation5 + $0x9d0] ss:$48 sps:$4 sm:$0xff]   ;;  %v7834_v16 = vld [vmem:[#allocation5 + $0x9d8] ss:$48 sps:$4 sm:$0xff]  }
  0xda   :  { %2759 = vmatprep.subr.bf16.mxu0 %v7755_v17  ;;  %2905 = vmatprep.subr.bf16.mxu1 %v7758_v18  ;;  %v7842_v17 = vld [vmem:[#allocation5 + $0xa3c] ss:$48 sps:$4 sm:$0xff]   ;;  %v7837_v18 = vld [vmem:[#allocation5 + $0xa30] ss:$48 sps:$4 sm:$0xff]  }
  0xdd   :  { %2760 = vmatpush1.bf16.msra.mxu0 %v7753_v19  ;;  %2906 = vmatpush1.bf16.msra.mxu1 %v7756_v21  ;;  %v7840_v19 = vld [vmem:[#allocation5 + $0xa38] ss:$48 sps:$4 sm:$0xff]   ;;  %v7845_v21 = vld [vmem:[#allocation5 + $0xa94] ss:$48 sps:$4 sm:$0xff]  }
  0xde   :  { %2761 = vmatprep.subr.bf16.mxu0 %v7761_v22  ;;  %2907 = vmatprep.subr.bf16.mxu1 %v7764_v24  ;;  %v7848_v22 = vld [vmem:[#allocation5 + $0xa9c] ss:$48 sps:$4 sm:$0xff]   ;;  %v7843_v24 = vld [vmem:[#allocation5 + $0xa90] ss:$48 sps:$4 sm:$0xff]  }
  0xe1   :  { %2762 = vmatpush1.bf16.msra.mxu0 %v7759_v26  ;;  %2908 = vmatpush1.bf16.msra.mxu1 %v7762_v28  ;;  %v7846_v26 = vld [vmem:[#allocation5 + $0xa98] ss:$48 sps:$4 sm:$0xff]   ;;  %v7851_v28 = vld [vmem:[#allocation5 + $0xaf4] ss:$48 sps:$4 sm:$0xff]  }
  0xe2   :  { %2763 = vmatprep.subr.bf16.mxu0 %v7767_v29  ;;  %2909 = vmatprep.subr.bf16.mxu1 %v7770_v30  ;;  %v7854_v29 = vld [vmem:[#allocation5 + $0xafc] ss:$48 sps:$4 sm:$0xff]   ;;  %v7849_v30 = vld [vmem:[#allocation5 + $0xaf0] ss:$48 sps:$4 sm:$0xff]  }
  0xe5   :  { %2764 = vmatpush1.bf16.msra.mxu0 %v7765_v32  ;;  %2910 = vmatpush1.bf16.msra.mxu1 %v7768_v34  ;;  %v7852_v32 = vld [vmem:[#allocation5 + $0xaf8] ss:$48 sps:$4 sm:$0xff]   ;;  %v7857_v34 = vld [vmem:[#allocation5 + $0xb54] ss:$48 sps:$4 sm:$0xff]  }
  0xe6   :  { %2806 = vmatprep.subr.bf16.mxu0 %v7773_v36  ;;  %2952 = vmatprep.subr.bf16.mxu1 %v7776_v37  ;;  %v7860_v36 = vld [vmem:[#allocation5 + $0xb5c] ss:$48 sps:$4 sm:$0xff]   ;;  %v7855_v37 = vld [vmem:[#allocation5 + $0xb50] ss:$48 sps:$4 sm:$0xff]  }
  0xe8   :  { %2766 = vmatmul.mubr.bf16.vlgmr.msra.gmra.mrb[16].mxu0 %v8457_v5  ;;  %2912 = vmatmul.mubr.bf16.vlgmr.msra.gmra.mrb[16].mxu1 %v8457_v5  ;;  %v7794_v5 = vld [vmem:[#allocation5 + $0x73c] ss:$48 sps:$4 sm:$0xff]  }
  0xe9   :  { %2807 = vmatpush1.bf16.msra.mxu0 %v7771_v38  ;;  %2953 = vmatpush1.bf16.msra.mxu1 %v7774_v41  ;;  %v7858_v38 = vld [vmem:[#allocation5 + $0xb58] ss:$48 sps:$4 sm:$0xff]   ;;  %v7863_v41 = vld [vmem:[#allocation5 + $0xbb4] ss:$48 sps:$4 sm:$0xff]  }
  0xea   :  { %2808 = vmatprep.subr.bf16.mxu0 %v7779_v42  ;;  %2954 = vmatprep.subr.bf16.mxu1 %v7782_v43  ;;  %v7866_v42 = vld [vmem:[#allocation5 + $0xbbc] ss:$48 sps:$4 sm:$0xff]   ;;  %v7861_v43 = vld [vmem:[#allocation5 + $0xbb0] ss:$48 sps:$4 sm:$0xff]  }
  0xeb   :  { %2775 = vmatprep.mubr.bf16.mxu0 %v8461_v14  ;;  %2921 = vmatprep.mubr.bf16.mxu1 %v8461_v14  ;;  %v7800_v14 = vld [vmem:[#allocation5 + $0x79c] ss:$48 sps:$4 sm:$0xff]  }
  0xed   :  { %2809 = vmatpush1.bf16.msra.mxu0 %v7777_v44  ;;  %2955 = vmatpush1.bf16.msra.mxu1 %v7780_v46  ;;  %v7864_v44 = vld [vmem:[#allocation5 + $0xbb8] ss:$48 sps:$4 sm:$0xff]   ;;  %v7869_v46 = vld [vmem:[#allocation5 + $0x24] ss:$48 sps:$4 sm:$0xff]  }
  0xee   :  { %2810 = vmatprep.subr.bf16.mxu0 %v7785_v48  ;;  %2956 = vmatprep.subr.bf16.mxu1 %v7788_v49  ;;  %v7872_v48 = vld [vmem:[#allocation5 + $0x2c] ss:$48 sps:$4 sm:$0xff]   ;;  %v7867_v49 = vld [vmem:[#allocation5 + $0x20] ss:$48 sps:$4 sm:$0xff]  }
  0xf0   :  { %2776 = vmatmul.mubr.bf16.gmra.mrb[20].mxu0 %v8463_v15  ;;  %2922 = vmatmul.mubr.bf16.gmra.mrb[20].mxu1 %v8463_v15  ;;  %v7804_v15 = vld [vmem:[#allocation5 + $0x7f8] ss:$48 sps:$4 sm:$0xff]  }
  0xf1   :  { %2811 = vmatpush1.bf16.msra.mxu0 %v7783_v50  ;;  %2957 = vmatpush1.bf16.msra.mxu1 %v7786_v52  ;;  %v7870_v50 = vld [vmem:[#allocation5 + $0x28] ss:$48 sps:$4 sm:$0xff]   ;;  %v7875_v52 = vld [vmem:[#allocation5 + $0x84] ss:$48 sps:$4 sm:$0xff]  }
  0xf2   :  { %2812 = vmatprep.subr.bf16.mxu0 %v7791_v53  ;;  %2958 = vmatprep.subr.bf16.mxu1 %v7794_v5  ;;  %v7878_v53 = vld [vmem:[#allocation5 + $0x8c] ss:$48 sps:$4 sm:$0xff]   ;;  %v7873_v5 = vld [vmem:[#allocation5 + $0x80] ss:$48 sps:$4 sm:$0xff]  }
  0xf3   :  { %2785 = vmatprep.mubr.bf16.mxu0 %v8469_v23  ;;  %2931 = vmatprep.mubr.bf16.mxu1 %v8469_v23  ;;  %v7812_v23 = vld [vmem:[#allocation5 + $0x85c] ss:$48 sps:$4 sm:$0xff]  }
  0xf5   :  { %2813 = vmatpush1.bf16.msra.mxu0 %v7789_v54  ;;  %2959 = vmatpush1.bf16.msra.mxu1 %v7792_v55  ;;  %v7876_v54 = vld [vmem:[#allocation5 + $0x88] ss:$48 sps:$4 sm:$0xff]   ;;  %v7881_v55 = vld [vmem:[#allocation5 + $0xe4] ss:$48 sps:$4 sm:$0xff]  }
  0xf6   :  { %2814 = vmatprep.subr.bf16.mxu0 %v7797_v56  ;;  %2960 = vmatprep.subr.bf16.mxu1 %v7800_v14  ;;  %v7884_v56 = vld [vmem:[#allocation5 + $0xec] ss:$48 sps:$4 sm:$0xff]   ;;  %v7879_v14 = vld [vmem:[#allocation5 + $0xe0] ss:$48 sps:$4 sm:$0xff]  }
  0xf8   :  { %2786 = vmatmul.mubr.bf16.gmra.mrb[24].mxu0 %v8471_v25  ;;  %2932 = vmatmul.mubr.bf16.gmra.mrb[24].mxu1 %v8471_v25  ;;  %v7816_v25 = vld [vmem:[#allocation5 + $0x8b8] ss:$48 sps:$4 sm:$0xff]  }
  0xf9   :  { %2815 = vmatpush1.bf16.msra.mxu0 %v7795_v57  ;;  %2961 = vmatpush1.bf16.msra.mxu1 %v7798_v58  ;;  %v7882_v57 = vld [vmem:[#allocation5 + $0xe8] ss:$48 sps:$4 sm:$0xff]   ;;  %v7887_v58 = vld [vmem:[#allocation5 + $0x144] ss:$48 sps:$4 sm:$0xff]  }
  0xfa   :  { %2816 = vmatprep.subr.bf16.mxu0 %v7803_v59  ;;  %2962 = vmatprep.subr.bf16.mxu1 %v7806_v60  ;;  %v7885_v59 = vld [vmem:[#allocation5 + $0x140] ss:$48 sps:$4 sm:$0xff]   ;;  %v7888_v60 = vld [vmem:[#allocation5 + $0x148] ss:$48 sps:$4 sm:$0xff]  }
  0xfb   :  { %2795 = vmatprep.mubr.bf16.mxu0 %v8477_v31  ;;  %2941 = vmatprep.mubr.bf16.mxu1 %v8477_v31  ;;  %v7824_v31 = vld [vmem:[#allocation5 + $0x91c] ss:$48 sps:$4 sm:$0xff]  }
  0xfd   :  { %2817 = vmatpush1.bf16.msra.mxu0 %v7801_v61  ;;  %2963 = vmatpush1.bf16.msra.mxu1 %v7804_v15  ;;  %v7893_v61 = vld [vmem:[#allocation5 + $0x1a4] ss:$48 sps:$4 sm:$0xff]   ;;  %v7891_v15 = vld [vmem:[#allocation5 + $0x1a0] ss:$48 sps:$4 sm:$0xff]  }
  0xfe   :  { %2818 = vmatprep.subr.bf16.mxu0 %v7809_v62  ;;  %2964 = vmatprep.subr.bf16.mxu1 %v7812_v23  ;;  %v7894_v62 = vld [vmem:[#allocation5 + $0x1a8] ss:$48 sps:$4 sm:$0xff]   ;;  %v7899_v23 = vld [vmem:[#allocation5 + $0x204] ss:$48 sps:$4 sm:$0xff]  }
 0x100   :  { %2796 = vmatmul.mubr.bf16.gmra.mrb[28].mxu0 %v8481_v35  ;;  %2942 = vmatmul.mubr.bf16.gmra.mrb[28].mxu1 %v8481_v35  ;;  %v7828_v35 = vld [vmem:[#allocation5 + $0x978] ss:$48 sps:$4 sm:$0xff]  }
 0x101   :  { %2819 = vmatpush1.bf16.msra.mxu0 %v7807_v63  ;;  %2965 = vmatpush1.bf16.msra.mxu1 %v7810_v0  ;;  %v7897_v63 = vld [vmem:[#allocation5 + $0x200] ss:$48 sps:$4 sm:$0xff]   ;;  %v7900_v0 = vld [vmem:[#allocation5 + $0x208] ss:$48 sps:$4 sm:$0xff]  }
 0x102   :  { %2820 = vmatprep.subr.bf16.mxu0 %v7815_v1  ;;  %2966 = vmatprep.subr.bf16.mxu1 %v7818_v2  ;;  %v7905_v1 = vld [vmem:[#allocation5 + $0x264] ss:$48 sps:$4 sm:$0xff]   ;;  %v7903_v2 = vld [vmem:[#allocation5 + $0x260] ss:$48 sps:$4 sm:$0xff]  }
 0x103   :  { %2838 = vmatprep.mubr.bf16.mxu0 %v8485_v40  ;;  %2984 = vmatprep.mubr.bf16.mxu1 %v8485_v40  ;;  %v7839_v40 = vld [vmem:[#allocation5 + $0xa34] ss:$48 sps:$4 sm:$0xff]  }
 0x105   :  { %2821 = vmatpush1.bf16.msra.mxu0 %v7813_v3  ;;  %2967 = vmatpush1.bf16.msra.mxu1 %v7816_v25  ;;  %v7906_v3 = vld [vmem:[#allocation5 + $0x268] ss:$48 sps:$4 sm:$0xff]   ;;  %v7911_v25 = vld [vmem:[#allocation5 + $0x2c4] ss:$48 sps:$4 sm:$0xff]  }
 0x106   :  { %2822 = vmatprep.subr.bf16.mxu0 %v7821_v4  ;;  %2968 = vmatprep.subr.bf16.mxu1 %v7824_v31  ;;  %v7909_v4 = vld [vmem:[#allocation5 + $0x2c0] ss:$48 sps:$4 sm:$0xff]   ;;  %v7912_v31 = vld [vmem:[#allocation5 + $0x2c8] ss:$48 sps:$4 sm:$0xff]  }
 0x109   :  { %2823 = vmatpush1.bf16.msra.mxu0 %v7819_v6  ;;  %2969 = vmatpush1.bf16.msra.mxu1 %v7822_v47  ;;  %v7917_v6 = vld [vmem:[#allocation5 + $0x324] ss:$48 sps:$4 sm:$0xff]  }
 0x10a   :  { %2824 = vmatprep.subr.bf16.mxu0 %v7827_v7  ;;  %2970 = vmatprep.subr.bf16.mxu1 %v7830_v8  ;;  %v8315_v47 = vld [vmem:[#allocation2 + $0x4] ss:$16 sps:$4 sm:$0xff]   ;;  %v7915_v7 = vld [vmem:[#allocation5 + $0x320] ss:$48 sps:$4 sm:$0xff]   ;;  %v7918_v8 = vld [vmem:[#allocation5 + $0x328] ss:$48 sps:$4 sm:$0xff]  }
 0x10d   :  { %2825 = vmatpush1.bf16.msra.mxu0 %v7825_v9  ;;  %2971 = vmatpush1.bf16.msra.mxu1 %v7828_v35  ;;  %v7923_v9 = vld [vmem:[#allocation5 + $0x384] ss:$48 sps:$4 sm:$0xff]   ;;  %v7926_v35 = vld [vmem:[#allocation5 + $0x38c] ss:$48 sps:$4 sm:$0xff]  }
 0x10e   :  { %2826 = vmatprep.subr.bf16.mxu0 %v7833_v10  ;;  %2972 = vmatprep.subr.bf16.mxu1 %v7836_v11  ;;  %v7924_v10 = vld [vmem:[#allocation5 + $0x388] ss:$48 sps:$4 sm:$0xff]   ;;  %v7929_v11 = vld [vmem:[#allocation5 + $0x3e4] ss:$48 sps:$4 sm:$0xff]  }
 0x111   :  { %2827 = vmatpush1.bf16.msra.mxu0 %v7831_v12  ;;  %2973 = vmatpush1.bf16.msra.mxu1 %v7834_v16  ;;  %v7932_v12 = vld [vmem:[#allocation5 + $0x3ec] ss:$48 sps:$4 sm:$0xff]   ;;  %v7927_v16 = vld [vmem:[#allocation5 + $0x3e0] ss:$48 sps:$4 sm:$0xff]  }
 0x112   :  { %2828 = vmatprep.subr.bf16.mxu0 %v7839_v40  ;;  %2974 = vmatprep.subr.bf16.mxu1 %v7842_v17  ;;  %v7930_v40 = vld [vmem:[#allocation5 + $0x3e8] ss:$48 sps:$4 sm:$0xff]   ;;  %v7935_v17 = vld [vmem:[#allocation5 + $0x444] ss:$48 sps:$4 sm:$0xff]  }
 0x115   :  { %2829 = vmatpush1.bf16.msra.mxu0 %v7837_v18  ;;  %2975 = vmatpush1.bf16.msra.mxu1 %v7840_v19  ;;  %v7938_v18 = vld [vmem:[#allocation5 + $0x44c] ss:$48 sps:$4 sm:$0xff]   ;;  %v7933_v19 = vld [vmem:[#allocation5 + $0x440] ss:$48 sps:$4 sm:$0xff]  }
 0x116   :  { %2830 = vmatprep.subr.bf16.mxu0 %v7845_v21  ;;  %2976 = vmatprep.subr.bf16.mxu1 %v7848_v22  ;;  %v7936_v21 = vld [vmem:[#allocation5 + $0x448] ss:$48 sps:$4 sm:$0xff]   ;;  %v7941_v22 = vld [vmem:[#allocation5 + $0x4a4] ss:$48 sps:$4 sm:$0xff]  }
 0x119   :  { %2831 = vmatpush1.bf16.msra.mxu0 %v7843_v24  ;;  %2977 = vmatpush1.bf16.msra.mxu1 %v7846_v26  ;;  %v7944_v24 = vld [vmem:[#allocation5 + $0x4ac] ss:$48 sps:$4 sm:$0xff]   ;;  %v7939_v26 = vld [vmem:[#allocation5 + $0x4a0] ss:$48 sps:$4 sm:$0xff]  }
 0x11a   :  { %2832 = vmatprep.subr.bf16.mxu0 %v7851_v28  ;;  %2978 = vmatprep.subr.bf16.mxu1 %v7854_v29  ;;  %v7942_v28 = vld [vmem:[#allocation5 + $0x4a8] ss:$48 sps:$4 sm:$0xff]   ;;  %v7947_v29 = vld [vmem:[#allocation5 + $0x504] ss:$48 sps:$4 sm:$0xff]  }
 0x11d   :  { %2833 = vmatpush1.bf16.msra.mxu0 %v7849_v30  ;;  %2979 = vmatpush1.bf16.msra.mxu1 %v7852_v32  ;;  %v7950_v30 = vld [vmem:[#allocation5 + $0x50c] ss:$48 sps:$4 sm:$0xff]   ;;  %v7945_v32 = vld [vmem:[#allocation5 + $0x500] ss:$48 sps:$4 sm:$0xff]  }
 0x11e   :  { %2834 = vmatprep.subr.bf16.mxu0 %v7857_v34  ;;  %2980 = vmatprep.subr.bf16.mxu1 %v7860_v36  ;;  %v7948_v34 = vld [vmem:[#allocation5 + $0x508] ss:$48 sps:$4 sm:$0xff]   ;;  %v7953_v36 = vld [vmem:[#allocation5 + $0x564] ss:$48 sps:$4 sm:$0xff]  }
 0x121   :  { %2835 = vmatpush1.bf16.msra.mxu0 %v7855_v37  ;;  %2981 = vmatpush1.bf16.msra.mxu1 %v7858_v38  ;;  %v7956_v37 = vld [vmem:[#allocation5 + $0x56c] ss:$48 sps:$4 sm:$0xff]   ;;  %v7951_v38 = vld [vmem:[#allocation5 + $0x560] ss:$48 sps:$4 sm:$0xff]  }
 0x122   :  { %2836 = vmatprep.subr.bf16.mxu0 %v7863_v41  ;;  %2982 = vmatprep.subr.bf16.mxu1 %v7866_v42  ;;  %v7954_v41 = vld [vmem:[#allocation5 + $0x568] ss:$48 sps:$4 sm:$0xff]   ;;  %v7959_v42 = vld [vmem:[#allocation5 + $0x5c4] ss:$48 sps:$4 sm:$0xff]  }
 0x125   :  { %2837 = vmatpush1.bf16.msra.mxu0 %v7861_v43  ;;  %2983 = vmatpush1.bf16.msra.mxu1 %v7864_v44  ;;  %v7962_v43 = vld [vmem:[#allocation5 + $0x5cc] ss:$48 sps:$4 sm:$0xff]   ;;  %v7957_v44 = vld [vmem:[#allocation5 + $0x5c0] ss:$48 sps:$4 sm:$0xff]  }
 0x126   :  { %3025 = vmatprep.subr.bf16.mxu0 %v7869_v46  ;;  %3171 = vmatprep.subr.bf16.mxu1 %v7872_v48  ;;  %v7960_v46 = vld [vmem:[#allocation5 + $0x5c8] ss:$48 sps:$4 sm:$0xff]   ;;  %v7965_v48 = vld [vmem:[#allocation5 + $0x624] ss:$48 sps:$4 sm:$0xff]  }
 0x128   :  { %2839 = vmatmul.mubr.bf16.vlgmr.msra.gmra.mrb[16].mxu0 %v8489_v13  ;;  %2985 = vmatmul.mubr.bf16.vlgmr.msra.gmra.mrb[16].mxu1 %v8489_v13  ;;  %v7890_v13 = vld [vmem:[#allocation5 + $0x14c] ss:$48 sps:$4 sm:$0xff]  }
 0x129   :  { %3026 = vmatpush1.bf16.msra.mxu0 %v7867_v49  ;;  %3172 = vmatpush1.bf16.msra.mxu1 %v7870_v50  ;;  %v7968_v49 = vld [vmem:[#allocation5 + $0x62c] ss:$48 sps:$4 sm:$0xff]   ;;  %v7963_v50 = vld [vmem:[#allocation5 + $0x620] ss:$48 sps:$4 sm:$0xff]  }
 0x12a   :  { %3027 = vmatprep.subr.bf16.mxu0 %v7875_v52  ;;  %3173 = vmatprep.subr.bf16.mxu1 %v7878_v53  ;;  %v7966_v52 = vld [vmem:[#allocation5 + $0x628] ss:$48 sps:$4 sm:$0xff]   ;;  %v7971_v53 = vld [vmem:[#allocation5 + $0x684] ss:$48 sps:$4 sm:$0xff]  }
 0x12b   :  { %2848 = vmatprep.mubr.bf16.mxu0 %v8491_v20  ;;  %2994 = vmatprep.mubr.bf16.mxu1 %v8491_v20  ;;  %v7896_v20 = vld [vmem:[#allocation5 + $0x1ac] ss:$48 sps:$4 sm:$0xff]  }
 0x12d   :  { %3028 = vmatpush1.bf16.msra.mxu0 %v7873_v5  ;;  %3174 = vmatpush1.bf16.msra.mxu1 %v7876_v54  ;;  %v7974_v5 = vld [vmem:[#allocation5 + $0x68c] ss:$48 sps:$4 sm:$0xff]   ;;  %v8316_v54 = vld [vmem:[#allocation2] ss:$16 sps:$4 sm:$0xff]  }
 0x12e   :  { %3029 = vmatprep.subr.bf16.mxu0 %v7881_v55  ;;  %3175 = vmatprep.subr.bf16.mxu1 %v7884_v56  ;;  %v7969_v55 = vld [vmem:[#allocation5 + $0x680] ss:$48 sps:$4 sm:$0xff]   ;;  %v7972_v56 = vld [vmem:[#allocation5 + $0x688] ss:$48 sps:$4 sm:$0xff]  }
 0x130   :  { %2849 = vmatmul.mubr.bf16.gmra.mrb[20].mxu0 %v8496_v27  ;;  %2995 = vmatmul.mubr.bf16.gmra.mrb[20].mxu1 %v8496_v27  ;;  %v7902_v27 = vld [vmem:[#allocation5 + $0x20c] ss:$48 sps:$4 sm:$0xff]  }
 0x131   :  { %3030 = vmatpush1.bf16.msra.mxu0 %v7879_v14  ;;  %3176 = vmatpush1.bf16.msra.mxu1 %v7882_v57  ;;  %v7977_v14 = vld [vmem:[#allocation5 + $0x6e4] ss:$48 sps:$4 sm:$0xff]   ;;  %v7980_v57 = vld [vmem:[#allocation5 + $0x6ec] ss:$48 sps:$4 sm:$0xff]  }
 0x132   :  { %3031 = vmatprep.subr.bf16.mxu0 %v7887_v58  ;;  %3177 = vmatprep.subr.bf16.mxu1 %v7890_v13  ;;  %v8317_v58 = vld [vmem:[#allocation2 + $0x24] ss:$16 sps:$4 sm:$0xff]   ;;  %v7975_v13 = vld [vmem:[#allocation5 + $0x6e0] ss:$48 sps:$4 sm:$0xff]  }
 0x133   :  { %2858 = vmatprep.mubr.bf16.mxu0 %v8499_v33  ;;  %3004 = vmatprep.mubr.bf16.mxu1 %v8499_v33  ;;  %v7908_v33 = vld [vmem:[#allocation5 + $0x26c] ss:$48 sps:$4 sm:$0xff]  }
 0x135   :  { %3032 = vmatpush1.bf16.msra.mxu0 %v7885_v59  ;;  %3178 = vmatpush1.bf16.msra.mxu1 %v7888_v60  ;;  %v7978_v59 = vld [vmem:[#allocation5 + $0x6e8] ss:$48 sps:$4 sm:$0xff]   ;;  %v7983_v60 = vld [vmem:[#allocation5 + $0x744] ss:$48 sps:$4 sm:$0xff]  }
 0x136   :  { %3033 = vmatprep.subr.bf16.mxu0 %v7893_v61  ;;  %3179 = vmatprep.subr.bf16.mxu1 %v7896_v20  ;;  %v7986_v61 = vld [vmem:[#allocation5 + $0x74c] ss:$48 sps:$4 sm:$0xff]   ;;  %v8318_v20 = vld [vmem:[#allocation2 + $0x20] ss:$16 sps:$4 sm:$0xff]  }
 0x138   :  { %2859 = vmatmul.mubr.bf16.gmra.mrb[24].mxu0 %v8504_v39  ;;  %3005 = vmatmul.mubr.bf16.gmra.mrb[24].mxu1 %v8504_v39  ;;  %v7914_v39 = vld [vmem:[#allocation5 + $0x2cc] ss:$48 sps:$4 sm:$0xff]  }
 0x139   :  { %3034 = vmatpush1.bf16.msra.mxu0 %v7891_v15  ;;  %3180 = vmatpush1.bf16.msra.mxu1 %v7894_v62  ;;  %v7981_v15 = vld [vmem:[#allocation5 + $0x740] ss:$48 sps:$4 sm:$0xff]   ;;  %v7984_v62 = vld [vmem:[#allocation5 + $0x748] ss:$48 sps:$4 sm:$0xff]  }
 0x13a   :  { %3035 = vmatprep.subr.bf16.mxu0 %v7899_v23  ;;  %3181 = vmatprep.subr.bf16.mxu1 %v7902_v27  ;;  %v7989_v23 = vld [vmem:[#allocation5 + $0x7a4] ss:$48 sps:$4 sm:$0xff]   ;;  %v7992_v27 = vld [vmem:[#allocation5 + $0x7ac] ss:$48 sps:$4 sm:$0xff]  }
 0x13b   :  { %2868 = vmatprep.mubr.bf16.mxu0 %v8507_v45  ;;  %3014 = vmatprep.mubr.bf16.mxu1 %v8507_v45  ;;  %v7920_v45 = vld [vmem:[#allocation5 + $0x32c] ss:$48 sps:$4 sm:$0xff]  }
 0x13d   :  { %3036 = vmatpush1.bf16.msra.mxu0 %v7897_v63  ;;  %3182 = vmatpush1.bf16.msra.mxu1 %v7900_v0  ;;  %v8319_v63 = vld [vmem:[#allocation2 + $0x44] ss:$16 sps:$4 sm:$0xff]   ;;  %v7987_v0 = vld [vmem:[#allocation5 + $0x7a0] ss:$48 sps:$4 sm:$0xff]  }
 0x13e   :  { %3037 = vmatprep.subr.bf16.mxu0 %v7905_v1  ;;  %3183 = vmatprep.subr.bf16.mxu1 %v7908_v33  ;;  %v7990_v1 = vld [vmem:[#allocation5 + $0x7a8] ss:$48 sps:$4 sm:$0xff]   ;;  %v7995_v33 = vld [vmem:[#allocation5 + $0x804] ss:$48 sps:$4 sm:$0xff]  }
 0x140   :  { %2869 = vmatmul.mubr.bf16.gmra.mrb[28].mxu0 %v8512_v51  ;;  %3015 = vmatmul.mubr.bf16.gmra.mrb[28].mxu1 %v8512_v51  ;;  %v7921_v51 = vld [vmem:[#allocation5 + $0x380] ss:$48 sps:$4 sm:$0xff]  }
 0x141   :  { %3038 = vmatpush1.bf16.msra.mxu0 %v7903_v2  ;;  %3184 = vmatpush1.bf16.msra.mxu1 %v7906_v3  ;;  %v7998_v2 = vld [vmem:[#allocation5 + $0x80c] ss:$48 sps:$4 sm:$0xff]   ;;  %v8320_v3 = vld [vmem:[#allocation2 + $0x40] ss:$16 sps:$4 sm:$0xff]  }
 0x142   :  { %3039 = vmatprep.subr.bf16.mxu0 %v7911_v25  ;;  %3185 = vmatprep.subr.bf16.mxu1 %v7914_v39  ;;  %v7993_v25 = vld [vmem:[#allocation5 + $0x800] ss:$48 sps:$4 sm:$0xff]   ;;  %v7996_v39 = vld [vmem:[#allocation5 + $0x808] ss:$48 sps:$4 sm:$0xff]  }
 0x143   :  { %3057 = vmatprep.mubr.bf16.mxu0 %v8315_v47  ;;  %3203 = vmatprep.mubr.bf16.mxu1 %v8315_v47 }
 0x145   :  { %3040 = vmatpush1.bf16.msra.mxu0 %v7909_v4  ;;  %3186 = vmatpush1.bf16.msra.mxu1 %v7912_v31  ;;  %v8001_v4 = vld [vmem:[#allocation5 + $0x864] ss:$48 sps:$4 sm:$0xff]   ;;  %v8004_v31 = vld [vmem:[#allocation5 + $0x86c] ss:$48 sps:$4 sm:$0xff]  }
 0x146   :  { %3041 = vmatprep.subr.bf16.mxu0 %v7917_v6  ;;  %3187 = vmatprep.subr.bf16.mxu1 %v7920_v45  ;;  %v8321_v45 = vld [vmem:[#allocation2 + $0x64] ss:$16 sps:$4 sm:$0xff]  }
 0x149   :  { %3042 = vmatpush1.bf16.msra.mxu0 %v7915_v7  ;;  %3188 = vmatpush1.bf16.msra.mxu1 %v7918_v8 }
 0x14a   :  { %3043 = vmatprep.subr.bf16.mxu0 %v7923_v9  ;;  %3189 = vmatprep.subr.bf16.mxu1 %v7926_v35  ;;  %v7999_v35 = vld [vmem:[#allocation5 + $0x860] ss:$48 sps:$4 sm:$0xff]  }
 0x14d   :  { %3044 = vmatpush1.bf16.msra.mxu0 %v7921_v51  ;;  %3190 = vmatpush1.bf16.msra.mxu1 %v7924_v10  ;;  %v8002_v51 = vld [vmem:[#allocation5 + $0x868] ss:$48 sps:$4 sm:$0xff]  }
 0x14e   :  { %3045 = vmatprep.subr.bf16.mxu0 %v7929_v11  ;;  %3191 = vmatprep.subr.bf16.mxu1 %v7932_v12 }
 0x151   :  { %3046 = vmatpush1.bf16.msra.mxu0 %v7927_v16  ;;  %3192 = vmatpush1.bf16.msra.mxu1 %v7930_v40  ;;  %v8007_v16 = vld [vmem:[#allocation5 + $0x8c4] ss:$48 sps:$4 sm:$0xff]   ;;  %v8010_v40 = vld [vmem:[#allocation5 + $0x8cc] ss:$48 sps:$4 sm:$0xff]  }
 0x152   :  { %3047 = vmatprep.subr.bf16.mxu0 %v7935_v17  ;;  %3193 = vmatprep.subr.bf16.mxu1 %v7938_v18 }
 0x155   :  { %3048 = vmatpush1.bf16.msra.mxu0 %v7933_v19  ;;  %3194 = vmatpush1.bf16.msra.mxu1 %v7936_v21 }
 0x156   :  { %3049 = vmatprep.subr.bf16.mxu0 %v7941_v22  ;;  %3195 = vmatprep.subr.bf16.mxu1 %v7944_v24  ;;  %v8322_v22 = vld [vmem:[#allocation2 + $0x60] ss:$16 sps:$4 sm:$0xff]  }
 0x157   :  { %v8005_v24 = vld [vmem:[#allocation5 + $0x8c0] ss:$48 sps:$4 sm:$0xff]  }
 0x159   :  { %3050 = vmatpush1.bf16.msra.mxu0 %v7939_v26  ;;  %3196 = vmatpush1.bf16.msra.mxu1 %v7942_v28  ;;  %v8008_v26 = vld [vmem:[#allocation5 + $0x8c8] ss:$48 sps:$4 sm:$0xff]   ;;  %v8013_v28 = vld [vmem:[#allocation5 + $0x924] ss:$48 sps:$4 sm:$0xff]  }
 0x15a   :  { %3051 = vmatprep.subr.bf16.mxu0 %v7947_v29  ;;  %3197 = vmatprep.subr.bf16.mxu1 %v7950_v30  ;;  %v8016_v29 = vld [vmem:[#allocation5 + $0x92c] ss:$48 sps:$4 sm:$0xff]  }
 0x15d   :  { %3052 = vmatpush1.bf16.msra.mxu0 %v7945_v32  ;;  %3198 = vmatpush1.bf16.msra.mxu1 %v7948_v34  ;;  %v8323_v32 = vld [vmem:[#allocation2 + $0xc] ss:$16 sps:$4 sm:$0xff]  }
 0x15e   :  { %3053 = vmatprep.subr.bf16.mxu0 %v7953_v36  ;;  %3199 = vmatprep.subr.bf16.mxu1 %v7956_v37 }
 0x161   :  { %3054 = vmatpush1.bf16.msra.mxu0 %v7951_v38  ;;  %3200 = vmatpush1.bf16.msra.mxu1 %v7954_v41  ;;  %v8011_v41 = vld [vmem:[#allocation5 + $0x920] ss:$48 sps:$4 sm:$0xff]  }
 0x162   :  { %3055 = vmatprep.subr.bf16.mxu0 %v7959_v42  ;;  %3201 = vmatprep.subr.bf16.mxu1 %v7962_v43  ;;  %v8014_v42 = vld [vmem:[#allocation5 + $0x928] ss:$48 sps:$4 sm:$0xff]  }
 0x165   :  { %3056 = vmatpush1.bf16.msra.mxu0 %v7957_v44  ;;  %3202 = vmatpush1.bf16.msra.mxu1 %v7960_v46 }
 0x166   :  { %3098 = vmatprep.subr.bf16.mxu0 %v7965_v48  ;;  %3244 = vmatprep.subr.bf16.mxu1 %v7968_v49  ;;  %v8019_v48 = vld [vmem:[#allocation5 + $0x984] ss:$48 sps:$4 sm:$0xff]   ;;  %v8022_v49 = vld [vmem:[#allocation5 + $0x98c] ss:$48 sps:$4 sm:$0xff]  }
 0x168   :  { %3058 = vmatmul.mubr.bf16.vlgmr.msra.gmra.mrb[32].mxu0 %v8316_v54  ;;  %3204 = vmatmul.mubr.bf16.vlgmr.msra.gmra.mrb[32].mxu1 %v8316_v54  ;;  %v8017_v54 = vld [vmem:[#allocation5 + $0x980] ss:$48 sps:$4 sm:$0xff]  }
 0x169   :  { %3099 = vmatpush1.bf16.msra.mxu0 %v7963_v50  ;;  %3245 = vmatpush1.bf16.msra.mxu1 %v7966_v52 }
 0x16a   :  { %3100 = vmatprep.subr.bf16.mxu0 %v7971_v53  ;;  %3246 = vmatprep.subr.bf16.mxu1 %v7974_v5 }
 0x16b   :  { %3067 = vmatprep.mubr.bf16.mxu0 %v8317_v58  ;;  %3213 = vmatprep.mubr.bf16.mxu1 %v8317_v58 }
 0x16d   :  { %3101 = vmatpush1.bf16.msra.mxu0 %v7969_v55  ;;  %3247 = vmatpush1.bf16.msra.mxu1 %v7972_v56  ;;  %v8020_v55 = vld [vmem:[#allocation5 + $0x988] ss:$48 sps:$4 sm:$0xff]   ;;  %v8025_v56 = vld [vmem:[#allocation5 + $0x9e4] ss:$48 sps:$4 sm:$0xff]  }
 0x16e   :  { %3102 = vmatprep.subr.bf16.mxu0 %v7977_v14  ;;  %3248 = vmatprep.subr.bf16.mxu1 %v7980_v57  ;;  %v8028_v14 = vld [vmem:[#allocation5 + $0x9ec] ss:$48 sps:$4 sm:$0xff]  }
 0x170   :  { %3068 = vmatmul.mubr.bf16.gmra.mrb[36].mxu0 %v8318_v20  ;;  %3214 = vmatmul.mubr.bf16.gmra.mrb[36].mxu1 %v8318_v20  ;;  %v8026_v20 = vld [vmem:[#allocation5 + $0x9e8] ss:$48 sps:$4 sm:$0xff]  }
 0x171   :  { %3103 = vmatpush1.bf16.msra.mxu0 %v7975_v13  ;;  %3249 = vmatpush1.bf16.msra.mxu1 %v7978_v59 }
 0x172   :  { %3104 = vmatprep.subr.bf16.mxu0 %v7983_v60  ;;  %3250 = vmatprep.subr.bf16.mxu1 %v7986_v61  ;;  %v8023_v61 = vld [vmem:[#allocation5 + $0x9e0] ss:$48 sps:$4 sm:$0xff]  }
 0x173   :  { %3077 = vmatprep.mubr.bf16.mxu0 %v8319_v63  ;;  %3223 = vmatprep.mubr.bf16.mxu1 %v8319_v63  ;;  %v8034_v63 = vld [vmem:[#allocation5 + $0xa4c] ss:$48 sps:$4 sm:$0xff]  }
 0x175   :  { %3105 = vmatpush1.bf16.msra.mxu0 %v7981_v15  ;;  %3251 = vmatpush1.bf16.msra.mxu1 %v7984_v62 }
 0x176   :  { %3106 = vmatprep.subr.bf16.mxu0 %v7989_v23  ;;  %3252 = vmatprep.subr.bf16.mxu1 %v7992_v27  ;;  %v8031_v27 = vld [vmem:[#allocation5 + $0xa44] ss:$48 sps:$4 sm:$0xff]  }
 0x178   :  { %3078 = vmatmul.mubr.bf16.gmra.mrb[40].mxu0 %v8320_v3  ;;  %3224 = vmatmul.mubr.bf16.gmra.mrb[40].mxu1 %v8320_v3  ;;  %v8029_v3 = vld [vmem:[#allocation5 + $0xa40] ss:$48 sps:$4 sm:$0xff]  }
 0x179   :  { %3107 = vmatpush1.bf16.msra.mxu0 %v7987_v0  ;;  %3253 = vmatpush1.bf16.msra.mxu1 %v7990_v1 }
 0x17a   :  { %3108 = vmatprep.subr.bf16.mxu0 %v7995_v33  ;;  %3254 = vmatprep.subr.bf16.mxu1 %v7998_v2 }
 0x17b   :  { %v2548_v6 = vpop.f32.mrb[0].mxu0  ;;  %3087 = vmatprep.mubr.bf16.mxu0 %v8321_v45  ;;  %3233 = vmatprep.mubr.bf16.mxu1 %v8321_v45  ;;  %v2694_v47 = vpop.f32.mrb[0].mxu1 }
 0x17c   :  { %v2550_v7 = vpop.f32.mrb[1].mxu0  ;;  %v2696_v8 = vpop.f32.mrb[1].mxu1 }
 0x17d   :  { %v2552_v9 = vpop.f32.mrb[2].mxu0  ;;  %3109 = vmatpush1.bf16.msra.mxu0 %v7993_v25  ;;  %3255 = vmatpush1.bf16.msra.mxu1 %v7996_v39  ;;  %v2698_v10 = vpop.f32.mrb[2].mxu1  ;;  %v8032_v25 = vld [vmem:[#allocation5 + $0xa48] ss:$48 sps:$4 sm:$0xff]   ;;  %v8037_v39 = vld [vmem:[#allocation5 + $0xaa4] ss:$48 sps:$4 sm:$0xff]  }
 0x17e   :  { %v8549_v11 = vpack.c.bf16 %v2552_v9, %v2548_v6  ;;  %v2554_v12 = vpop.f32.mrb[3].mxu0  ;;  %3110 = vmatprep.subr.bf16.mxu0 %v8001_v4  ;;  %3256 = vmatprep.subr.bf16.mxu1 %v8004_v31  ;;  %v8551_v17 = vpack.c.bf16 %v2698_v10, %v2694_v47  ;;  %v2700_v18 = vpop.f32.mrb[3].mxu1  ;;  %v8040_v4 = vld [vmem:[#allocation5 + $0xaac] ss:$48 sps:$4 sm:$0xff]   ;;  %v8038_v9 = vld [vmem:[#allocation5 + $0xaa8] ss:$48 sps:$4 sm:$0xff]  }
 0x17f   :  { %v8553_v19 = vpack.c.bf16 %v2554_v12, %v2550_v7  ;;  %v8555_v21 = vpack.c.bf16 %v2700_v18, %v2696_v8  ;;  %v8035_v8 = vld [vmem:[#allocation5 + $0xaa0] ss:$48 sps:$4 sm:$0xff]   ;;  %v8043_v12 = vld [vmem:[#allocation5 + $0xb04] ss:$48 sps:$4 sm:$0xff]  }
 0x180   :  { %3088 = vmatmul.mubr.bf16.gmra.mrb[44].mxu0 %v8322_v22  ;;  %3234 = vmatmul.mubr.bf16.gmra.mrb[44].mxu1 %v8322_v22 }
 0x181   :  { %9559 = vst [vmem:[#allocation11_spill] sm:$0xff] %v8555_v21  ;;  %3111 = vmatpush1.bf16.msra.mxu0 %v7999_v35  ;;  %3257 = vmatpush1.bf16.msra.mxu1 %v8002_v51 }
 0x182   :  { %3112 = vmatprep.subr.bf16.mxu0 %v8007_v16  ;;  %3258 = vmatprep.subr.bf16.mxu1 %v8010_v40  ;;  %v8046_v16 = vld [vmem:[#allocation5 + $0xb0c] ss:$48 sps:$4 sm:$0xff]  }
 0x183   :  { %v2558_v30 = vpop.f32.mrb[4].mxu0  ;;  %3130 = vmatprep.mubr.bf16.mxu0 %v8323_v32  ;;  %3276 = vmatprep.mubr.bf16.mxu1 %v8323_v32  ;;  %v2704_v34 = vpop.f32.mrb[4].mxu1  ;;  %v8047_v32 = vld [vmem:[#allocation5 + $0xb60] ss:$48 sps:$4 sm:$0xff]  }
 0x184   :  { %v2560_v36 = vpop.f32.mrb[5].mxu0  ;;  %v2706_v37 = vpop.f32.mrb[5].mxu1 }
 0x185   :  { %v2562_v38 = vpop.f32.mrb[6].mxu0  ;;  %3113 = vmatpush1.bf16.msra.mxu0 %v8005_v24  ;;  %3259 = vmatpush1.bf16.msra.mxu1 %v8008_v26  ;;  %v2708_v43 = vpop.f32.mrb[6].mxu1  ;;  %v8041_v26 = vld [vmem:[#allocation5 + $0xb00] ss:$48 sps:$4 sm:$0xff]  }
 0x186   :  { %v8557_v44 = vpack.c.bf16 %v2562_v38, %v2558_v30  ;;  %v2564_v46 = vpop.f32.mrb[7].mxu0  ;;  %3114 = vmatprep.subr.bf16.mxu0 %v8013_v28  ;;  %3260 = vmatprep.subr.bf16.mxu1 %v8016_v29  ;;  %v8559_v50 = vpack.c.bf16 %v2708_v43, %v2704_v34  ;;  %v2710_v52 = vpop.f32.mrb[7].mxu1  ;;  %v8044_v28 = vld [vmem:[#allocation5 + $0xb08] ss:$48 sps:$4 sm:$0xff]   ;;  %v8049_v29 = vld [vmem:[#allocation5 + $0xb64] ss:$48 sps:$4 sm:$0xff]  }
 0x187   :  { %v8561_v53 = vpack.c.bf16 %v2564_v46, %v2560_v36  ;;  %v8563_v5 = vpack.c.bf16 %v2710_v52, %v2706_v37  ;;  %v8052_v30 = vld [vmem:[#allocation5 + $0xb6c] ss:$48 sps:$4 sm:$0xff]   ;;  %v8050_v34 = vld [vmem:[#allocation5 + $0xb68] ss:$48 sps:$4 sm:$0xff]   ;;  %v8055_v36 = vld [vmem:[#allocation5 + $0xbc4] ss:$48 sps:$4 sm:$0xff]  }
 0x188   :  { %v8058_v37 = vld [vmem:[#allocation5 + $0xbcc] ss:$48 sps:$4 sm:$0xff]   ;;  %v8053_v38 = vld [vmem:[#allocation5 + $0xbc0] ss:$48 sps:$4 sm:$0xff]   ;;  %v8326_v46 = vld [vmem:[#allocation2 + $0x28] ss:$16 sps:$4 sm:$0xff]  }
 0x189   :  { %9560 = vst [vmem:[#allocation12_spill] sm:$0xff] %v8563_v5  ;;  %3115 = vmatpush1.bf16.msra.mxu0 %v8011_v41  ;;  %3261 = vmatpush1.bf16.msra.mxu1 %v8014_v42  ;;  %v8056_v41 = vld [vmem:[#allocation5 + $0xbc8] ss:$48 sps:$4 sm:$0xff]   ;;  %v8325_v43 = vld [vmem:[#allocation2 + $0x2c] ss:$16 sps:$4 sm:$0xff]  }
 0x18a   :  { %3116 = vmatprep.subr.bf16.mxu0 %v8019_v48  ;;  %3262 = vmatprep.subr.bf16.mxu1 %v8022_v49  ;;  %v8324_v42 = vld [vmem:[#allocation2 + $0x8] ss:$16 sps:$4 sm:$0xff]   ;;  %v8327_v48 = vld [vmem:[#allocation2 + $0x4c] ss:$16 sps:$4 sm:$0xff]  }
 0x18b   :  { %v2568_v57 = vpop.f32.mrb[8].mxu0  ;;  %v2714_v58 = vpop.f32.mrb[8].mxu1  ;;  %v8328_v49 = vld [vmem:[#allocation2 + $0x48] ss:$16 sps:$4 sm:$0xff]   ;;  %v8329_v52 = vld [vmem:[#allocation2 + $0x6c] ss:$16 sps:$4 sm:$0xff]  }
 0x18c   :  { %v2570_v13 = vpop.f32.mrb[9].mxu0  ;;  %v2716_v59 = vpop.f32.mrb[9].mxu1 }
 0x18d   :  { %v2572_v60 = vpop.f32.mrb[10].mxu0  ;;  %3117 = vmatpush1.bf16.msra.mxu0 %v8017_v54  ;;  %3263 = vmatpush1.bf16.msra.mxu1 %v8020_v55  ;;  %v2718_v15 = vpop.f32.mrb[10].mxu1  ;;  %v8330_v54 = vld [vmem:[#allocation2 + $0x68] ss:$16 sps:$4 sm:$0xff]  }
 0x18e   :  { %v8565_v62 = vpack.c.bf16 %v2572_v60, %v2568_v57  ;;  %v2574_v23 = vpop.f32.mrb[11].mxu0  ;;  %3118 = vmatprep.subr.bf16.mxu0 %v8025_v56  ;;  %3264 = vmatprep.subr.bf16.mxu1 %v8028_v14  ;;  %v8567_v0 = vpack.c.bf16 %v2718_v15, %v2714_v58  ;;  %v2720_v1 = vpop.f32.mrb[11].mxu1 }
 0x18f   :  { %v8569_v33 = vpack.c.bf16 %v2574_v23, %v2570_v13  ;;  %v8571_v2 = vpack.c.bf16 %v2720_v1, %v2716_v59 }
 0x191   :  { %9561 = vst [vmem:[#allocation13_spill] sm:$0xff] %v8571_v2  ;;  %3119 = vmatpush1.bf16.msra.mxu0 %v8023_v61  ;;  %3265 = vmatpush1.bf16.msra.mxu1 %v8026_v20 }
 0x192   :  { %3120 = vmatprep.subr.bf16.mxu0 %v8031_v27  ;;  %3266 = vmatprep.subr.bf16.mxu1 %v8034_v63 }
 0x193   :  { %v2578_v31 = vpop.f32.mrb[12].mxu0  ;;  %v2724_v6 = vpop.f32.mrb[12].mxu1 }
 0x194   :  { %v2580_v45 = vpop.f32.mrb[13].mxu0  ;;  %v2726_v47 = vpop.f32.mrb[13].mxu1 }
 0x195   :  { %v2582_v7 = vpop.f32.mrb[14].mxu0  ;;  %3121 = vmatpush1.bf16.msra.mxu0 %v8029_v3  ;;  %3267 = vmatpush1.bf16.msra.mxu1 %v8032_v25  ;;  %v2728_v35 = vpop.f32.mrb[14].mxu1 }
 0x196   :  { %v8573_v51 = vpack.c.bf16 %v2582_v7, %v2578_v31  ;;  %v2584_v10 = vpop.f32.mrb[15].mxu0  ;;  %3122 = vmatprep.subr.bf16.mxu0 %v8037_v39  ;;  %3268 = vmatprep.subr.bf16.mxu1 %v8040_v4  ;;  %v8575_v40 = vpack.c.bf16 %v2728_v35, %v2724_v6  ;;  %v2730_v18 = vpop.f32.mrb[15].mxu1 }
 0x197   :  { %v8577_v22 = vpack.c.bf16 %v2584_v10, %v2580_v45  ;;  %v8579_v24 = vpack.c.bf16 %v2730_v18, %v2726_v47 }
 0x199   :  { %9562 = vst [vmem:[#allocation14_spill] sm:$0xff] %v8579_v24  ;;  %3123 = vmatpush1.bf16.msra.mxu0 %v8035_v8  ;;  %3269 = vmatpush1.bf16.msra.mxu1 %v8038_v9 }
 0x19a   :  { %3124 = vmatprep.subr.bf16.mxu0 %v8043_v12  ;;  %3270 = vmatprep.subr.bf16.mxu1 %v8046_v16 }
 0x19d   :  { %3125 = vmatpush1.bf16.msra.mxu0 %v8041_v26  ;;  %3271 = vmatpush1.bf16.msra.mxu1 %v8044_v28 }
 0x19e   :  { %3126 = vmatprep.subr.bf16.mxu0 %v8049_v29  ;;  %3272 = vmatprep.subr.bf16.mxu1 %v8052_v30 }
 0x1a1   :  { %3127 = vmatpush1.bf16.msra.mxu0 %v8047_v32  ;;  %3273 = vmatpush1.bf16.msra.mxu1 %v8050_v34 }
 0x1a2   :  { %3128 = vmatprep.subr.bf16.mxu0 %v8055_v36  ;;  %3274 = vmatprep.subr.bf16.mxu1 %v8058_v37 }
 0x1a5   :  { %3129 = vmatpush1.bf16.msra.mxu0 %v8053_v38  ;;  %3275 = vmatpush1.bf16.msra.mxu1 %v8056_v41 }
 0x1a8   :  { %3131 = vmatmul.mubr.bf16.vlgmr.msra.gmra.mrb[32].mxu0 %v8324_v42  ;;  %3277 = vmatmul.mubr.bf16.vlgmr.msra.gmra.mrb[32].mxu1 %v8324_v42 }
 0x1a9   :  { %3140 = vmatprep.mubr.bf16.mxu0 %v8325_v43  ;;  %3286 = vmatprep.mubr.bf16.mxu1 %v8325_v43 }
 0x1b0   :  { %3141 = vmatmul.mubr.bf16.gmra.mrb[36].mxu0 %v8326_v46  ;;  %3287 = vmatmul.mubr.bf16.gmra.mrb[36].mxu1 %v8326_v46 }
 0x1b1   :  { %3150 = vmatprep.mubr.bf16.mxu0 %v8327_v48  ;;  %3296 = vmatprep.mubr.bf16.mxu1 %v8327_v48 }
 0x1b8   :  { %3151 = vmatmul.mubr.bf16.gmra.mrb[40].mxu0 %v8328_v49  ;;  %3297 = vmatmul.mubr.bf16.gmra.mrb[40].mxu1 %v8328_v49 }
 0x1b9   :  { %3160 = vmatprep.mubr.bf16.mxu0 %v8329_v52  ;;  %3306 = vmatprep.mubr.bf16.mxu1 %v8329_v52 }
 0x1c0   :  { %3161 = vmatmul.mubr.bf16.gmra.mrb[44].mxu0 %v8330_v54  ;;  %3307 = vmatmul.mubr.bf16.gmra.mrb[44].mxu1 %v8330_v54 }
 0x1c1   :  { %7068 = vmatprep.mubr.msk.bf16.mxu0 %vm3344_vm0, %v8549_v11  ;;  %7076 = vmatprep.mubr.msk.bf16.mxu1 %vm3344_vm0, %v8565_v62 }
 0x1fb   :  { %v2840_v55 = vpop.f32.mrb[16].mxu0  ;;  %v2986_v56 = vpop.f32.mrb[16].mxu1 }
 0x1fc   :  { %v2842_v14 = vpop.f32.mrb[17].mxu0  ;;  %v2988_v57 = vpop.f32.mrb[17].mxu1 }
 0x1fd   :  { %v2844_v58 = vpop.f32.mrb[18].mxu0  ;;  %v2990_v13 = vpop.f32.mrb[18].mxu1 }
 0x1fe   :  { %v8585_v59 = vpack.c.bf16 %v2844_v58, %v2840_v55  ;;  %v2846_v60 = vpop.f32.mrb[19].mxu0  ;;  %v8587_v61 = vpack.c.bf16 %v2990_v13, %v2986_v56  ;;  %v2992_v20 = vpop.f32.mrb[19].mxu1 }
 0x1ff   :  { %v8589_v15 = vpack.c.bf16 %v2846_v60, %v2842_v14  ;;  %v8591_v23 = vpack.c.bf16 %v2992_v20, %v2988_v57 }
 0x200   :  { %7416 = vmatprep.subr.msk.bf16.mxu0 %vm3344_vm0, %v8585_v59  ;;  %v3352_v27 = vsel %vm3344_vm0, %v8585_v59, 0 }
 0x201   :  { %7065 = vmatpush3.bf16.xpose.msra.mxu0 %v3352_v27 }
 0x203   :  { %v2850_v63 = vpop.f32.mrb[20].mxu0  ;;  %v2996_v1 = vpop.f32.mrb[20].mxu1 }
 0x204   :  { %v2852_v3 = vpop.f32.mrb[21].mxu0  ;;  %v2998_v25 = vpop.f32.mrb[21].mxu1 }
 0x205   :  { %v2854_v39 = vpop.f32.mrb[22].mxu0  ;;  %v3000_v4 = vpop.f32.mrb[22].mxu1 }
 0x206   :  { %v8597_v31 = vpack.c.bf16 %v2854_v39, %v2850_v63  ;;  %v2856_v6 = vpop.f32.mrb[23].mxu0  ;;  %v8599_v45 = vpack.c.bf16 %v3000_v4, %v2996_v1  ;;  %v3002_v47 = vpop.f32.mrb[23].mxu1 }
 0x207   :  { %v8601_v7 = vpack.c.bf16 %v2856_v6, %v2852_v3  ;;  %v8603_v8 = vpack.c.bf16 %v3002_v47, %v2998_v25 }
 0x208   :  { %7417 = vmatprep.subr.msk.bf16.mxu0 %vm3344_vm0, %v8597_v31  ;;  %v3355_v9 = vsel %vm3344_vm0, %v8597_v31, 0 }
 0x209   :  { %9563 = vst [vmem:[#allocation15_spill] sm:$0xff] %v8603_v8  ;;  %7067 = vmatpush3.bf16.xpose.msra.mxu0 %v3355_v9 }
 0x20b   :  { %v2860_v35 = vpop.f32.mrb[24].mxu0  ;;  %v3006_v10 = vpop.f32.mrb[24].mxu1 }
 0x20c   :  { %v2862_v12 = vpop.f32.mrb[25].mxu0  ;;  %v3008_v16 = vpop.f32.mrb[25].mxu1 }
 0x20d   :  { %v2864_v18 = vpop.f32.mrb[26].mxu0  ;;  %v3010_v26 = vpop.f32.mrb[26].mxu1 }
 0x20e   :  { %v8609_v28 = vpack.c.bf16 %v2864_v18, %v2860_v35  ;;  %v2866_v29 = vpop.f32.mrb[27].mxu0  ;;  %v8611_v30 = vpack.c.bf16 %v3010_v26, %v3006_v10  ;;  %v3012_v32 = vpop.f32.mrb[27].mxu1 }
 0x20f   :  { %v8613_v34 = vpack.c.bf16 %v2866_v29, %v2862_v12  ;;  %v8615_v36 = vpack.c.bf16 %v3012_v32, %v3008_v16 }
 0x210   :  { %7069 = vmatmul.mubr.msk.bf16.vlgmr.msra.gmra.mrb[48].mxu0 %vm3344_vm0, %v8557_v44  ;;  %7418 = vmatprep.subr.msk.bf16.mxu1 %vm3344_vm0, %v8609_v28  ;;  %v3413_v37 = vsel %vm3344_vm0, %v8609_v28, 0 }
 0x211   :  { %9564 = vst [vmem:[#allocation16_spill] sm:$0xff] %v8615_v36  ;;  %7073 = vmatpush3.bf16.xpose.msra.mxu1 %v3413_v37 }
 0x213   :  { %v2870_v38 = vpop.f32.mrb[28].mxu0  ;;  %v3016_v41 = vpop.f32.mrb[28].mxu1 }
 0x214   :  { %v2872_v42 = vpop.f32.mrb[29].mxu0  ;;  %v3018_v43 = vpop.f32.mrb[29].mxu1 }
 0x215   :  { %v2874_v46 = vpop.f32.mrb[30].mxu0  ;;  %v3020_v48 = vpop.f32.mrb[30].mxu1 }
 0x216   :  { %v8623_v49 = vpack.c.bf16 %v2874_v46, %v2870_v38  ;;  %v2876_v52 = vpop.f32.mrb[31].mxu0  ;;  %v8625_v54 = vpack.c.bf16 %v3020_v48, %v3016_v41  ;;  %v3022_v55 = vpop.f32.mrb[31].mxu1 }
 0x217   :  { %v8627_v56 = vpack.c.bf16 %v2876_v52, %v2872_v42  ;;  %v8629_v14 = vpack.c.bf16 %v3022_v55, %v3018_v43 }
 0x218   :  { %7419 = vmatprep.subr.msk.bf16.mxu1 %vm3344_vm0, %v8623_v49  ;;  %v3416_v57 = vsel %vm3344_vm0, %v8623_v49, 0 }
 0x219   :  { %9565 = vst [vmem:[#allocation17_spill] sm:$0xff] %v8629_v14  ;;  %7075 = vmatpush3.bf16.xpose.msra.mxu1 %v3416_v57 }
 0x220   :  { %7077 = vmatmul.mubr.msk.bf16.vlgmr.msra.gmra.mrb[48].mxu1 %vm3344_vm0, %v8573_v51 }
 0x27b   :  { %v3132_v58 = vpop.f32.mrb[32].mxu0  ;;  %v3278_v13 = vpop.f32.mrb[32].mxu1 }
 0x27c   :  { %v3134_v60 = vpop.f32.mrb[33].mxu0  ;;  %v3280_v20 = vpop.f32.mrb[33].mxu1 }
 0x27d   :  { %v3136_v27 = vpop.f32.mrb[34].mxu0  ;;  %v3282_v63 = vpop.f32.mrb[34].mxu1 }
 0x27e   :  { %v8637_v1 = vpack.c.bf16 %v3136_v27, %v3132_v58  ;;  %v3138_v3 = vpop.f32.mrb[35].mxu0  ;;  %v8639_v25 = vpack.c.bf16 %v3282_v63, %v3278_v13  ;;  %v3284_v39 = vpop.f32.mrb[35].mxu1 }
 0x27f   :  { %v8641_v4 = vpack.c.bf16 %v3138_v3, %v3134_v60  ;;  %v8643_v6 = vpack.c.bf16 %v3284_v39, %v3280_v20 }
 0x280   :  { %7080 = vmatprep.subr.bf16.mxu0 %v8637_v1 }
 0x281   :  { %9566 = vst [vmem:[#allocation18_spill] sm:$0xff] %v8643_v6  ;;  %7081 = vmatpush3.bf16.msra.mxu0 %v8637_v1 }
 0x283   :  { %v3142_v47 = vpop.f32.mrb[36].mxu0  ;;  %v3288_v9 = vpop.f32.mrb[36].mxu1 }
 0x284   :  { %v3144_v35 = vpop.f32.mrb[37].mxu0  ;;  %v3290_v10 = vpop.f32.mrb[37].mxu1 }
 0x285   :  { %v3146_v12 = vpop.f32.mrb[38].mxu0  ;;  %v3292_v16 = vpop.f32.mrb[38].mxu1 }
 0x286   :  { %v8647_v18 = vpack.c.bf16 %v3146_v12, %v3142_v47  ;;  %v3148_v26 = vpop.f32.mrb[39].mxu0  ;;  %v8649_v29 = vpack.c.bf16 %v3292_v16, %v3288_v9  ;;  %v3294_v32 = vpop.f32.mrb[39].mxu1 }
 0x287   :  { %v8651_v37 = vpack.c.bf16 %v3148_v26, %v3144_v35  ;;  %v8653_v38 = vpack.c.bf16 %v3294_v32, %v3290_v10 }
 0x288   :  { %7082 = vmatprep.subr.bf16.mxu0 %v8647_v18 }
 0x289   :  { %9567 = vst [vmem:[#allocation19_spill] sm:$0xff] %v8653_v38  ;;  %7083 = vmatpush3.bf16.msra.mxu0 %v8647_v18 }
 0x28b   :  { %v3152_v41 = vpop.f32.mrb[40].mxu0  ;;  %v3298_v42 = vpop.f32.mrb[40].mxu1 }
 0x28c   :  { %v3154_v43 = vpop.f32.mrb[41].mxu0  ;;  %v3300_v46 = vpop.f32.mrb[41].mxu1 }
 0x28d   :  { %v3156_v48 = vpop.f32.mrb[42].mxu0  ;;  %v3302_v52 = vpop.f32.mrb[42].mxu1 }
 0x28e   :  { %v8657_v55 = vpack.c.bf16 %v3156_v48, %v3152_v41  ;;  %v3158_v57 = vpop.f32.mrb[43].mxu0  ;;  %v8659_v58 = vpack.c.bf16 %v3302_v52, %v3298_v42  ;;  %v3304_v13 = vpop.f32.mrb[43].mxu1  ;;  %v3317_v41 = vlaneseq }
 0x28f   :  { %v8661_v60 = vpack.c.bf16 %v3158_v57, %v3154_v43  ;;  %v8663_v20 = vpack.c.bf16 %v3304_v13, %v3300_v46  ;;  %v8409_v13 = vmov -1e+30  }
 0x290   :  { %7088 = vmatprep.subr.bf16.mxu1 %v8657_v55  ;;  %v3318_v42 = vshrl.u32 %v3317_v41, 7  ;;  %v3323_v46 = vand.u32 127, %v3317_v41 }
 0x291   :  { %9568 = vst [vmem:[#allocation20_spill] sm:$0xff] %v8663_v20  ;;  %7089 = vmatpush3.bf16.msra.mxu1 %v8657_v55 }
 0x292   :  { %v3320_v43 = vadd.s32 16, %v3318_v42  ;;  %v3321_v48 = vadd.s32 24, %v3318_v42  ;;  %vm3324_vm3 = vcmp.le.s32.totalorder %v3323_v46, %v3318_v42  ;;  %v3319_v52 = vadd.s32 8, %v3318_v42 }
 0x293   :  { %v3162_v27 = vpop.f32.mrb[44].mxu0  ;;  %v3308_v63 = vpop.f32.mrb[44].mxu1 }
 0x294   :  { %v3164_v3 = vpop.f32.mrb[45].mxu0  ;;  %v3310_v39 = vpop.f32.mrb[45].mxu1  ;;  %vm3326_vm1 = vcmp.le.s32.totalorder %v3323_v46, %v3320_v43  ;;  %vm3327_vm2 = vcmp.le.s32.totalorder %v3323_v46, %v3321_v48  ;;  %vm3325_vm5 = vcmp.le.s32.totalorder %v3323_v46, %v3319_v52 }
 0x295   :  { %v3166_v47 = vpop.f32.mrb[46].mxu0  ;;  %v3312_v9 = vpop.f32.mrb[46].mxu1 }
 0x296   :  { %v8667_v35 = vpack.c.bf16 %v3166_v47, %v3162_v27  ;;  %v3168_v10 = vpop.f32.mrb[47].mxu0  ;;  %v8669_v12 = vpack.c.bf16 %v3312_v9, %v3308_v63  ;;  %v3314_v16 = vpop.f32.mrb[47].mxu1  ;;  %v8677_v27 = vsel %vm3326_vm1, 0.0, %v8409_v13  ;;  %v8679_v9 = vsel %vm3327_vm2, 0.0, %v8409_v13 }
 0x297   :  { %v8671_v26 = vpack.c.bf16 %v3168_v10, %v3164_v3  ;;  %v8673_v32 = vpack.c.bf16 %v3314_v16, %v3310_v39  ;;  %v8681_v10 = vsel %vm3324_vm3, 0.0, %v8409_v13 }
 0x298   :  { %7090 = vmatprep.subr.bf16.mxu1 %v8667_v35 }
 0x299   :  { %9569 = vst [vmem:[#allocation21_spill] sm:$0xff] %v8673_v32  ;;  %7091 = vmatpush3.bf16.msra.mxu1 %v8667_v35 }
 0x2e3   :  { %v7070_v57 = vpop.f32.mrb[48].mxu0 }
 0x2e4   :  { %v3469_v63 = vmul.f32 0.125, %v7070_v57  ;;  %v3391_v3 = vpop.f32.mrb[49].mxu0 }
 0x2e5   :  { %v3467_v39 = vmul.f32 0.125, %v3391_v3  ;;  %v7071_v47 = vpop.f32.mrb[50].mxu0  ;;  %v8687_v3 = vsel %vm3325_vm5, 0.0, %v8409_v13 }
 0x2e6   :  { %v3470_v16 = vmul.f32 0.125, %v7071_v47  ;;  %v3394_v41 = vpop.f32.mrb[51].mxu0  ;;  %v3477_v43 = vadd.f32 %v3469_v63, %v8677_v27 }
 0x2e7   :  { %v3468_v48 = vmul.f32 0.125, %v3394_v41  ;;  %v3475_v57 = vadd.f32 %v3467_v39, %v8681_v10 }
 0x2e8   :  { %v3490_v42 = vsel %vm3483_vm4, %v3477_v43, -inf  ;;  %v3478_v32 = vadd.f32 %v3470_v16, %v8679_v9 }
 0x2e9   :  { %3491 = vmax.xlane.f32.xlu0 %v3490_v42  ;;  %v3484_v20 = vsel %vm3483_vm4, %v3475_v57, -inf  ;;  %v3476_v47 = vadd.f32 %v3468_v48, %v8687_v3 }
 0x2ea   :  { %v3493_v24 = vsel %vm3483_vm4, %v3478_v32, -inf }
 0x2eb   :  { %3494 = vmax.xlane.f32.xlu1 %v3493_v24  ;;  %v3487_v46 = vsel %vm3483_vm4, %v3476_v47, -inf }
 0x2ed   :  { %3485 = vmax.xlane.f32.xlu0 %v3484_v20 }
 0x2f1   :  { %3488 = vmax.xlane.f32.xlu0 %v3487_v46 }
 0x2f3   :  { %v7078_v52 = vpop.f32.mrb[48].mxu1 }
 0x2f4   :  { %v3473_v63 = vmul.f32 0.125, %v7078_v52  ;;  %v3452_v41 = vpop.f32.mrb[49].mxu1 }
 0x2f5   :  { %v3471_v16 = vmul.f32 0.125, %v3452_v41  ;;  %v7079_v14 = vpop.f32.mrb[50].mxu1 }
 0x2f6   :  { %v3455_v39 = vpop.f32.mrb[51].mxu1  ;;  %v3481_v13 = vadd.f32 %v3473_v63, %v8677_v27  ;;  %v3474_v36 = vmul.f32 0.125, %v7079_v14 }
 0x2f7   :  { %v3472_v42 = vmul.f32 0.125, %v3455_v39  ;;  %v3479_v2 = vadd.f32 %v3471_v16, %v8681_v10 }
 0x2f8   :  { %v3502_v24 = vsel %vm3483_vm4, %v3481_v13, -inf  ;;  %v3482_v52 = vadd.f32 %v3474_v36, %v8679_v9 }
 0x2f9   :  { %3503 = vmax.xlane.f32.xlu0 %v3502_v24  ;;  %v3496_v20 = vsel %vm3483_vm4, %v3479_v2, -inf  ;;  %v3480_v48 = vadd.f32 %v3472_v42, %v8687_v3 }
 0x2fa   :  { %3497 = vmax.xlane.f32.xlu1 %v3496_v20  ;;  %v3505_v41 = vsel %vm3483_vm4, %v3482_v52, -inf }
 0x2fb   :  { %v3499_v46 = vsel %vm3483_vm4, %v3480_v48, -inf }
 0x2fe   :  { %3500 = vmax.xlane.f32.xlu1 %v3499_v46 }
 0x302   :  { %3506 = vmax.xlane.f32.xlu1 %v3505_v41 }
 0x376   :  { %v3492_v63 = vpop.xlane.xlu0 %3491 }
 0x377   :  { %v3510_v39 = vsub.f32 %v3477_v43, %v3492_v63 }
 0x378   :  { %v3495_v16 = vpop.xlane.xlu1 %3494 }
 0x379   :  { %v3520_v38 = vmul.f32 1.442695, %v3510_v39  ;;  %v3511_v5 = vsub.f32 %v3478_v32, %v3495_v16 }
 0x37a   :  { %v3486_v14 = vpop.xlane.xlu0 %3485 }
 0x37b   :  { %8059 = vpow2.f32 %v3520_v38  ;;  %v3522_v24 = vmul.f32 1.442695, %v3511_v5  ;;  %v3508_v6 = vsub.f32 %v3475_v57, %v3486_v14 }
 0x37d   :  { %8061 = vpow2.f32 %v3522_v24  ;;  %v3516_v42 = vmul.f32 1.442695, %v3508_v6 }
 0x37e   :  { %v3489_v20 = vpop.xlane.xlu0 %3488 }
 0x37f   :  { %8063 = vpow2.f32 %v3516_v42  ;;  %v3509_v8 = vsub.f32 %v3476_v47, %v3489_v20 }
 0x381   :  { %v3518_v21 = vmul.f32 1.442695, %v3509_v8 }
 0x383   :  { %8065 = vpow2.f32 %v3518_v21 }
 0x385   :  { %v8701_v36 = vpop.eup %8059 }
 0x386   :  { %v3504_v46 = vpop.xlane.xlu0 %3503  ;;  %v3538_v43 = vsel %vm3483_vm4, %v8701_v36, 0.0 }
 0x387   :  { %v8062_v41 = vpop.eup %8061  ;;  %v3514_v63 = vsub.f32 %v3481_v13, %v3504_v46  ;;  %v3498_v32 = vpop.xlane.xlu1 %3497  ;;  %3539 = vadd.xlane.f32.xlu0 %v3538_v43 }
 0x388   :  { %v3512_v38 = vsub.f32 %v3479_v2, %v3498_v32  ;;  %v3541_v5 = vsel %vm3483_vm4, %v8062_v41, 0.0 }
 0x389   :  { %v8064_v57 = vpop.eup %8063  ;;  %v3528_v6 = vmul.f32 1.442695, %v3514_v63  ;;  %3542 = vadd.xlane.f32.xlu1 %v3541_v5 }
 0x38a   :  { %v3524_v39 = vmul.f32 1.442695, %v3512_v38  ;;  %v3532_v8 = vsel %vm3483_vm4, %v8064_v57, 0.0 }
 0x38b   :  { %8067 = vpow2.f32 %v3528_v6  ;;  %3533 = vadd.xlane.f32.xlu0 %v3532_v8  ;;  %v3501_v24 = vpop.xlane.xlu1 %3500 }
 0x38c   :  { %8069 = vpow2.f32 %v3524_v39  ;;  %v3513_v46 = vsub.f32 %v3480_v48, %v3501_v24 }
 0x38d   :  { %v8066_v21 = vpop.eup %8065 }
 0x38e   :  { %v3535_v47 = vsel %vm3483_vm4, %v8066_v21, 0.0  ;;  %v3526_v63 = vmul.f32 1.442695, %v3513_v46 }
 0x38f   :  { %3536 = vadd.xlane.f32.xlu1 %v3535_v47  ;;  %v3507_v42 = vpop.xlane.xlu1 %3506 }
 0x390   :  { %v3515_v20 = vsub.f32 %v3482_v52, %v3507_v42 }
 0x392   :  { %v3530_v43 = vmul.f32 1.442695, %v3515_v20 }
 0x394   :  { %8071 = vpow2.f32 %v3530_v43 }
 0x395   :  { %v8708_v16 = vpop.eup %8067  ;;  %8073 = vpow2.f32 %v3526_v63 }
 0x396   :  { %v3550_v2 = vsel %vm3483_vm4, %v8708_v16, 0.0  ;;  %v8712_v13 = vpop.eup %8069 }
 0x397   :  { %3551 = vadd.xlane.f32.xlu0 %v3550_v2  ;;  %v3544_v14 = vsel %vm3483_vm4, %v8712_v13, 0.0 }
 0x39b   :  { %3545 = vadd.xlane.f32.xlu0 %v3544_v14 }
 0x39e   :  { %v8072_v32 = vpop.eup %8071 }
 0x39f   :  { %v8074_v38 = vpop.eup %8073 }
 0x3a0   :  { %3767 = vrot.lane.b32.xlu1 %v8609_v28, %s8410_s1  ;;  %v3553_v28 = vsel %vm3483_vm4, %v8072_v32, 0.0  ;;  %v3547_v52 = vsel %vm3483_vm4, %v8074_v38, 0.0 }
 0x3b1   :  { %3694 = vrot.lane.b32.xlu0 %v8585_v59, %s8410_s1 }
 0x3b5   :  { %3688 = vrot.lane.b32.xlu0 %v8549_v11, %s8410_s1 }
 0x3b9   :  { %3690 = vrot.lane.b32.xlu0 %v8557_v44, %s8410_s1 }
 0x3c4   :  { %3554 = vadd.xlane.f32.xlu1 %v3553_v28 }
 0x3c8   :  { %3548 = vadd.xlane.f32.xlu1 %v3547_v52 }
 0x3d9   :  { %3696 = vrot.lane.b32.xlu1 %v8597_v31, %s8410_s1 }
 0x3dd   :  { %3769 = vrot.lane.b32.xlu1 %v8623_v49, %s8410_s1 }
 0x3e1   :  { %3761 = vrot.lane.b32.xlu1 %v8565_v62, %s8410_s1 }
 0x3e5   :  { %3763 = vrot.lane.b32.xlu1 %v8573_v51, %s8410_s1 }
 0x414   :  { %v3540_v11 = vpop.xlane.xlu0 %3539 }
 0x416   :  { %v3543_v44 = vpop.xlane.xlu1 %3542 }
 0x417   :  { %8075 = vrcp.f32 %v3543_v44 }
 0x418   :  { %v3534_v59 = vpop.xlane.xlu0 %3533 }
 0x419   :  { %8077 = vrcp.f32 %v3534_v59 }
 0x41a   :  { %8079 = vrcp.f32 %v3540_v11 }
 0x41c   :  { %v3537_v48 = vpop.xlane.xlu1 %3536 }
 0x41d   :  { %8081 = vrcp.f32 %v3537_v48 }
 0x420   :  { %v3768_v5 = vpop.permute.xlu1 %3767 }
 0x421   :  { %7422 = vmatprep.subr.msk.bf16.mxu1 %vm3344_vm0, %v3768_v5  ;;  %v8076_v31 = vpop.eup %8075 }
 0x422   :  { %v3567_v62 = vmul.f32 %v8076_v31, %v8062_v41 }
 0x423   :  { %v8078_v49 = vpop.eup %8077 }
 0x424   :  { %v3552_v6 = vpop.xlane.xlu0 %3551  ;;  %v8080_v39 = vpop.eup %8079  ;;  %v3564_v2 = vmul.f32 %v8078_v49, %v8064_v57 }
 0x425   :  { %v3566_v14 = vmul.f32 %v8080_v39, %v8701_v36 }
 0x427   :  { %v8082_v8 = vpop.eup %8081  ;;  %v3573_v42 = vpack.c.bf16 %v3567_v62, %v3566_v14 }
 0x428   :  { %v3546_v47 = vpop.xlane.xlu0 %3545  ;;  %v3565_v51 = vmul.f32 %v8082_v8, %v8066_v21 }
 0x42a   :  { %v3572_v24 = vpack.c.bf16 %v3565_v51, %v3564_v2 }
 0x42c   :  { %7084 = vmatprep.mubr.msk.bf16.mxu0 %vm3483_vm4, %v3572_v24  ;;  %v3695_v20 = vpop.permute.xlu0 %3694 }
 0x42d   :  { %7085 = vmatmul.mubr.msk.bf16.vlgmr.msra.gmra.mrb[52].mxu0 %vm3483_vm4, %v3573_v42  ;;  %7420 = vmatprep.subr.msk.bf16.mxu0 %vm3344_vm0, %v3695_v20  ;;  %v3705_v46 = vsel %vm3344_vm0, %v3695_v20, 0 }
 0x42e   :  { %7097 = vmatpush3.bf16.xpose.msra.mxu0 %v3705_v46 }
 0x430   :  { %v3689_v43 = vpop.permute.xlu0 %3688 }
 0x431   :  { %7100 = vmatprep.mubr.msk.bf16.mxu0 %vm3344_vm0, %v3689_v43 }
 0x434   :  { %v3691_v48 = vpop.permute.xlu0 %3690 }
 0x451   :  { %v3555_v41 = vpop.xlane.xlu1 %3554 }
 0x452   :  { %8083 = vrcp.f32 %v3555_v41 }
 0x453   :  { %8085 = vrcp.f32 %v3546_v47  ;;  %v3778_v47 = vsel %vm3344_vm0, %v3768_v5, 0 }
 0x454   :  { %8087 = vrcp.f32 %v3552_v6 }
 0x455   :  { %v3549_v36 = vpop.xlane.xlu1 %3548 }
 0x456   :  { %8089 = vrcp.f32 %v3549_v36 }
 0x459   :  { %v3697_v57 = vpop.permute.xlu1 %3696 }
 0x45a   :  { %7421 = vmatprep.subr.msk.bf16.mxu0 %vm3344_vm0, %v3697_v57  ;;  %v3708_v21 = vsel %vm3344_vm0, %v3697_v57, 0 }
 0x45b   :  { %7099 = vmatpush3.bf16.xpose.msra.mxu0 %v3708_v21 }
 0x45c   :  { %v8084_v63 = vpop.eup %8083 }
 0x45d   :  { %v8086_v28 = vpop.eup %8085  ;;  %v3571_v44 = vmul.f32 %v8084_v63, %v8072_v32  ;;  %v3770_v59 = vpop.permute.xlu1 %3769 }
 0x45e   :  { %v8088_v52 = vpop.eup %8087  ;;  %v3568_v31 = vmul.f32 %v8086_v28, %v8712_v13  ;;  %v3781_v13 = vsel %vm3344_vm0, %v3770_v59, 0 }
 0x45f   :  { %v3570_v6 = vmul.f32 %v8088_v52, %v8708_v16 }
 0x460   :  { %v8090_v11 = vpop.eup %8089 }
 0x461   :  { %v3569_v49 = vmul.f32 %v8090_v11, %v8074_v38  ;;  %v3575_v8 = vpack.c.bf16 %v3571_v44, %v3570_v6  ;;  %v3762_v62 = vpop.permute.xlu1 %3761 }
 0x462   :  { %7101 = vmatmul.mubr.msk.bf16.vlgmr.msra.gmra.mrb[56].mxu0 %vm3344_vm0, %v3691_v48 }
 0x463   :  { %v3574_v39 = vpack.c.bf16 %v3569_v49, %v3568_v31 }
 0x465   :  { %7092 = vmatprep.mubr.msk.bf16.mxu1 %vm3483_vm4, %v3574_v39  ;;  %v3764_v16 = vpop.permute.xlu1 %3763 }
 0x466   :  { %7093 = vmatmul.mubr.msk.bf16.vlgmr.msra.gmra.mrb[52].mxu1 %vm3483_vm4, %v3575_v8 }
 0x467   :  { %7105 = vmatpush3.bf16.xpose.msra.mxu1 %v3778_v47  ;;  %7108 = vmatprep.mubr.msk.bf16.mxu1 %vm3344_vm0, %v3762_v62 }
 0x468   :  { %7423 = vmatprep.subr.msk.bf16.mxu1 %vm3344_vm0, %v3770_v59 }
 0x46f   :  { %7107 = vmatpush3.bf16.xpose.msra.mxu1 %v3781_v13 }
 0x476   :  { %7109 = vmatmul.mubr.msk.bf16.vlgmr.msra.gmra.mrb[56].mxu1 %vm3344_vm0, %v3764_v16 }
 0x500   :  { %v8753_v32 = vpop.f32.mrb[52].mxu0 }
 0x501   :  { %v8755_v38 = vpop.f32.mrb[53].mxu0 }
 0x502   :  { %v8757_v2 = vpop.f32.mrb[54].mxu0 }
 0x503   :  { %9570 = vst [vmem:[#allocation22_spill] sm:$0xff] %v8757_v2  ;;  %v8759_v51 = vpop.f32.mrb[55].mxu0 }
 0x504   :  { %9571 = vst [vmem:[#allocation23_spill] sm:$0xff] %v8759_v51 }
 0x535   :  { %v7102_v5 = vpop.f32.mrb[56].mxu0 }
 0x536   :  { %v3834_v14 = vmul.f32 0.125, %v7102_v5  ;;  %v3744_v24 = vpop.f32.mrb[57].mxu0 }
 0x537   :  { %v3832_v42 = vmul.f32 0.125, %v3744_v24  ;;  %v7103_v20 = vpop.f32.mrb[58].mxu0 }
 0x538   :  { %v3835_v46 = vmul.f32 0.125, %v7103_v20  ;;  %v3747_v43 = vpop.f32.mrb[59].mxu0  ;;  %v3842_v41 = vadd.f32 %v3834_v14, %v8677_v27 }
 0x539   :  { %v3833_v36 = vmul.f32 0.125, %v3747_v43  ;;  %v8762_v57 = vpop.f32.mrb[52].mxu1  ;;  %v3840_v52 = vadd.f32 %v3832_v42, %v8681_v10 }
 0x53a   :  { %9572 = vst [vmem:[#allocation24_spill] sm:$0xff] %v8762_v57  ;;  %v8764_v21 = vpop.f32.mrb[53].mxu1  ;;  %v3854_v63 = vsel %vm3483_vm4, %v3842_v41, -inf  ;;  %v3843_v28 = vadd.f32 %v3835_v46, %v8679_v9 }
 0x53b   :  { %9573 = vst [vmem:[#allocation25_spill] sm:$0xff] %v8764_v21  ;;  %v8769_v11 = vpop.f32.mrb[54].mxu1  ;;  %3855 = vmax.xlane.f32.xlu0 %v3854_v63  ;;  %v3841_v48 = vadd.f32 %v3833_v36, %v8687_v3  ;;  %v3848_v31 = vsel %vm3483_vm4, %v3840_v52, -inf }
 0x53c   :  { %9574 = vst [vmem:[#allocation26_spill] sm:$0xff] %v8769_v11  ;;  %v8771_v44 = vpop.f32.mrb[55].mxu1  ;;  %v3857_v59 = vsel %vm3483_vm4, %v3843_v28, -inf }
 0x53d   :  { %9575 = vst [vmem:[#allocation27_spill] sm:$0xff] %v8771_v44  ;;  %3858 = vmax.xlane.f32.xlu1 %v3857_v59  ;;  %v3851_v49 = vsel %vm3483_vm4, %v3841_v48, -inf }
 0x53f   :  { %3849 = vmax.xlane.f32.xlu0 %v3848_v31 }
 0x541   :  { %3852 = vmax.xlane.f32.xlu1 %v3851_v49 }
 0x549   :  { %v7110_v6 = vpop.f32.mrb[56].mxu1 }
 0x54a   :  { %v3817_v39 = vpop.f32.mrb[57].mxu1  ;;  %v3838_v24 = vmul.f32 0.125, %v7110_v6 }
 0x54b   :  { %v3836_v8 = vmul.f32 0.125, %v3817_v39  ;;  %v7111_v62 = vpop.f32.mrb[58].mxu1 }
 0x54c   :  { %v3839_v47 = vmul.f32 0.125, %v7111_v62  ;;  %v3820_v13 = vpop.f32.mrb[59].mxu1  ;;  %v3846_v36 = vadd.f32 %v3838_v24, %v8677_v27 }
 0x54d   :  { %v3837_v16 = vmul.f32 0.125, %v3820_v13  ;;  %v3844_v5 = vadd.f32 %v3836_v8, %v8681_v10 }
 0x54e   :  { %v3847_v14 = vadd.f32 %v3839_v47, %v8679_v9  ;;  %v3866_v63 = vsel %vm3483_vm4, %v3846_v36, -inf }
 0x54f   :  { %v3860_v42 = vsel %vm3483_vm4, %v3844_v5, -inf  ;;  %v3845_v20 = vadd.f32 %v3837_v16, %v8687_v3 }
 0x550   :  { %3861 = vmax.xlane.f32.xlu0 %v3860_v42  ;;  %v3869_v46 = vsel %vm3483_vm4, %v3847_v14, -inf }
 0x551   :  { %3870 = vmax.xlane.f32.xlu1 %v3869_v46  ;;  %v3863_v43 = vsel %vm3483_vm4, %v3845_v20, -inf }
 0x554   :  { %3864 = vmax.xlane.f32.xlu0 %v3863_v43 }
 0x558   :  { %3867 = vmax.xlane.f32.xlu0 %v3866_v63 }
 0x5c8   :  { %v3856_v59 = vpop.xlane.xlu0 %3855 }
 0x5c9   :  { %v3874_v31 = vsub.f32 %v3842_v41, %v3856_v59 }
 0x5ca   :  { %v3859_v49 = vpop.xlane.xlu1 %3858 }
 0x5cb   :  { %v3884_v6 = vmul.f32 1.442695, %v3874_v31  ;;  %v3875_v39 = vsub.f32 %v3843_v28, %v3859_v49 }
 0x5cc   :  { %v3850_v8 = vpop.xlane.xlu0 %3849 }
 0x5cd   :  { %8091 = vpow2.f32 %v3884_v6  ;;  %v3886_v62 = vmul.f32 1.442695, %v3875_v39  ;;  %v3872_v47 = vsub.f32 %v3840_v52, %v3850_v8 }
 0x5ce   :  { %v3853_v13 = vpop.xlane.xlu1 %3852 }
 0x5cf   :  { %8093 = vpow2.f32 %v3886_v62  ;;  %v3880_v16 = vmul.f32 1.442695, %v3872_v47  ;;  %v3873_v42 = vsub.f32 %v3841_v48, %v3853_v13 }
 0x5d1   :  { %8095 = vpow2.f32 %v3880_v16  ;;  %v3882_v46 = vmul.f32 1.442695, %v3873_v42 }
 0x5d3   :  { %8097 = vpow2.f32 %v3882_v46 }
 0x5d7   :  { %v8785_v24 = vpop.eup %8091 }
 0x5d8   :  { %v3902_v43 = vsel %vm3483_vm4, %v8785_v24, 0.0 }
 0x5d9   :  { %v8789_v41 = vpop.eup %8093  ;;  %3903 = vadd.xlane.f32.xlu0 %v3902_v43 }
 0x5da   :  { %v3905_v28 = vsel %vm3483_vm4, %v8789_v41, 0.0 }
 0x5db   :  { %v8096_v63 = vpop.eup %8095  ;;  %3906 = vadd.xlane.f32.xlu1 %v3905_v28 }
 0x5dc   :  { %v3896_v52 = vsel %vm3483_vm4, %v8096_v63, 0.0 }
 0x5dd   :  { %v8098_v59 = vpop.eup %8097  ;;  %v3862_v48 = vpop.xlane.xlu0 %3861  ;;  %3897 = vadd.xlane.f32.xlu0 %v3896_v52 }
 0x5de   :  { %v3899_v31 = vsel %vm3483_vm4, %v8098_v59, 0.0  ;;  %v3876_v6 = vsub.f32 %v3844_v5, %v3862_v48 }
 0x5df   :  { %3900 = vadd.xlane.f32.xlu1 %v3899_v31 }
 0x5e0   :  { %v3888_v62 = vmul.f32 1.442695, %v3876_v6 }
 0x5e1   :  { %v3865_v49 = vpop.xlane.xlu0 %3864 }
 0x5e2   :  { %v3877_v28 = vsub.f32 %v3845_v20, %v3865_v49 }
 0x5e5   :  { %v3868_v39 = vpop.xlane.xlu0 %3867 }
 0x5e6   :  { %v3878_v8 = vsub.f32 %v3846_v36, %v3868_v39  ;;  %v3871_v36 = vpop.xlane.xlu1 %3870 }
 0x5e7   :  { %v3879_v46 = vsub.f32 %v3847_v14, %v3871_v36 }
 0x5e8   :  { %v3892_v47 = vmul.f32 1.442695, %v3878_v8 }
 0x5e9   :  { %v3894_v43 = vmul.f32 1.442695, %v3879_v46 }
 0x5ea   :  { %8099 = vpow2.f32 %v3892_v47 }
 0x5eb   :  { %8101 = vpow2.f32 %v3888_v62 }
 0x5ec   :  { %8103 = vpow2.f32 %v3894_v43 }
 0x5f0   :  { %4005 = vrot.lane.b32.xlu1 %v8657_v55, %s8410_s1  ;;  %v3890_v55 = vmul.f32 1.442695, %v3877_v28 }
 0x5f2   :  { %8105 = vpow2.f32 %v3890_v55 }
 0x5f4   :  { %v8797_v13 = vpop.eup %8099  ;;  %3944 = vrot.lane.b32.xlu1 %v8647_v18, %s8410_s1 }
 0x5f5   :  { %v3914_v16 = vsel %vm3483_vm4, %v8797_v13, 0.0  ;;  %v8803_v42 = vpop.eup %8101 }
 0x5f6   :  { %3915 = vadd.xlane.f32.xlu0 %v3914_v16  ;;  %v3908_v5 = vsel %vm3483_vm4, %v8803_v42, 0.0  ;;  %v8809_v18 = vpop.eup %8103 }
 0x5f7   :  { %v3917_v52 = vsel %vm3483_vm4, %v8809_v18, 0.0 }
 0x5fa   :  { %3909 = vadd.xlane.f32.xlu0 %v3908_v5 }
 0x5fc   :  { %v8813_v48 = vpop.eup %8105 }
 0x5fd   :  { %v3911_v31 = vsel %vm3483_vm4, %v8813_v48, 0.0 }
 0x610   :  { %3942 = vrot.lane.b32.xlu0 %v8637_v1, %s8410_s1 }
 0x618   :  { %3918 = vadd.xlane.f32.xlu1 %v3917_v52 }
 0x61c   :  { %3912 = vadd.xlane.f32.xlu1 %v3911_v31 }
 0x62d   :  { %4007 = vrot.lane.b32.xlu1 %v8667_v35, %s8410_s1 }
 0x666   :  { %v3904_v14 = vpop.xlane.xlu0 %3903 }
 0x668   :  { %v3907_v20 = vpop.xlane.xlu1 %3906 }
 0x66a   :  { %v3898_v49 = vpop.xlane.xlu0 %3897 }
 0x66b   :  { %8107 = vrcp.f32 %v3898_v49 }
 0x66c   :  { %v3901_v1 = vpop.xlane.xlu1 %3900 }
 0x66d   :  { %8109 = vrcp.f32 %v3901_v1 }
 0x66e   :  { %8111 = vrcp.f32 %v3907_v20 }
 0x66f   :  { %8113 = vrcp.f32 %v3904_v14 }
 0x670   :  { %v4006_v6 = vpop.permute.xlu1 %4005 }
 0x671   :  { %7120 = vmatprep.subr.bf16.mxu1 %v4006_v6 }
 0x672   :  { %7121 = vmatpush3.bf16.msra.mxu1 %v4006_v6 }
 0x674   :  { %v3945_v28 = vpop.permute.xlu1 %3944 }
 0x675   :  { %v8108_v39 = vpop.eup %8107 }
 0x676   :  { %v3928_v62 = vmul.f32 %v8108_v39, %v8096_v63 }
 0x677   :  { %v8110_v8 = vpop.eup %8109 }
 0x678   :  { %v3929_v47 = vmul.f32 %v8110_v8, %v8098_v59  ;;  %v8112_v36 = vpop.eup %8111  ;;  %v4085_v59 = vsel %vm3344_vm0, %v8589_v15, 0 }
 0x679   :  { %v8114_v43 = vpop.eup %8113  ;;  %v3931_v55 = vmul.f32 %v8112_v36, %v8789_v41 }
 0x67a   :  { %v3936_v16 = vpack.c.bf16 %v3929_v47, %v3928_v62  ;;  %v3930_v52 = vmul.f32 %v8114_v43, %v8785_v24  ;;  %v4088_v24 = vsel %vm3344_vm0, %v8601_v7, 0 }
 0x67c   :  { %7116 = vmatprep.mubr.msk.bf16.mxu0 %vm3483_vm4, %v3936_v16  ;;  %v3937_v63 = vpack.c.bf16 %v3931_v55, %v3930_v52 }
 0x683   :  { %v3916_v5 = vpop.xlane.xlu0 %3915 }
 0x687   :  { %v3910_v35 = vpop.xlane.xlu0 %3909 }
 0x68b   :  { %v3943_v46 = vpop.permute.xlu0 %3942 }
 0x68c   :  { %7112 = vmatprep.subr.bf16.mxu0 %v3943_v46 }
 0x68d   :  { %7113 = vmatpush3.bf16.msra.mxu0 %v3943_v46 }
 0x68e   :  { %7114 = vmatprep.subr.bf16.mxu0 %v3945_v28 }
 0x691   :  { %7115 = vmatpush3.bf16.msra.mxu0 %v3945_v28 }
 0x692   :  { %7424 = vmatprep.subr.msk.bf16.mxu0 %vm3344_vm0, %v8589_v15 }
 0x694   :  { %7117 = vmatmul.mubr.msk.bf16.vlgmr.msra.gmra.mrb[60].mxu0 %vm3483_vm4, %v3937_v63 }
 0x695   :  { %7132 = vmatprep.mubr.msk.bf16.mxu0 %vm3344_vm0, %v8553_v19 }
 0x69a   :  { %7129 = vmatpush3.bf16.xpose.msra.mxu0 %v4085_v59 }
 0x69b   :  { %7425 = vmatprep.subr.msk.bf16.mxu0 %vm3344_vm0, %v8601_v7 }
 0x6a2   :  { %7131 = vmatpush3.bf16.xpose.msra.mxu0 %v4088_v24 }
 0x6a3   :  { %7144 = vmatprep.subr.bf16.mxu0 %v8641_v4 }
 0x6a5   :  { %v3919_v41 = vpop.xlane.xlu1 %3918 }
 0x6a6   :  { %8115 = vrcp.f32 %v3919_v41 }
 0x6a7   :  { %8117 = vrcp.f32 %v3910_v35  ;;  %v4146_v35 = vsel %vm3344_vm0, %v8613_v34, 0 }
 0x6a8   :  { %8119 = vrcp.f32 %v3916_v5 }
 0x6a9   :  { %7133 = vmatmul.mubr.msk.bf16.vlgmr.msra.gmra.mrb[64].mxu0 %vm3344_vm0, %v8561_v53  ;;  %v3913_v31 = vpop.xlane.xlu1 %3912 }
 0x6aa   :  { %7145 = vmatpush3.bf16.msra.mxu0 %v8641_v4  ;;  %8121 = vrcp.f32 %v3913_v31 }
 0x6ab   :  { %7146 = vmatprep.subr.bf16.mxu0 %v8651_v37 }
 0x6ad   :  { %v4008_v14 = vpop.permute.xlu1 %4007 }
 0x6ae   :  { %7147 = vmatpush3.bf16.msra.mxu0 %v8651_v37  ;;  %7122 = vmatprep.subr.bf16.mxu1 %v4008_v14 }
 0x6af   :  { %7123 = vmatpush3.bf16.msra.mxu1 %v4008_v14 }
 0x6b0   :  { %7426 = vmatprep.subr.msk.bf16.mxu1 %vm3344_vm0, %v8613_v34  ;;  %v8116_v20 = vpop.eup %8115 }
 0x6b1   :  { %v8118_v49 = vpop.eup %8117  ;;  %v3935_v39 = vmul.f32 %v8116_v20, %v8809_v18 }
 0x6b2   :  { %v8120_v1 = vpop.eup %8119  ;;  %v3932_v8 = vmul.f32 %v8118_v49, %v8803_v42  ;;  %v4149_v42 = vsel %vm3344_vm0, %v8627_v56, 0 }
 0x6b3   :  { %v3934_v47 = vmul.f32 %v8120_v1, %v8797_v13 }
 0x6b4   :  { %v8122_v6 = vpop.eup %8121 }
 0x6b5   :  { %v3933_v62 = vmul.f32 %v8122_v6, %v8813_v48  ;;  %v3939_v5 = vpack.c.bf16 %v3935_v39, %v3934_v47 }
 0x6b7   :  { %v3938_v16 = vpack.c.bf16 %v3933_v62, %v3932_v8 }
 0x6b9   :  { %7124 = vmatprep.mubr.msk.bf16.mxu1 %vm3483_vm4, %v3938_v16 }
 0x6ba   :  { %7125 = vmatmul.mubr.msk.bf16.vlgmr.msra.gmra.mrb[60].mxu1 %vm3483_vm4, %v3939_v5 }
 0x6bb   :  { %7137 = vmatpush3.bf16.xpose.msra.mxu1 %v4146_v35  ;;  %7140 = vmatprep.mubr.msk.bf16.mxu1 %vm3344_vm0, %v8569_v33 }
 0x6bc   :  { %7427 = vmatprep.subr.msk.bf16.mxu1 %vm3344_vm0, %v8627_v56 }
 0x6c3   :  { %7139 = vmatpush3.bf16.xpose.msra.mxu1 %v4149_v42 }
 0x6c4   :  { %7152 = vmatprep.subr.bf16.mxu1 %v8661_v60 }
 0x6ca   :  { %7141 = vmatmul.mubr.msk.bf16.vlgmr.msra.gmra.mrb[64].mxu1 %vm3344_vm0, %v8577_v22 }
 0x6cb   :  { %7153 = vmatpush3.bf16.msra.mxu1 %v8661_v60 }
 0x6cc   :  { %7154 = vmatprep.subr.bf16.mxu1 %v8671_v26 }
 0x6cf   :  { %7155 = vmatpush3.bf16.msra.mxu1 %v8671_v26 }
 0x767   :  { %v8861_v13 = vpop.f32.mrb[60].mxu0 }
 0x768   :  { %v8863_v18 = vpop.f32.mrb[61].mxu0 }
 0x769   :  { %v8865_v48 = vpop.f32.mrb[62].mxu0 }
 0x76a   :  { %v8867_v36 = vpop.f32.mrb[63].mxu0 }
 0x77c   :  { %v7134_v46 = vpop.f32.mrb[64].mxu0 }
 0x77d   :  { %v4202_v43 = vmul.f32 0.125, %v7134_v46  ;;  %v4124_v28 = vpop.f32.mrb[65].mxu0 }
 0x77e   :  { %v4200_v55 = vmul.f32 0.125, %v4124_v28  ;;  %v7135_v52 = vpop.f32.mrb[66].mxu0 }
 0x77f   :  { %v4203_v63 = vmul.f32 0.125, %v7135_v52  ;;  %v4127_v59 = vpop.f32.mrb[67].mxu0  ;;  %v4210_v24 = vadd.f32 %v4202_v43, %v8677_v27 }
 0x780   :  { %v4201_v41 = vmul.f32 0.125, %v4127_v59  ;;  %v4208_v20 = vadd.f32 %v4200_v55, %v8681_v10 }
 0x781   :  { %v4222_v31 = vsel %vm3483_vm4, %v4210_v24, -inf  ;;  %v4211_v14 = vadd.f32 %v4203_v63, %v8679_v9 }
 0x782   :  { %4223 = vmax.xlane.f32.xlu0 %v4222_v31  ;;  %v4209_v1 = vadd.f32 %v4201_v41, %v8687_v3  ;;  %v4216_v6 = vsel %vm3483_vm4, %v4208_v20, -inf }
 0x783   :  { %v4225_v49 = vsel %vm3483_vm4, %v4211_v14, -inf }
 0x784   :  { %4226 = vmax.xlane.f32.xlu1 %v4225_v49  ;;  %v4219_v39 = vsel %vm3483_vm4, %v4209_v1, -inf }
 0x786   :  { %4217 = vmax.xlane.f32.xlu0 %v4216_v6 }
 0x788   :  { %4220 = vmax.xlane.f32.xlu1 %v4219_v39 }
 0x78d   :  { %v8877_v8 = vpop.f32.mrb[60].mxu1 }
 0x78e   :  { %v8879_v62 = vpop.f32.mrb[61].mxu1 }
 0x78f   :  { %v8881_v47 = vpop.f32.mrb[62].mxu1 }
 0x790   :  { %v8883_v16 = vpop.f32.mrb[63].mxu1 }
 0x79d   :  { %v7142_v5 = vpop.f32.mrb[64].mxu1 }
 0x79e   :  { %v4185_v35 = vpop.f32.mrb[65].mxu1  ;;  %v4206_v59 = vmul.f32 0.125, %v7142_v5 }
 0x79f   :  { %v4204_v42 = vmul.f32 0.125, %v4185_v35  ;;  %v7143_v46 = vpop.f32.mrb[66].mxu1 }
 0x7a0   :  { %v4207_v43 = vmul.f32 0.125, %v7143_v46  ;;  %v4188_v28 = vpop.f32.mrb[67].mxu1  ;;  %v4214_v39 = vadd.f32 %v4206_v59, %v8677_v27 }
 0x7a1   :  { %v4205_v55 = vmul.f32 0.125, %v4188_v28  ;;  %v4212_v52 = vadd.f32 %v4204_v42, %v8681_v10 }
 0x7a2   :  { %v4215_v63 = vadd.f32 %v4207_v43, %v8679_v9  ;;  %v4234_v35 = vsel %vm3483_vm4, %v4214_v39, -inf }
 0x7a3   :  { %v4228_v41 = vsel %vm3483_vm4, %v4212_v52, -inf  ;;  %v4213_v31 = vadd.f32 %v4205_v55, %v8687_v3 }
 0x7a4   :  { %4229 = vmax.xlane.f32.xlu0 %v4228_v41  ;;  %v4237_v49 = vsel %vm3483_vm4, %v4215_v63, -inf }
 0x7a5   :  { %4238 = vmax.xlane.f32.xlu1 %v4237_v49  ;;  %v4231_v6 = vsel %vm3483_vm4, %v4213_v31, -inf }
 0x7a8   :  { %4232 = vmax.xlane.f32.xlu0 %v4231_v6 }
 0x7ac   :  { %4235 = vmax.xlane.f32.xlu0 %v4234_v35 }
 0x80f   :  { %v4224_v42 = vpop.xlane.xlu0 %4223 }
 0x810   :  { %v4242_v46 = vsub.f32 %v4210_v24, %v4224_v42 }
 0x811   :  { %v4227_v43 = vpop.xlane.xlu1 %4226 }
 0x812   :  { %v4252_v5 = vmul.f32 1.442695, %v4242_v46  ;;  %v4243_v28 = vsub.f32 %v4211_v14, %v4227_v43 }
 0x813   :  { %v4218_v11 = vpop.xlane.xlu0 %4217 }
 0x814   :  { %8123 = vpow2.f32 %v4252_v5  ;;  %v4254_v55 = vmul.f32 1.442695, %v4243_v28  ;;  %v4240_v41 = vsub.f32 %v4208_v20, %v4218_v11 }
 0x815   :  { %v4221_v44 = vpop.xlane.xlu1 %4220 }
 0x816   :  { %8125 = vpow2.f32 %v4254_v55  ;;  %v4248_v49 = vmul.f32 1.442695, %v4240_v41  ;;  %v4241_v2 = vsub.f32 %v4209_v1, %v4221_v44 }
 0x818   :  { %8127 = vpow2.f32 %v4248_v49  ;;  %v4250_v51 = vmul.f32 1.442695, %v4241_v2 }
 0x81a   :  { %8129 = vpow2.f32 %v4250_v51 }
 0x81e   :  { %v8893_v59 = vpop.eup %8123 }
 0x81f   :  { %v4270_v6 = vsel %vm3483_vm4, %v8893_v59, 0.0 }
 0x820   :  { %v8126_v24 = vpop.eup %8125  ;;  %4271 = vadd.xlane.f32.xlu0 %v4270_v6 }
 0x821   :  { %v4273_v14 = vsel %vm3483_vm4, %v8126_v24, 0.0 }
 0x822   :  { %v8128_v35 = vpop.eup %8127  ;;  %4274 = vadd.xlane.f32.xlu1 %v4273_v14 }
 0x823   :  { %v4264_v11 = vsel %vm3483_vm4, %v8128_v35, 0.0 }
 0x824   :  { %v8130_v20 = vpop.eup %8129  ;;  %4265 = vadd.xlane.f32.xlu0 %v4264_v11 }
 0x825   :  { %v4267_v44 = vsel %vm3483_vm4, %v8130_v20, 0.0 }
 0x826   :  { %4268 = vadd.xlane.f32.xlu1 %v4267_v44 }
 0x831   :  { %v4230_v2 = vpop.xlane.xlu0 %4229 }
 0x832   :  { %v4244_v1 = vsub.f32 %v4212_v52, %v4230_v2  ;;  %v4239_v28 = vpop.xlane.xlu1 %4238 }
 0x833   :  { %v4247_v55 = vsub.f32 %v4215_v63, %v4239_v28 }
 0x834   :  { %v4256_v43 = vmul.f32 1.442695, %v4244_v1 }
 0x835   :  { %v4233_v51 = vpop.xlane.xlu0 %4232  ;;  %v4262_v49 = vmul.f32 1.442695, %v4247_v55 }
 0x836   :  { %v4245_v6 = vsub.f32 %v4213_v31, %v4233_v51 }
 0x837   :  { %4499 = vrot.lane.b32.xlu1 %v8613_v34, %s8410_s1 }
 0x838   :  { %v4258_v34 = vmul.f32 1.442695, %v4245_v6 }
 0x839   :  { %v4236_v42 = vpop.xlane.xlu0 %4235 }
 0x83a   :  { %v4246_v46 = vsub.f32 %v4214_v39, %v4236_v42 }
 0x83c   :  { %v4260_v5 = vmul.f32 1.442695, %v4246_v46 }
 0x83e   :  { %8131 = vpow2.f32 %v4260_v5 }
 0x83f   :  { %8133 = vpow2.f32 %v4256_v43 }
 0x840   :  { %8135 = vpow2.f32 %v4262_v49 }
 0x841   :  { %8137 = vpow2.f32 %v4258_v34 }
 0x848   :  { %v8902_v41 = vpop.eup %8131 }
 0x849   :  { %v4282_v14 = vsel %vm3483_vm4, %v8902_v41, 0.0  ;;  %v8906_v11 = vpop.eup %8133 }
 0x84a   :  { %4283 = vadd.xlane.f32.xlu0 %v4282_v14  ;;  %v4276_v52 = vsel %vm3483_vm4, %v8906_v11, 0.0  ;;  %v8136_v39 = vpop.eup %8135 }
 0x84b   :  { %v4285_v63 = vsel %vm3483_vm4, %v8136_v39, 0.0  ;;  %v8138_v44 = vpop.eup %8137 }
 0x84c   :  { %v4279_v31 = vsel %vm3483_vm4, %v8138_v44, 0.0 }
 0x84e   :  { %4277 = vadd.xlane.f32.xlu0 %v4276_v52 }
 0x85b   :  { %4286 = vadd.xlane.f32.xlu1 %v4285_v63 }
 0x85f   :  { %4280 = vadd.xlane.f32.xlu1 %v4279_v31 }
 0x864   :  { %4426 = vrot.lane.b32.xlu0 %v8589_v15, %s8410_s1 }
 0x868   :  { %4420 = vrot.lane.b32.xlu0 %v8553_v19, %s8410_s1 }
 0x86c   :  { %4422 = vrot.lane.b32.xlu0 %v8561_v53, %s8410_s1 }
 0x870   :  { %4428 = vrot.lane.b32.xlu1 %v8601_v7, %s8410_s1 }
 0x874   :  { %4501 = vrot.lane.b32.xlu1 %v8627_v56, %s8410_s1 }
 0x878   :  { %4493 = vrot.lane.b32.xlu1 %v8569_v33, %s8410_s1 }
 0x87c   :  { %4495 = vrot.lane.b32.xlu1 %v8577_v22, %s8410_s1 }
 0x8ad   :  { %v4272_v2 = vpop.xlane.xlu0 %4271 }
 0x8af   :  { %v4275_v15 = vpop.xlane.xlu1 %4274 }
 0x8b0   :  { %8139 = vrcp.f32 %v4275_v15 }
 0x8b1   :  { %v4266_v51 = vpop.xlane.xlu0 %4265 }
 0x8b2   :  { %8141 = vrcp.f32 %v4266_v51 }
 0x8b3   :  { %8143 = vrcp.f32 %v4272_v2  ;;  %v4269_v19 = vpop.xlane.xlu1 %4268 }
 0x8b4   :  { %8145 = vrcp.f32 %v4269_v19 }
 0x8b7   :  { %v4500_v53 = vpop.permute.xlu1 %4499 }
 0x8b8   :  { %7430 = vmatprep.subr.msk.bf16.mxu1 %vm3344_vm0, %v4500_v53 }
 0x8ba   :  { %v8140_v7 = vpop.eup %8139 }
 0x8bb   :  { %v4299_v46 = vmul.f32 %v8140_v7, %v8126_v24 }
 0x8bc   :  { %v8142_v1 = vpop.eup %8141 }
 0x8bd   :  { %v8144_v56 = vpop.eup %8143  ;;  %v4296_v33 = vmul.f32 %v8142_v1, %v8128_v35 }
 0x8be   :  { %v8146_v42 = vpop.eup %8145  ;;  %v4298_v22 = vmul.f32 %v8144_v56, %v8893_v59 }
 0x8bf   :  { %v4297_v43 = vmul.f32 %v8146_v42, %v8130_v20 }
 0x8c0   :  { %v4305_v28 = vpack.c.bf16 %v4299_v46, %v4298_v22 }
 0x8c1   :  { %v4304_v5 = vpack.c.bf16 %v4297_v43, %v4296_v33  ;;  %v4510_v43 = vsel %vm3344_vm0, %v4500_v53, 0 }
 0x8c3   :  { %7148 = vmatprep.mubr.msk.bf16.mxu0 %vm3483_vm4, %v4304_v5 }
 0x8c4   :  { %7149 = vmatmul.mubr.msk.bf16.vlgmr.msra.gmra.mrb[68].mxu0 %vm3483_vm4, %v4305_v28 }
 0x8d7   :  { %v4284_v55 = vpop.xlane.xlu0 %4283 }
 0x8db   :  { %v4278_v49 = vpop.xlane.xlu0 %4277 }
 0x8df   :  { %v4427_v6 = vpop.permute.xlu0 %4426 }
 0x8e0   :  { %7428 = vmatprep.subr.msk.bf16.mxu0 %vm3344_vm0, %v4427_v6  ;;  %v4437_v14 = vsel %vm3344_vm0, %v4427_v6, 0 }
 0x8e1   :  { %7161 = vmatpush3.bf16.xpose.msra.mxu0 %v4437_v14 }
 0x8e3   :  { %v4421_v34 = vpop.permute.xlu0 %4420 }
 0x8e4   :  { %7164 = vmatprep.mubr.msk.bf16.mxu0 %vm3344_vm0, %v4421_v34 }
 0x8e7   :  { %v4423_v19 = vpop.permute.xlu0 %4422 }
 0x8e8   :  { %v4287_v24 = vpop.xlane.xlu1 %4286 }
 0x8e9   :  { %8147 = vrcp.f32 %v4287_v24 }
 0x8ea   :  { %8149 = vrcp.f32 %v4278_v49 }
 0x8eb   :  { %8151 = vrcp.f32 %v4284_v55 }
 0x8ec   :  { %v4281_v59 = vpop.xlane.xlu1 %4280 }
 0x8ed   :  { %8153 = vrcp.f32 %v4281_v59 }
 0x8f0   :  { %v4429_v35 = vpop.permute.xlu1 %4428 }
 0x8f1   :  { %7429 = vmatprep.subr.msk.bf16.mxu0 %vm3344_vm0, %v4429_v35  ;;  %v4440_v20 = vsel %vm3344_vm0, %v4429_v35, 0 }
 0x8f2   :  { %7163 = vmatpush3.bf16.xpose.msra.mxu0 %v4440_v20 }
 0x8f3   :  { %v8148_v52 = vpop.eup %8147 }
 0x8f4   :  { %v8150_v63 = vpop.eup %8149  ;;  %v4303_v15 = vmul.f32 %v8148_v52, %v8136_v39  ;;  %v4502_v51 = vpop.permute.xlu1 %4501 }
 0x8f5   :  { %v8152_v31 = vpop.eup %8151  ;;  %v4300_v7 = vmul.f32 %v8150_v63, %v8906_v11  ;;  %v4513_v11 = vsel %vm3344_vm0, %v4502_v51, 0 }
 0x8f6   :  { %v4302_v56 = vmul.f32 %v8152_v31, %v8902_v41 }
 0x8f7   :  { %v8154_v2 = vpop.eup %8153 }
 0x8f8   :  { %v4301_v1 = vmul.f32 %v8154_v2, %v8138_v44  ;;  %v4307_v46 = vpack.c.bf16 %v4303_v15, %v4302_v56  ;;  %v4494_v33 = vpop.permute.xlu1 %4493 }
 0x8f9   :  { %7165 = vmatmul.mubr.msk.bf16.vlgmr.msra.gmra.mrb[72].mxu0 %vm3344_vm0, %v4423_v19 }
 0x8fa   :  { %v4306_v42 = vpack.c.bf16 %v4301_v1, %v4300_v7 }
 0x8fc   :  { %7156 = vmatprep.mubr.msk.bf16.mxu1 %vm3483_vm4, %v4306_v42  ;;  %v4496_v41 = vpop.permute.xlu1 %4495 }
 0x8fd   :  { %7157 = vmatmul.mubr.msk.bf16.vlgmr.msra.gmra.mrb[68].mxu1 %vm3483_vm4, %v4307_v46 }
 0x8fe   :  { %7169 = vmatpush3.bf16.xpose.msra.mxu1 %v4510_v43  ;;  %7172 = vmatprep.mubr.msk.bf16.mxu1 %vm3344_vm0, %v4494_v33 }
 0x8ff   :  { %7431 = vmatprep.subr.msk.bf16.mxu1 %vm3344_vm0, %v4502_v51 }
 0x906   :  { %7171 = vmatpush3.bf16.xpose.msra.mxu1 %v4513_v11 }
 0x90d   :  { %7173 = vmatmul.mubr.msk.bf16.vlgmr.msra.gmra.mrb[72].mxu1 %vm3344_vm0, %v4496_v41 }
 0x997   :  { %v8945_v39 = vpop.f32.mrb[68].mxu0 }
 0x998   :  { %9576 = vst [vmem:[#allocation28_spill] sm:$0xff] %v8945_v39  ;;  %v8947_v44 = vpop.f32.mrb[69].mxu0 }
 0x999   :  { %9577 = vst [vmem:[#allocation29_spill] sm:$0xff] %v8947_v44  ;;  %v8949_v22 = vpop.f32.mrb[70].mxu0 }
 0x99a   :  { %9578 = vst [vmem:[#allocation30_spill] sm:$0xff] %v8949_v22  ;;  %v8951_v5 = vpop.f32.mrb[71].mxu0 }
 0x99b   :  { %9579 = vst [vmem:[#allocation31_spill] sm:$0xff] %v8951_v5 }
 0x9cc   :  { %v7166_v53 = vpop.f32.mrb[72].mxu0 }
 0x9cd   :  { %v4566_v28 = vmul.f32 0.125, %v7166_v53  ;;  %v4476_v55 = vpop.f32.mrb[73].mxu0 }
 0x9ce   :  { %v4564_v49 = vmul.f32 0.125, %v4476_v55  ;;  %v7167_v6 = vpop.f32.mrb[74].mxu0 }
 0x9cf   :  { %v4567_v14 = vmul.f32 0.125, %v7167_v6  ;;  %v4479_v34 = vpop.f32.mrb[75].mxu0  ;;  %v4574_v24 = vadd.f32 %v4566_v28, %v8677_v27 }
 0x9d0   :  { %v4565_v59 = vmul.f32 0.125, %v4479_v34  ;;  %v8954_v35 = vpop.f32.mrb[68].mxu1  ;;  %v4572_v31 = vadd.f32 %v4564_v49, %v8681_v10 }
 0x9d1   :  { %9580 = vst [vmem:[#allocation32_spill] sm:$0xff] %v8954_v35  ;;  %v8956_v20 = vpop.f32.mrb[69].mxu1  ;;  %v4586_v52 = vsel %vm3483_vm4, %v4574_v24, -inf  ;;  %v4575_v63 = vadd.f32 %v4567_v14, %v8679_v9 }
 0x9d2   :  { %9581 = vst [vmem:[#allocation33_spill] sm:$0xff] %v8956_v20  ;;  %v8961_v2 = vpop.f32.mrb[70].mxu1  ;;  %4587 = vmax.xlane.f32.xlu0 %v4586_v52  ;;  %v4573_v19 = vadd.f32 %v4565_v59, %v8687_v3  ;;  %v4580_v7 = vsel %vm3483_vm4, %v4572_v31, -inf }
 0x9d3   :  { %9582 = vst [vmem:[#allocation34_spill] sm:$0xff] %v8961_v2  ;;  %v8963_v15 = vpop.f32.mrb[71].mxu1  ;;  %v4589_v51 = vsel %vm3483_vm4, %v4575_v63, -inf }
 0x9d4   :  { %9583 = vst [vmem:[#allocation35_spill] sm:$0xff] %v8963_v15  ;;  %4590 = vmax.xlane.f32.xlu1 %v4589_v51  ;;  %v4583_v1 = vsel %vm3483_vm4, %v4573_v19, -inf }
 0x9d6   :  { %4581 = vmax.xlane.f32.xlu0 %v4580_v7 }
 0x9d8   :  { %4584 = vmax.xlane.f32.xlu1 %v4583_v1 }
 0x9e0   :  { %v7174_v56 = vpop.f32.mrb[72].mxu1 }
 0x9e1   :  { %v4549_v42 = vpop.f32.mrb[73].mxu1  ;;  %v4570_v55 = vmul.f32 0.125, %v7174_v56 }
 0x9e2   :  { %v4568_v46 = vmul.f32 0.125, %v4549_v42  ;;  %v7175_v33 = vpop.f32.mrb[74].mxu1 }
 0x9e3   :  { %v4571_v43 = vmul.f32 0.125, %v7175_v33  ;;  %v4552_v11 = vpop.f32.mrb[75].mxu1  ;;  %v4578_v59 = vadd.f32 %v4570_v55, %v8677_v27 }
 0x9e4   :  { %v4569_v41 = vmul.f32 0.125, %v4552_v11  ;;  %v4576_v53 = vadd.f32 %v4568_v46, %v8681_v10 }
 0x9e5   :  { %v4579_v28 = vadd.f32 %v4571_v43, %v8679_v9  ;;  %v4598_v52 = vsel %vm3483_vm4, %v4578_v59, -inf }
 0x9e6   :  { %v4592_v49 = vsel %vm3483_vm4, %v4576_v53, -inf  ;;  %v4577_v6 = vadd.f32 %v4569_v41, %v8687_v3 }
 0x9e7   :  { %4593 = vmax.xlane.f32.xlu0 %v4592_v49  ;;  %v4601_v14 = vsel %vm3483_vm4, %v4579_v28, -inf }
 0x9e8   :  { %4602 = vmax.xlane.f32.xlu1 %v4601_v14  ;;  %v4595_v34 = vsel %vm3483_vm4, %v4577_v6, -inf }
 0x9eb   :  { %4596 = vmax.xlane.f32.xlu0 %v4595_v34 }
 0x9ef   :  { %4599 = vmax.xlane.f32.xlu0 %v4598_v52 }
 0xa5f   :  { %v4588_v51 = vpop.xlane.xlu0 %4587 }
 0xa60   :  { %v4606_v7 = vsub.f32 %v4574_v24, %v4588_v51 }
 0xa61   :  { %v4591_v1 = vpop.xlane.xlu1 %4590 }
 0xa62   :  { %v4616_v56 = vmul.f32 1.442695, %v4606_v7  ;;  %v4607_v42 = vsub.f32 %v4575_v63, %v4591_v1 }
 0xa63   :  { %v4582_v46 = vpop.xlane.xlu0 %4581 }
 0xa64   :  { %8155 = vpow2.f32 %v4616_v56  ;;  %v4618_v33 = vmul.f32 1.442695, %v4607_v42  ;;  %v4604_v43 = vsub.f32 %v4572_v31, %v4582_v46 }
 0xa65   :  { %v4585_v11 = vpop.xlane.xlu1 %4584 }
 0xa66   :  { %8157 = vpow2.f32 %v4618_v33  ;;  %v4612_v41 = vmul.f32 1.442695, %v4604_v43  ;;  %v4605_v49 = vsub.f32 %v4573_v19, %v4585_v11 }
 0xa68   :  { %8159 = vpow2.f32 %v4612_v41  ;;  %v4614_v14 = vmul.f32 1.442695, %v4605_v49 }
 0xa6a   :  { %8161 = vpow2.f32 %v4614_v14 }
 0xa6e   :  { %v8977_v55 = vpop.eup %8155 }
 0xa6f   :  { %v4634_v34 = vsel %vm3483_vm4, %v8977_v55, 0.0 }
 0xa70   :  { %v8981_v24 = vpop.eup %8157  ;;  %4635 = vadd.xlane.f32.xlu0 %v4634_v34 }
 0xa71   :  { %v4637_v63 = vsel %vm3483_vm4, %v8981_v24, 0.0 }
 0xa72   :  { %v8160_v52 = vpop.eup %8159  ;;  %4638 = vadd.xlane.f32.xlu1 %v4637_v63 }
 0xa73   :  { %v4628_v31 = vsel %vm3483_vm4, %v8160_v52, 0.0 }
 0xa74   :  { %v8162_v51 = vpop.eup %8161  ;;  %v4594_v19 = vpop.xlane.xlu0 %4593  ;;  %4629 = vadd.xlane.f32.xlu0 %v4628_v31 }
 0xa75   :  { %v4631_v7 = vsel %vm3483_vm4, %v8162_v51, 0.0  ;;  %v4608_v56 = vsub.f32 %v4576_v53, %v4594_v19 }
 0xa76   :  { %4632 = vadd.xlane.f32.xlu1 %v4631_v7 }
 0xa77   :  { %v4620_v33 = vmul.f32 1.442695, %v4608_v56 }
 0xa78   :  { %v4597_v1 = vpop.xlane.xlu0 %4596 }
 0xa79   :  { %v4609_v63 = vsub.f32 %v4577_v6, %v4597_v1 }
 0xa7c   :  { %v4600_v42 = vpop.xlane.xlu0 %4599 }
 0xa7d   :  { %v4610_v46 = vsub.f32 %v4578_v59, %v4600_v42  ;;  %v4603_v59 = vpop.xlane.xlu1 %4602 }
 0xa7e   :  { %v4611_v14 = vsub.f32 %v4579_v28, %v4603_v59 }
 0xa7f   :  { %v4624_v43 = vmul.f32 1.442695, %v4610_v46 }
 0xa80   :  { %v4626_v34 = vmul.f32 1.442695, %v4611_v14 }
 0xa81   :  { %8163 = vpow2.f32 %v4624_v43 }
 0xa82   :  { %8165 = vpow2.f32 %v4620_v33 }
 0xa83   :  { %8167 = vpow2.f32 %v4626_v34 }
 0xa87   :  { %4737 = vrot.lane.b32.xlu1 %v8661_v60, %s8410_s1  ;;  %v4622_v60 = vmul.f32 1.442695, %v4609_v63 }
 0xa89   :  { %8169 = vpow2.f32 %v4622_v60 }
 0xa8b   :  { %v8989_v11 = vpop.eup %8163  ;;  %4676 = vrot.lane.b32.xlu1 %v8651_v37, %s8410_s1 }
 0xa8c   :  { %v4646_v41 = vsel %vm3483_vm4, %v8989_v11, 0.0  ;;  %v8995_v49 = vpop.eup %8165 }
 0xa8d   :  { %4647 = vadd.xlane.f32.xlu0 %v4646_v41  ;;  %v4640_v53 = vsel %vm3483_vm4, %v8995_v49, 0.0  ;;  %v9001_v37 = vpop.eup %8167 }
 0xa8e   :  { %v4649_v31 = vsel %vm3483_vm4, %v9001_v37, 0.0 }
 0xa91   :  { %4641 = vadd.xlane.f32.xlu0 %v4640_v53 }
 0xa93   :  { %v9005_v19 = vpop.eup %8169 }
 0xa94   :  { %v4643_v7 = vsel %vm3483_vm4, %v9005_v19, 0.0 }
 0xaa7   :  { %4674 = vrot.lane.b32.xlu0 %v8641_v4, %s8410_s1 }
 0xaaf   :  { %4650 = vadd.xlane.f32.xlu1 %v4649_v31 }
 0xab3   :  { %4644 = vadd.xlane.f32.xlu1 %v4643_v7 }
 0xac4   :  { %4739 = vrot.lane.b32.xlu1 %v8671_v26, %s8410_s1 }
 0xafd   :  { %v4636_v28 = vpop.xlane.xlu0 %4635 }
 0xaff   :  { %v4639_v6 = vpop.xlane.xlu1 %4638 }
 0xb01   :  { %v4630_v1 = vpop.xlane.xlu0 %4629 }
 0xb02   :  { %8171 = vrcp.f32 %v4630_v1 }
 0xb03   :  { %v4633_v4 = vpop.xlane.xlu1 %4632 }
 0xb04   :  { %8173 = vrcp.f32 %v4633_v4 }
 0xb05   :  { %8175 = vrcp.f32 %v4639_v6 }
 0xb06   :  { %8177 = vrcp.f32 %v4636_v28 }
 0xb07   :  { %v4738_v56 = vpop.permute.xlu1 %4737 }
 0xb08   :  { %7184 = vmatprep.subr.bf16.mxu1 %v4738_v56 }
 0xb09   :  { %7185 = vmatpush3.bf16.msra.mxu1 %v4738_v56 }
 0xb0b   :  { %v4677_v63 = vpop.permute.xlu1 %4676 }
 0xb0c   :  { %v8172_v42 = vpop.eup %8171 }
 0xb0d   :  { %v4660_v33 = vmul.f32 %v8172_v42, %v8160_v52 }
 0xb0e   :  { %v8174_v46 = vpop.eup %8173 }
 0xb0f   :  { %v4661_v43 = vmul.f32 %v8174_v46, %v8162_v51  ;;  %v8176_v59 = vpop.eup %8175  ;;  %v4817_v51 = vsel %vm3344_vm0, %v8587_v61, 0 }
 0xb10   :  { %v8178_v34 = vpop.eup %8177  ;;  %v4663_v60 = vmul.f32 %v8176_v59, %v8981_v24 }
 0xb11   :  { %v4668_v41 = vpack.c.bf16 %v4661_v43, %v4660_v33  ;;  %v4662_v31 = vmul.f32 %v8178_v34, %v8977_v55  ;;  %v4820_v55 = vsel %vm3344_vm0, %v8599_v45, 0 }
 0xb13   :  { %7180 = vmatprep.mubr.msk.bf16.mxu0 %vm3483_vm4, %v4668_v41  ;;  %v4669_v52 = vpack.c.bf16 %v4663_v60, %v4662_v31 }
 0xb1a   :  { %v4648_v53 = vpop.xlane.xlu0 %4647 }
 0xb1e   :  { %v4642_v26 = vpop.xlane.xlu0 %4641 }
 0xb22   :  { %v4675_v14 = vpop.permute.xlu0 %4674 }
 0xb23   :  { %7176 = vmatprep.subr.bf16.mxu0 %v4675_v14 }
 0xb24   :  { %7177 = vmatpush3.bf16.msra.mxu0 %v4675_v14 }
 0xb25   :  { %7178 = vmatprep.subr.bf16.mxu0 %v4677_v63 }
 0xb28   :  { %7179 = vmatpush3.bf16.msra.mxu0 %v4677_v63 }
 0xb29   :  { %7432 = vmatprep.subr.msk.bf16.mxu0 %vm3344_vm0, %v8587_v61 }
 0xb2b   :  { %7181 = vmatmul.mubr.msk.bf16.vlgmr.msra.gmra.mrb[76].mxu0 %vm3483_vm4, %v4669_v52 }
 0xb2c   :  { %7196 = vmatprep.mubr.msk.bf16.mxu0 %vm3344_vm0, %v8551_v17 }
 0xb31   :  { %7193 = vmatpush3.bf16.xpose.msra.mxu0 %v4817_v51 }
 0xb32   :  { %7433 = vmatprep.subr.msk.bf16.mxu0 %vm3344_vm0, %v8599_v45 }
 0xb39   :  { %7195 = vmatpush3.bf16.xpose.msra.mxu0 %v4820_v55 }
 0xb3a   :  { %7208 = vmatprep.subr.bf16.mxu0 %v8639_v25 }
 0xb3c   :  { %v4651_v24 = vpop.xlane.xlu1 %4650 }
 0xb3d   :  { %8179 = vrcp.f32 %v4651_v24 }
 0xb3e   :  { %8181 = vrcp.f32 %v4642_v26  ;;  %v4878_v26 = vsel %vm3344_vm0, %v8611_v30, 0 }
 0xb3f   :  { %8183 = vrcp.f32 %v4648_v53 }
 0xb40   :  { %7197 = vmatmul.mubr.msk.bf16.vlgmr.msra.gmra.mrb[80].mxu0 %vm3344_vm0, %v8559_v50  ;;  %v4645_v7 = vpop.xlane.xlu1 %4644 }
 0xb41   :  { %7209 = vmatpush3.bf16.msra.mxu0 %v8639_v25  ;;  %8185 = vrcp.f32 %v4645_v7 }
 0xb42   :  { %7210 = vmatprep.subr.bf16.mxu0 %v8649_v29 }
 0xb44   :  { %v4740_v28 = vpop.permute.xlu1 %4739 }
 0xb45   :  { %7211 = vmatpush3.bf16.msra.mxu0 %v8649_v29  ;;  %7186 = vmatprep.subr.bf16.mxu1 %v4740_v28 }
 0xb46   :  { %7187 = vmatpush3.bf16.msra.mxu1 %v4740_v28 }
 0xb47   :  { %7434 = vmatprep.subr.msk.bf16.mxu1 %vm3344_vm0, %v8611_v30  ;;  %v8180_v6 = vpop.eup %8179 }
 0xb48   :  { %v8182_v1 = vpop.eup %8181  ;;  %v4667_v42 = vmul.f32 %v8180_v6, %v9001_v37 }
 0xb49   :  { %v8184_v4 = vpop.eup %8183  ;;  %v4664_v46 = vmul.f32 %v8182_v1, %v8995_v49  ;;  %v4881_v49 = vsel %vm3344_vm0, %v8625_v54, 0 }
 0xb4a   :  { %v4666_v43 = vmul.f32 %v8184_v4, %v8989_v11 }
 0xb4b   :  { %v8186_v56 = vpop.eup %8185 }
 0xb4c   :  { %v4665_v33 = vmul.f32 %v8186_v56, %v9005_v19  ;;  %v4671_v53 = vpack.c.bf16 %v4667_v42, %v4666_v43 }
 0xb4e   :  { %v4670_v41 = vpack.c.bf16 %v4665_v33, %v4664_v46 }
 0xb50   :  { %7188 = vmatprep.mubr.msk.bf16.mxu1 %vm3483_vm4, %v4670_v41 }
 0xb51   :  { %7189 = vmatmul.mubr.msk.bf16.vlgmr.msra.gmra.mrb[76].mxu1 %vm3483_vm4, %v4671_v53 }
 0xb52   :  { %7201 = vmatpush3.bf16.xpose.msra.mxu1 %v4878_v26  ;;  %7204 = vmatprep.mubr.msk.bf16.mxu1 %vm3344_vm0, %v8567_v0 }
 0xb53   :  { %7435 = vmatprep.subr.msk.bf16.mxu1 %vm3344_vm0, %v8625_v54 }
 0xb5a   :  { %7203 = vmatpush3.bf16.xpose.msra.mxu1 %v4881_v49 }
 0xb5b   :  { %7216 = vmatprep.subr.bf16.mxu1 %v8659_v58 }
 0xb61   :  { %7205 = vmatmul.mubr.msk.bf16.vlgmr.msra.gmra.mrb[80].mxu1 %vm3344_vm0, %v8575_v40 }
 0xb62   :  { %7217 = vmatpush3.bf16.msra.mxu1 %v8659_v58 }
 0xb63   :  { %7218 = vmatprep.subr.bf16.mxu1 %v8669_v12 }
 0xb66   :  { %7219 = vmatpush3.bf16.msra.mxu1 %v8669_v12 }
 0xbfe   :  { %v9053_v11 = vpop.f32.mrb[76].mxu0 }
 0xbff   :  { %v9055_v37 = vpop.f32.mrb[77].mxu0 }
 0xc00   :  { %v9057_v19 = vpop.f32.mrb[78].mxu0 }
 0xc01   :  { %v9059_v59 = vpop.f32.mrb[79].mxu0 }
 0xc13   :  { %v7198_v14 = vpop.f32.mrb[80].mxu0 }
 0xc14   :  { %v4934_v34 = vmul.f32 0.125, %v7198_v14  ;;  %v4856_v63 = vpop.f32.mrb[81].mxu0 }
 0xc15   :  { %v4932_v60 = vmul.f32 0.125, %v4856_v63  ;;  %v7199_v31 = vpop.f32.mrb[82].mxu0 }
 0xc16   :  { %v4935_v52 = vmul.f32 0.125, %v7199_v31  ;;  %v4859_v51 = vpop.f32.mrb[83].mxu0  ;;  %v4942_v55 = vadd.f32 %v4934_v34, %v8677_v27 }
 0xc17   :  { %v4933_v24 = vmul.f32 0.125, %v4859_v51  ;;  %v4940_v6 = vadd.f32 %v4932_v60, %v8681_v10 }
 0xc18   :  { %v4954_v7 = vsel %vm3483_vm4, %v4942_v55, -inf  ;;  %v4943_v28 = vadd.f32 %v4935_v52, %v8679_v9 }
 0xc19   :  { %4955 = vmax.xlane.f32.xlu0 %v4954_v7  ;;  %v4941_v4 = vadd.f32 %v4933_v24, %v8687_v3  ;;  %v4948_v56 = vsel %vm3483_vm4, %v4940_v6, -inf }
 0xc1a   :  { %v4957_v1 = vsel %vm3483_vm4, %v4943_v28, -inf }
 0xc1b   :  { %4958 = vmax.xlane.f32.xlu1 %v4957_v1  ;;  %v4951_v42 = vsel %vm3483_vm4, %v4941_v4, -inf }
 0xc1d   :  { %4949 = vmax.xlane.f32.xlu0 %v4948_v56 }
 0xc1f   :  { %4952 = vmax.xlane.f32.xlu1 %v4951_v42 }
 0xc24   :  { %v9069_v46 = vpop.f32.mrb[76].mxu1 }
 0xc25   :  { %v9071_v33 = vpop.f32.mrb[77].mxu1 }
 0xc26   :  { %v9073_v43 = vpop.f32.mrb[78].mxu1 }
 0xc27   :  { %v9075_v41 = vpop.f32.mrb[79].mxu1 }
 0xc34   :  { %v7206_v53 = vpop.f32.mrb[80].mxu1 }
 0xc35   :  { %v4917_v26 = vpop.f32.mrb[81].mxu1  ;;  %v4938_v51 = vmul.f32 0.125, %v7206_v53 }
 0xc36   :  { %v4936_v49 = vmul.f32 0.125, %v4917_v26  ;;  %v7207_v14 = vpop.f32.mrb[82].mxu1 }
 0xc37   :  { %v4939_v34 = vmul.f32 0.125, %v7207_v14  ;;  %v4920_v63 = vpop.f32.mrb[83].mxu1  ;;  %v4946_v42 = vadd.f32 %v4938_v51, %v8677_v27 }
 0xc38   :  { %v4937_v60 = vmul.f32 0.125, %v4920_v63  ;;  %v4944_v31 = vadd.f32 %v4936_v49, %v8681_v10 }
 0xc39   :  { %v4947_v52 = vadd.f32 %v4939_v34, %v8679_v9  ;;  %v4966_v26 = vsel %vm3483_vm4, %v4946_v42, -inf }
 0xc3a   :  { %v4960_v24 = vsel %vm3483_vm4, %v4944_v31, -inf  ;;  %v4945_v7 = vadd.f32 %v4937_v60, %v8687_v3 }
 0xc3b   :  { %4961 = vmax.xlane.f32.xlu0 %v4960_v24  ;;  %v4969_v1 = vsel %vm3483_vm4, %v4947_v52, -inf }
 0xc3c   :  { %4970 = vmax.xlane.f32.xlu1 %v4969_v1  ;;  %v4963_v56 = vsel %vm3483_vm4, %v4945_v7, -inf }
 0xc3f   :  { %4964 = vmax.xlane.f32.xlu0 %v4963_v56 }
 0xc43   :  { %4967 = vmax.xlane.f32.xlu0 %v4966_v26 }
 0xca6   :  { %v4956_v49 = vpop.xlane.xlu0 %4955 }
 0xca7   :  { %v4974_v14 = vsub.f32 %v4942_v55, %v4956_v49 }
 0xca8   :  { %v4959_v34 = vpop.xlane.xlu1 %4958 }
 0xca9   :  { %v4984_v53 = vmul.f32 1.442695, %v4974_v14  ;;  %v4975_v63 = vsub.f32 %v4943_v28, %v4959_v34 }
 0xcaa   :  { %v4950_v2 = vpop.xlane.xlu0 %4949 }
 0xcab   :  { %8187 = vpow2.f32 %v4984_v53  ;;  %v4986_v60 = vmul.f32 1.442695, %v4975_v63  ;;  %v4972_v24 = vsub.f32 %v4940_v6, %v4950_v2 }
 0xcac   :  { %v4953_v15 = vpop.xlane.xlu1 %4952 }
 0xcad   :  { %8189 = vpow2.f32 %v4986_v60  ;;  %v4980_v1 = vmul.f32 1.442695, %v4972_v24  ;;  %v4973_v22 = vsub.f32 %v4941_v4, %v4953_v15 }
 0xcaf   :  { %8191 = vpow2.f32 %v4980_v1  ;;  %v4982_v5 = vmul.f32 1.442695, %v4973_v22 }
 0xcb1   :  { %8193 = vpow2.f32 %v4982_v5 }
 0xcb5   :  { %v9085_v51 = vpop.eup %8187 }
 0xcb6   :  { %v5002_v56 = vsel %vm3483_vm4, %v9085_v51, 0.0 }
 0xcb7   :  { %v8190_v55 = vpop.eup %8189  ;;  %5003 = vadd.xlane.f32.xlu0 %v5002_v56 }
 0xcb8   :  { %v5005_v28 = vsel %vm3483_vm4, %v8190_v55, 0.0 }
 0xcb9   :  { %v8192_v26 = vpop.eup %8191  ;;  %5006 = vadd.xlane.f32.xlu1 %v5005_v28 }
 0xcba   :  { %v4996_v2 = vsel %vm3483_vm4, %v8192_v26, 0.0 }
 0xcbb   :  { %v8194_v6 = vpop.eup %8193  ;;  %4997 = vadd.xlane.f32.xlu0 %v4996_v2 }
 0xcbc   :  { %v4999_v15 = vsel %vm3483_vm4, %v8194_v6, 0.0 }
 0xcbd   :  { %5000 = vadd.xlane.f32.xlu1 %v4999_v15 }
 0xcc8   :  { %v4962_v22 = vpop.xlane.xlu0 %4961 }
 0xcc9   :  { %v4976_v4 = vsub.f32 %v4944_v31, %v4962_v22  ;;  %v4971_v63 = vpop.xlane.xlu1 %4970 }
 0xcca   :  { %v4979_v60 = vsub.f32 %v4947_v52, %v4971_v63 }
 0xccb   :  { %v4988_v34 = vmul.f32 1.442695, %v4976_v4 }
 0xccc   :  { %v4965_v5 = vpop.xlane.xlu0 %4964  ;;  %v4994_v1 = vmul.f32 1.442695, %v4979_v60 }
 0xccd   :  { %v4977_v56 = vsub.f32 %v4945_v7, %v4965_v5 }
 0xcce   :  { %5231 = vrot.lane.b32.xlu1 %v8611_v30, %s8410_s1 }
 0xccf   :  { %v4990_v30 = vmul.f32 1.442695, %v4977_v56 }
 0xcd0   :  { %v4968_v49 = vpop.xlane.xlu0 %4967 }
 0xcd1   :  { %v4978_v14 = vsub.f32 %v4946_v42, %v4968_v49 }
 0xcd3   :  { %v4992_v53 = vmul.f32 1.442695, %v4978_v14 }
 0xcd5   :  { %8195 = vpow2.f32 %v4992_v53 }
 0xcd6   :  { %8197 = vpow2.f32 %v4988_v34 }
 0xcd7   :  { %8199 = vpow2.f32 %v4994_v1 }
 0xcd8   :  { %8201 = vpow2.f32 %v4990_v30 }
 0xcdf   :  { %v9094_v24 = vpop.eup %8195 }
 0xce0   :  { %v5014_v28 = vsel %vm3483_vm4, %v9094_v24, 0.0  ;;  %v9098_v2 = vpop.eup %8197 }
 0xce1   :  { %5015 = vadd.xlane.f32.xlu0 %v5014_v28  ;;  %v5008_v31 = vsel %vm3483_vm4, %v9098_v2, 0.0  ;;  %v8200_v42 = vpop.eup %8199 }
 0xce2   :  { %v5017_v52 = vsel %vm3483_vm4, %v8200_v42, 0.0  ;;  %v8202_v15 = vpop.eup %8201 }
 0xce3   :  { %v5011_v7 = vsel %vm3483_vm4, %v8202_v15, 0.0 }
 0xce5   :  { %5009 = vadd.xlane.f32.xlu0 %v5008_v31 }
 0xcf2   :  { %5018 = vadd.xlane.f32.xlu1 %v5017_v52 }
 0xcf6   :  { %5012 = vadd.xlane.f32.xlu1 %v5011_v7 }
 0xcfb   :  { %5158 = vrot.lane.b32.xlu0 %v8587_v61, %s8410_s1 }
 0xcff   :  { %5152 = vrot.lane.b32.xlu0 %v8551_v17, %s8410_s1 }
 0xd03   :  { %5154 = vrot.lane.b32.xlu0 %v8559_v50, %s8410_s1 }
 0xd07   :  { %5160 = vrot.lane.b32.xlu1 %v8599_v45, %s8410_s1 }
 0xd0b   :  { %5233 = vrot.lane.b32.xlu1 %v8625_v54, %s8410_s1 }
 0xd0f   :  { %5225 = vrot.lane.b32.xlu1 %v8567_v0, %s8410_s1 }
 0xd13   :  { %5227 = vrot.lane.b32.xlu1 %v8575_v40, %s8410_s1 }
 0xd44   :  { %v5004_v22 = vpop.xlane.xlu0 %5003 }
 0xd46   :  { %v5007_v61 = vpop.xlane.xlu1 %5006 }
 0xd47   :  { %8203 = vrcp.f32 %v5007_v61 }
 0xd48   :  { %v4998_v5 = vpop.xlane.xlu0 %4997 }
 0xd49   :  { %8205 = vrcp.f32 %v4998_v5 }
 0xd4a   :  { %8207 = vrcp.f32 %v5004_v22  ;;  %v5001_v17 = vpop.xlane.xlu1 %5000 }
 0xd4b   :  { %8209 = vrcp.f32 %v5001_v17 }
 0xd4e   :  { %v5232_v50 = vpop.permute.xlu1 %5231 }
 0xd4f   :  { %7438 = vmatprep.subr.msk.bf16.mxu1 %vm3344_vm0, %v5232_v50 }
 0xd51   :  { %v8204_v45 = vpop.eup %8203 }
 0xd52   :  { %v5031_v14 = vmul.f32 %v8204_v45, %v8190_v55 }
 0xd53   :  { %v8206_v4 = vpop.eup %8205 }
 0xd54   :  { %v8208_v54 = vpop.eup %8207  ;;  %v5028_v0 = vmul.f32 %v8206_v4, %v8192_v26 }
 0xd55   :  { %v8210_v49 = vpop.eup %8209  ;;  %v5030_v40 = vmul.f32 %v8208_v54, %v9085_v51 }
 0xd56   :  { %v5029_v34 = vmul.f32 %v8210_v49, %v8194_v6 }
 0xd57   :  { %v5037_v63 = vpack.c.bf16 %v5031_v14, %v5030_v40 }
 0xd58   :  { %v5036_v53 = vpack.c.bf16 %v5029_v34, %v5028_v0  ;;  %v5242_v34 = vsel %vm3344_vm0, %v5232_v50, 0 }
 0xd5a   :  { %7212 = vmatprep.mubr.msk.bf16.mxu0 %vm3483_vm4, %v5036_v53 }
 0xd5b   :  { %7213 = vmatmul.mubr.msk.bf16.vlgmr.msra.gmra.mrb[84].mxu0 %vm3483_vm4, %v5037_v63 }
 0xd6e   :  { %v5016_v60 = vpop.xlane.xlu0 %5015 }
 0xd72   :  { %v5010_v1 = vpop.xlane.xlu0 %5009 }
 0xd76   :  { %v5159_v56 = vpop.permute.xlu0 %5158 }
 0xd77   :  { %7436 = vmatprep.subr.msk.bf16.mxu0 %vm3344_vm0, %v5159_v56  ;;  %v5169_v28 = vsel %vm3344_vm0, %v5159_v56, 0 }
 0xd78   :  { %7225 = vmatpush3.bf16.xpose.msra.mxu0 %v5169_v28 }
 0xd7a   :  { %v5153_v30 = vpop.permute.xlu0 %5152 }
 0xd7b   :  { %7228 = vmatprep.mubr.msk.bf16.mxu0 %vm3344_vm0, %v5153_v30 }
 0xd7e   :  { %v5155_v17 = vpop.permute.xlu0 %5154 }
 0xd7f   :  { %v5019_v55 = vpop.xlane.xlu1 %5018 }
 0xd80   :  { %8211 = vrcp.f32 %v5019_v55 }
 0xd81   :  { %8213 = vrcp.f32 %v5010_v1 }
 0xd82   :  { %8215 = vrcp.f32 %v5016_v60 }
 0xd83   :  { %v5013_v51 = vpop.xlane.xlu1 %5012 }
 0xd84   :  { %8217 = vrcp.f32 %v5013_v51 }
 0xd87   :  { %v5161_v26 = vpop.permute.xlu1 %5160 }
 0xd88   :  { %7437 = vmatprep.subr.msk.bf16.mxu0 %vm3344_vm0, %v5161_v26  ;;  %v5172_v6 = vsel %vm3344_vm0, %v5161_v26, 0 }
 0xd89   :  { %7227 = vmatpush3.bf16.xpose.msra.mxu0 %v5172_v6 }
 0xd8a   :  { %v8212_v31 = vpop.eup %8211 }
 0xd8b   :  { %v8214_v52 = vpop.eup %8213  ;;  %v5035_v61 = vmul.f32 %v8212_v31, %v8200_v42  ;;  %v5234_v5 = vpop.permute.xlu1 %5233 }
 0xd8c   :  { %v8216_v7 = vpop.eup %8215  ;;  %v5032_v45 = vmul.f32 %v8214_v52, %v9098_v2  ;;  %v5245_v2 = vsel %vm3344_vm0, %v5234_v5, 0 }
 0xd8d   :  { %v5034_v54 = vmul.f32 %v8216_v7, %v9094_v24 }
 0xd8e   :  { %v8218_v22 = vpop.eup %8217 }
 0xd8f   :  { %v5033_v4 = vmul.f32 %v8218_v22, %v8202_v15  ;;  %v5039_v14 = vpack.c.bf16 %v5035_v61, %v5034_v54  ;;  %v5226_v0 = vpop.permute.xlu1 %5225 }
 0xd90   :  { %7229 = vmatmul.mubr.msk.bf16.vlgmr.msra.gmra.mrb[88].mxu0 %vm3344_vm0, %v5155_v17 }
 0xd91   :  { %v5038_v49 = vpack.c.bf16 %v5033_v4, %v5032_v45 }
 0xd93   :  { %7220 = vmatprep.mubr.msk.bf16.mxu1 %vm3483_vm4, %v5038_v49  ;;  %v5228_v24 = vpop.permute.xlu1 %5227 }
 0xd94   :  { %7221 = vmatmul.mubr.msk.bf16.vlgmr.msra.gmra.mrb[84].mxu1 %vm3483_vm4, %v5039_v14 }
 0xd95   :  { %7233 = vmatpush3.bf16.xpose.msra.mxu1 %v5242_v34  ;;  %7236 = vmatprep.mubr.msk.bf16.mxu1 %vm3344_vm0, %v5226_v0 }
 0xd96   :  { %7439 = vmatprep.subr.msk.bf16.mxu1 %vm3344_vm0, %v5234_v5 }
 0xd9d   :  { %7235 = vmatpush3.bf16.xpose.msra.mxu1 %v5245_v2 }
 0xda4   :  { %7237 = vmatmul.mubr.msk.bf16.vlgmr.msra.gmra.mrb[88].mxu1 %vm3344_vm0, %v5228_v24 }
 0xe2e   :  { %v9137_v42 = vpop.f32.mrb[84].mxu0 }
 0xe2f   :  { %9584 = vst [vmem:[#allocation36_spill] sm:$0xff] %v9137_v42  ;;  %v9139_v15 = vpop.f32.mrb[85].mxu0 }
 0xe30   :  { %9585 = vst [vmem:[#allocation37_spill] sm:$0xff] %v9139_v15  ;;  %v9141_v40 = vpop.f32.mrb[86].mxu0 }
 0xe31   :  { %9586 = vst [vmem:[#allocation38_spill] sm:$0xff] %v9141_v40  ;;  %v9143_v53 = vpop.f32.mrb[87].mxu0 }
 0xe32   :  { %9587 = vst [vmem:[#allocation39_spill] sm:$0xff] %v9143_v53 }
 0xe63   :  { %v7230_v50 = vpop.f32.mrb[88].mxu0 }
 0xe64   :  { %v5298_v63 = vmul.f32 0.125, %v7230_v50  ;;  %v5208_v60 = vpop.f32.mrb[89].mxu0 }
 0xe65   :  { %v5296_v1 = vmul.f32 0.125, %v5208_v60  ;;  %v7231_v56 = vpop.f32.mrb[90].mxu0 }
 0xe66   :  { %v5306_v28 = vadd.f32 %v5298_v63, %v8677_v27  ;;  %v5299_v30 = vmul.f32 0.125, %v7231_v56  ;;  %v5211_v55 = vpop.f32.mrb[91].mxu0 }
 0xe67   :  { %v5297_v51 = vmul.f32 0.125, %v5211_v55  ;;  %v9146_v26 = vpop.f32.mrb[84].mxu1  ;;  %v5304_v6 = vadd.f32 %v5296_v1, %v8681_v10 }
 0xe68   :  { %9588 = vst [vmem:[#allocation40_spill] sm:$0xff] %v9146_v26  ;;  %v5307_v31 = vadd.f32 %v5299_v30, %v8679_v9  ;;  %v9150_v52 = vpop.f32.mrb[85].mxu1  ;;  %v5318_v7 = vsel %vm3483_vm4, %v5306_v28, -inf }
 0xe69   :  { %9589 = vst [vmem:[#allocation41_spill] sm:$0xff] %v9150_v52  ;;  %v9153_v22 = vpop.f32.mrb[86].mxu1  ;;  %5319 = vmax.xlane.f32.xlu0 %v5318_v7  ;;  %v5305_v61 = vadd.f32 %v5297_v51, %v8687_v3  ;;  %v5312_v45 = vsel %vm3483_vm4, %v5304_v6, -inf }
 0xe6a   :  { %9590 = vst [vmem:[#allocation42_spill] sm:$0xff] %v9153_v22  ;;  %v9156_v5 = vpop.f32.mrb[87].mxu1  ;;  %v5321_v17 = vsel %vm3483_vm4, %v5307_v31, -inf }
 0xe6b   :  { %9591 = vst [vmem:[#allocation43_spill] sm:$0xff] %v9156_v5  ;;  %5322 = vmax.xlane.f32.xlu1 %v5321_v17  ;;  %v5315_v4 = vsel %vm3483_vm4, %v5305_v61, -inf }
 0xe6d   :  { %5313 = vmax.xlane.f32.xlu0 %v5312_v45 }
 0xe6f   :  { %5316 = vmax.xlane.f32.xlu1 %v5315_v4 }
 0xe77   :  { %v7238_v54 = vpop.f32.mrb[88].mxu1 }
 0xe78   :  { %v5281_v49 = vpop.f32.mrb[89].mxu1  ;;  %v5302_v60 = vmul.f32 0.125, %v7238_v54 }
 0xe79   :  { %v5300_v14 = vmul.f32 0.125, %v5281_v49  ;;  %v7239_v0 = vpop.f32.mrb[90].mxu1 }
 0xe7a   :  { %v5303_v34 = vmul.f32 0.125, %v7239_v0  ;;  %v5284_v2 = vpop.f32.mrb[91].mxu1  ;;  %v5310_v55 = vadd.f32 %v5302_v60, %v8677_v27 }
 0xe7b   :  { %v5308_v24 = vadd.f32 %v5300_v14, %v8681_v10  ;;  %v5301_v50 = vmul.f32 0.125, %v5284_v2 }
 0xe7c   :  { %v5311_v63 = vadd.f32 %v5303_v34, %v8679_v9  ;;  %v5330_v7 = vsel %vm3483_vm4, %v5310_v55, -inf }
 0xe7d   :  { %v5309_v1 = vadd.f32 %v5301_v50, %v8687_v3  ;;  %v5324_v56 = vsel %vm3483_vm4, %v5308_v24, -inf }
 0xe7e   :  { %5325 = vmax.xlane.f32.xlu0 %v5324_v56  ;;  %v5333_v30 = vsel %vm3483_vm4, %v5311_v63, -inf }
 0xe7f   :  { %5334 = vmax.xlane.f32.xlu1 %v5333_v30  ;;  %v5327_v51 = vsel %vm3483_vm4, %v5309_v1, -inf }
 0xe82   :  { %5328 = vmax.xlane.f32.xlu0 %v5327_v51 }
 0xe86   :  { %5331 = vmax.xlane.f32.xlu0 %v5330_v7 }
 0xef6   :  { %v5320_v17 = vpop.xlane.xlu0 %5319 }
 0xef7   :  { %v5338_v45 = vsub.f32 %v5306_v28, %v5320_v17 }
 0xef8   :  { %v5323_v4 = vpop.xlane.xlu1 %5322 }
 0xef9   :  { %v5348_v54 = vmul.f32 1.442695, %v5338_v45  ;;  %v5339_v49 = vsub.f32 %v5307_v31, %v5323_v4 }
 0xefa   :  { %v5314_v14 = vpop.xlane.xlu0 %5313 }
 0xefb   :  { %8219 = vpow2.f32 %v5348_v54  ;;  %v5350_v0 = vmul.f32 1.442695, %v5339_v49  ;;  %v5336_v34 = vsub.f32 %v5304_v6, %v5314_v14 }
 0xefc   :  { %v5317_v2 = vpop.xlane.xlu1 %5316 }
 0xefd   :  { %8221 = vpow2.f32 %v5350_v0  ;;  %v5344_v50 = vmul.f32 1.442695, %v5336_v34  ;;  %v5337_v56 = vsub.f32 %v5305_v61, %v5317_v2 }
 0xeff   :  { %8223 = vpow2.f32 %v5344_v50  ;;  %v5346_v60 = vmul.f32 1.442695, %v5337_v56 }
 0xf01   :  { %8225 = vpow2.f32 %v5346_v60 }
 0xf05   :  { %v9169_v30 = vpop.eup %8219 }
 0xf06   :  { %v5366_v51 = vsel %vm3483_vm4, %v9169_v30, 0.0 }
 0xf07   :  { %v9173_v28 = vpop.eup %8221  ;;  %5367 = vadd.xlane.f32.xlu0 %v5366_v51 }
 0xf08   :  { %v5369_v31 = vsel %vm3483_vm4, %v9173_v28, 0.0 }
 0xf09   :  { %v8224_v7 = vpop.eup %8223  ;;  %5370 = vadd.xlane.f32.xlu1 %v5369_v31 }
 0xf0a   :  { %v5360_v6 = vsel %vm3483_vm4, %v8224_v7, 0.0 }
 0xf0b   :  { %v8226_v17 = vpop.eup %8225  ;;  %v5326_v61 = vpop.xlane.xlu0 %5325  ;;  %5361 = vadd.xlane.f32.xlu0 %v5360_v6 }
 0xf0c   :  { %v5363_v45 = vsel %vm3483_vm4, %v8226_v17, 0.0  ;;  %v5340_v54 = vsub.f32 %v5308_v24, %v5326_v61 }
 0xf0d   :  { %5364 = vadd.xlane.f32.xlu1 %v5363_v45 }
 0xf0e   :  { %v5352_v0 = vmul.f32 1.442695, %v5340_v54 }
 0xf0f   :  { %v5329_v4 = vpop.xlane.xlu0 %5328 }
 0xf10   :  { %v5341_v31 = vsub.f32 %v5309_v1, %v5329_v4 }
 0xf13   :  { %v5332_v49 = vpop.xlane.xlu0 %5331 }
 0xf14   :  { %v5342_v14 = vsub.f32 %v5310_v55, %v5332_v49  ;;  %v5335_v55 = vpop.xlane.xlu1 %5334 }
 0xf15   :  { %v5343_v60 = vsub.f32 %v5311_v63, %v5335_v55 }
 0xf16   :  { %v5356_v34 = vmul.f32 1.442695, %v5342_v14 }
 0xf17   :  { %v5358_v51 = vmul.f32 1.442695, %v5343_v60 }
 0xf18   :  { %8227 = vpow2.f32 %v5356_v34 }
 0xf19   :  { %8229 = vpow2.f32 %v5352_v0 }
 0xf1a   :  { %8231 = vpow2.f32 %v5358_v51 }
 0xf1e   :  { %5469 = vrot.lane.b32.xlu1 %v8659_v58, %s8410_s1  ;;  %v5354_v58 = vmul.f32 1.442695, %v5341_v31 }
 0xf20   :  { %8233 = vpow2.f32 %v5354_v58 }
 0xf22   :  { %v9181_v2 = vpop.eup %8227  ;;  %5408 = vrot.lane.b32.xlu1 %v8649_v29, %s8410_s1 }
 0xf23   :  { %v5378_v50 = vsel %vm3483_vm4, %v9181_v2, 0.0  ;;  %v9187_v56 = vpop.eup %8229 }
 0xf24   :  { %5379 = vadd.xlane.f32.xlu0 %v5378_v50  ;;  %v5372_v24 = vsel %vm3483_vm4, %v9187_v56, 0.0  ;;  %v9193_v29 = vpop.eup %8231 }
 0xf25   :  { %v5381_v6 = vsel %vm3483_vm4, %v9193_v29, 0.0 }
 0xf28   :  { %5373 = vadd.xlane.f32.xlu0 %v5372_v24 }
 0xf2a   :  { %v9197_v61 = vpop.eup %8233 }
 0xf2b   :  { %v5375_v45 = vsel %vm3483_vm4, %v9197_v61, 0.0 }
 0xf3e   :  { %5406 = vrot.lane.b32.xlu0 %v8639_v25, %s8410_s1 }
 0xf46   :  { %5382 = vadd.xlane.f32.xlu1 %v5381_v6 }
 0xf4a   :  { %5376 = vadd.xlane.f32.xlu1 %v5375_v45  ;;  %v5549_v45 = vsel %vm3344_vm0, %v8591_v23, 0 }
 0xf5b   :  { %5471 = vrot.lane.b32.xlu1 %v8669_v12, %s8410_s1 }
 0xf94   :  { %v5368_v63 = vpop.xlane.xlu0 %5367 }
 0xf96   :  { %v5371_v1 = vpop.xlane.xlu1 %5370 }
 0xf98   :  { %v5362_v4 = vpop.xlane.xlu0 %5361 }
 0xf99   :  { %8235 = vrcp.f32 %v5362_v4  ;;  %v9595_v4 = vld [vmem:[#allocation12_spill] sm:$0xff] }
 0xf9a   :  { %v5365_v25 = vpop.xlane.xlu1 %5364 }
 0xf9b   :  { %8237 = vrcp.f32 %v5365_v25 }
 0xf9c   :  { %8239 = vrcp.f32 %v5371_v1 }
 0xf9d   :  { %8241 = vrcp.f32 %v5368_v63  ;;  %v9593_v63 = vld [vmem:[#allocation15_spill] sm:$0xff] }
 0xf9e   :  { %v5470_v54 = vpop.permute.xlu1 %5469 }
 0xf9f   :  { %7248 = vmatprep.subr.bf16.mxu1 %v5470_v54 }
 0xfa0   :  { %7249 = vmatpush3.bf16.msra.mxu1 %v5470_v54  ;;  %v9596_v54 = vld [vmem:[#allocation19_spill] sm:$0xff] }
 0xfa2   :  { %v5409_v31 = vpop.permute.xlu1 %5408 }
 0xfa3   :  { %v8236_v49 = vpop.eup %8235 }
 0xfa4   :  { %v5392_v0 = vmul.f32 %v8236_v49, %v8224_v7 }
 0xfa5   :  { %v8238_v14 = vpop.eup %8237 }
 0xfa6   :  { %v5393_v34 = vmul.f32 %v8238_v14, %v8226_v17  ;;  %v8240_v55 = vpop.eup %8239  ;;  %v9592_v17 = vld [vmem:[#allocation11_spill] sm:$0xff]  ;;  %v9597_v14 = vld [vmem:[#allocation16_spill] sm:$0xff] }
 0xfa7   :  { %v8242_v51 = vpop.eup %8241  ;;  %v5395_v58 = vmul.f32 %v8240_v55, %v9173_v28  ;;  %v9594_v28 = vld [vmem:[#allocation18_spill] sm:$0xff] }
 0xfa8   :  { %v5400_v50 = vpack.c.bf16 %v5393_v34, %v5392_v0  ;;  %v5394_v6 = vmul.f32 %v8242_v51, %v9169_v30  ;;  %v5552_v30 = vsel %vm3344_vm0, %v9593_v63, 0 }
 0xfaa   :  { %7244 = vmatprep.mubr.msk.bf16.mxu0 %vm3483_vm4, %v5400_v50  ;;  %v5401_v7 = vpack.c.bf16 %v5395_v58, %v5394_v6  ;;  %v5610_v6 = vsel %vm3344_vm0, %v9597_v14, 0 }
 0xfb1   :  { %v5380_v24 = vpop.xlane.xlu0 %5379 }
 0xfb5   :  { %v5374_v12 = vpop.xlane.xlu0 %5373 }
 0xfb9   :  { %v5407_v60 = vpop.permute.xlu0 %5406 }
 0xfba   :  { %7240 = vmatprep.subr.bf16.mxu0 %v5407_v60 }
 0xfbb   :  { %7241 = vmatpush3.bf16.msra.mxu0 %v5407_v60 }
 0xfbc   :  { %7242 = vmatprep.subr.bf16.mxu0 %v5409_v31 }
 0xfbf   :  { %7243 = vmatpush3.bf16.msra.mxu0 %v5409_v31 }
 0xfc0   :  { %7440 = vmatprep.subr.msk.bf16.mxu0 %vm3344_vm0, %v8591_v23 }
 0xfc2   :  { %7245 = vmatmul.mubr.msk.bf16.vlgmr.msra.gmra.mrb[92].mxu0 %vm3483_vm4, %v5401_v7  ;;  %v9598_v7 = vld [vmem:[#allocation13_spill] sm:$0xff] }
 0xfc3   :  { %7260 = vmatprep.mubr.msk.bf16.mxu0 %vm3344_vm0, %v9592_v17 }
 0xfc8   :  { %7257 = vmatpush3.bf16.xpose.msra.mxu0 %v5549_v45  ;;  %v9602_v45 = vld [vmem:[#allocation21_spill] sm:$0xff] }
 0xfc9   :  { %7441 = vmatprep.subr.msk.bf16.mxu0 %vm3344_vm0, %v9593_v63 }
 0xfd0   :  { %7259 = vmatpush3.bf16.xpose.msra.mxu0 %v5552_v30 }
 0xfd1   :  { %7272 = vmatprep.subr.bf16.mxu0 %v9594_v28 }
 0xfd3   :  { %v5383_v1 = vpop.xlane.xlu1 %5382 }
 0xfd4   :  { %8243 = vrcp.f32 %v5383_v1 }
 0xfd5   :  { %8245 = vrcp.f32 %v5374_v12 }
 0xfd6   :  { %8247 = vrcp.f32 %v5380_v24 }
 0xfd7   :  { %7261 = vmatmul.mubr.msk.bf16.vlgmr.msra.gmra.mrb[96].mxu0 %vm3344_vm0, %v9595_v4  ;;  %v5377_v25 = vpop.xlane.xlu1 %5376 }
 0xfd8   :  { %7273 = vmatpush3.bf16.msra.mxu0 %v9594_v28  ;;  %8249 = vrcp.f32 %v5377_v25 }
 0xfd9   :  { %7274 = vmatprep.subr.bf16.mxu0 %v9596_v54 }
 0xfdb   :  { %v5472_v49 = vpop.permute.xlu1 %5471 }
 0xfdc   :  { %7275 = vmatpush3.bf16.msra.mxu0 %v9596_v54  ;;  %7250 = vmatprep.subr.bf16.mxu1 %v5472_v49 }
 0xfdd   :  { %7251 = vmatpush3.bf16.msra.mxu1 %v5472_v49 }
 0xfde   :  { %7442 = vmatprep.subr.msk.bf16.mxu1 %vm3344_vm0, %v9597_v14  ;;  %v8244_v0 = vpop.eup %8243 }
 0xfdf   :  { %v8246_v34 = vpop.eup %8245  ;;  %v5399_v12 = vmul.f32 %v8244_v0, %v9193_v29  ;;  %v9599_v29 = vld [vmem:[#allocation17_spill] sm:$0xff] }
 0xfe0   :  { %v8248_v50 = vpop.eup %8247  ;;  %v5396_v55 = vmul.f32 %v8246_v34, %v9187_v56  ;;  %v5613_v56 = vsel %vm3344_vm0, %v9599_v29, 0 }
 0xfe1   :  { %v5398_v51 = vmul.f32 %v8248_v50, %v9181_v2  ;;  %v9600_v2 = vld [vmem:[#allocation20_spill] sm:$0xff] }
 0xfe2   :  { %v8250_v24 = vpop.eup %8249 }
 0xfe3   :  { %v5397_v60 = vmul.f32 %v8250_v24, %v9197_v61  ;;  %v5403_v58 = vpack.c.bf16 %v5399_v12, %v5398_v51  ;;  %v9601_v61 = vld [vmem:[#allocation14_spill] sm:$0xff] }
 0xfe5   :  { %v5402_v31 = vpack.c.bf16 %v5397_v60, %v5396_v55 }
 0xfe7   :  { %7252 = vmatprep.mubr.msk.bf16.mxu1 %vm3483_vm4, %v5402_v31 }
 0xfe8   :  { %7253 = vmatmul.mubr.msk.bf16.vlgmr.msra.gmra.mrb[92].mxu1 %vm3483_vm4, %v5403_v58 }
 0xfe9   :  { %7265 = vmatpush3.bf16.xpose.msra.mxu1 %v5610_v6  ;;  %7268 = vmatprep.mubr.msk.bf16.mxu1 %vm3344_vm0, %v9598_v7 }
 0xfea   :  { %7443 = vmatprep.subr.msk.bf16.mxu1 %vm3344_vm0, %v9599_v29 }
 0xff1   :  { %7267 = vmatpush3.bf16.xpose.msra.mxu1 %v5613_v56 }
 0xff2   :  { %7280 = vmatprep.subr.bf16.mxu1 %v9600_v2 }
 0xff8   :  { %7269 = vmatmul.mubr.msk.bf16.vlgmr.msra.gmra.mrb[96].mxu1 %vm3344_vm0, %v9601_v61 }
 0xff9   :  { %7281 = vmatpush3.bf16.msra.mxu1 %v9600_v2 }
 0xffa   :  { %7282 = vmatprep.subr.bf16.mxu1 %v9602_v45 }
 0xffd   :  { %7283 = vmatpush3.bf16.msra.mxu1 %v9602_v45 }
0x1095   :  { %v9245_v30 = vpop.f32.mrb[92].mxu0 }
0x1096   :  { %v9247_v1 = vpop.f32.mrb[93].mxu0 }
0x1097   :  { %v9249_v25 = vpop.f32.mrb[94].mxu0 }
0x1098   :  { %v9251_v49 = vpop.f32.mrb[95].mxu0 }
0x10aa   :  { %v7262_v0 = vpop.f32.mrb[96].mxu0 }
0x10ab   :  { %v5666_v34 = vmul.f32 0.125, %v7262_v0  ;;  %v5588_v50 = vpop.f32.mrb[97].mxu0 }
0x10ac   :  { %v5664_v24 = vmul.f32 0.125, %v5588_v50  ;;  %v7263_v12 = vpop.f32.mrb[98].mxu0 }
0x10ad   :  { %v5674_v55 = vadd.f32 %v5666_v34, %v8677_v27  ;;  %v5667_v60 = vmul.f32 0.125, %v7263_v12  ;;  %v5591_v51 = vpop.f32.mrb[99].mxu0 }
0x10ae   :  { %v5665_v31 = vmul.f32 0.125, %v5591_v51  ;;  %v5672_v58 = vadd.f32 %v5664_v24, %v8681_v10 }
0x10af   :  { %v5675_v6 = vadd.f32 %v5667_v60, %v8679_v9  ;;  %v5686_v56 = vsel %vm3483_vm4, %v5674_v55, -inf }
0x10b0   :  { %5687 = vmax.xlane.f32.xlu0 %v5686_v56  ;;  %v5673_v22 = vadd.f32 %v5665_v31, %v8687_v3  ;;  %v5680_v0 = vsel %vm3483_vm4, %v5672_v58, -inf }
0x10b1   :  { %v5689_v5 = vsel %vm3483_vm4, %v5675_v6, -inf }
0x10b2   :  { %5690 = vmax.xlane.f32.xlu1 %v5689_v5  ;;  %v5683_v34 = vsel %vm3483_vm4, %v5673_v22, -inf }
0x10b4   :  { %5681 = vmax.xlane.f32.xlu0 %v5680_v0 }
0x10b6   :  { %5684 = vmax.xlane.f32.xlu1 %v5683_v34 }
0x10bb   :  { %v9261_v50 = vpop.f32.mrb[92].mxu1 }
0x10bc   :  { %v9263_v12 = vpop.f32.mrb[93].mxu1 }
0x10bd   :  { %v9265_v24 = vpop.f32.mrb[94].mxu1 }
0x10be   :  { %v9267_v60 = vpop.f32.mrb[95].mxu1 }
0x10cb   :  { %v7270_v51 = vpop.f32.mrb[96].mxu1 }
0x10cc   :  { %v5649_v56 = vpop.f32.mrb[97].mxu1  ;;  %v5670_v34 = vmul.f32 0.125, %v7270_v51 }
0x10cd   :  { %v5668_v31 = vmul.f32 0.125, %v5649_v56  ;;  %v7271_v40 = vpop.f32.mrb[98].mxu1 }
0x10ce   :  { %v5671_v53 = vmul.f32 0.125, %v7271_v40  ;;  %v5652_v5 = vpop.f32.mrb[99].mxu1  ;;  %v5678_v20 = vadd.f32 %v5670_v34, %v8677_v27 }
0x10cf   :  { %v5676_v26 = vadd.f32 %v5668_v31, %v8681_v10  ;;  %v5669_v0 = vmul.f32 0.125, %v5652_v5 }
0x10d0   :  { %v5679_v52 = vadd.f32 %v5671_v53, %v8679_v9  ;;  %v5698_v40 = vsel %vm3483_vm4, %v5678_v20, -inf }
0x10d1   :  { %v5677_v42 = vadd.f32 %v5669_v0, %v8687_v3  ;;  %v5692_v15 = vsel %vm3483_vm4, %v5676_v26, -inf }
0x10d2   :  { %5693 = vmax.xlane.f32.xlu0 %v5692_v15  ;;  %v5701_v35 = vsel %vm3483_vm4, %v5679_v52, -inf }
0x10d3   :  { %5702 = vmax.xlane.f32.xlu1 %v5701_v35  ;;  %v5695_v56 = vsel %vm3483_vm4, %v5677_v42, -inf }
0x10d6   :  { %5696 = vmax.xlane.f32.xlu0 %v5695_v56 }
0x10da   :  { %5699 = vmax.xlane.f32.xlu0 %v5698_v40 }
0x113d   :  { %v5688_v31 = vpop.xlane.xlu0 %5687 }
0x113e   :  { %v5706_v5 = vsub.f32 %v5674_v55, %v5688_v31 }
0x113f   :  { %v5691_v53 = vpop.xlane.xlu1 %5690 }
0x1140   :  { %v5716_v51 = vmul.f32 1.442695, %v5706_v5  ;;  %v5707_v39 = vsub.f32 %v5675_v6, %v5691_v53 }
0x1141   :  { %v5682_v0 = vpop.xlane.xlu0 %5681 }
0x1142   :  { %8251 = vpow2.f32 %v5716_v51  ;;  %v5718_v44 = vmul.f32 1.442695, %v5707_v39  ;;  %v5704_v15 = vsub.f32 %v5672_v58, %v5682_v0 }
0x1143   :  { %v5685_v57 = vpop.xlane.xlu1 %5684 }
0x1144   :  { %8253 = vpow2.f32 %v5718_v44  ;;  %v5712_v35 = vmul.f32 1.442695, %v5704_v15  ;;  %v5705_v21 = vsub.f32 %v5673_v22, %v5685_v57 }
0x1146   :  { %8255 = vpow2.f32 %v5712_v35  ;;  %v5714_v34 = vmul.f32 1.442695, %v5705_v21 }
0x1148   :  { %8257 = vpow2.f32 %v5714_v34 }
0x114c   :  { %v9277_v56 = vpop.eup %8251 }
0x114d   :  { %v5734_v40 = vsel %vm3483_vm4, %v9277_v56, 0.0 }
0x114e   :  { %v8254_v55 = vpop.eup %8253  ;;  %5735 = vadd.xlane.f32.xlu0 %v5734_v40 }
0x114f   :  { %v5737_v6 = vsel %vm3483_vm4, %v8254_v55, 0.0 }
0x1150   :  { %v8256_v31 = vpop.eup %8255  ;;  %5738 = vadd.xlane.f32.xlu1 %v5737_v6 }
0x1151   :  { %v5728_v39 = vsel %vm3483_vm4, %v8256_v31, 0.0 }
0x1152   :  { %v8258_v58 = vpop.eup %8257  ;;  %5729 = vadd.xlane.f32.xlu0 %v5728_v39 }
0x1153   :  { %v5731_v57 = vsel %vm3483_vm4, %v8258_v58, 0.0 }
0x1154   :  { %5732 = vadd.xlane.f32.xlu1 %v5731_v57 }
0x115f   :  { %v5694_v21 = vpop.xlane.xlu0 %5693 }
0x1160   :  { %v5708_v22 = vsub.f32 %v5676_v26, %v5694_v21  ;;  %v5703_v15 = vpop.xlane.xlu1 %5702 }
0x1161   :  { %v5711_v35 = vsub.f32 %v5679_v52, %v5703_v15 }
0x1162   :  { %v5720_v51 = vmul.f32 1.442695, %v5708_v22 }
0x1163   :  { %v5697_v44 = vpop.xlane.xlu0 %5696  ;;  %v5726_v40 = vmul.f32 1.442695, %v5711_v35 }
0x1164   :  { %v5709_v6 = vsub.f32 %v5677_v42, %v5697_v44 }
0x1165   :  { %5963 = vrot.lane.b32.xlu1 %v9597_v14, %s8410_s1 }
0x1166   :  { %v5722_v26 = vmul.f32 1.442695, %v5709_v6 }
0x1167   :  { %v5700_v5 = vpop.xlane.xlu0 %5699 }
0x1168   :  { %v5710_v53 = vsub.f32 %v5678_v20, %v5700_v5 }
0x116a   :  { %v5724_v0 = vmul.f32 1.442695, %v5710_v53 }
0x116c   :  { %8259 = vpow2.f32 %v5724_v0 }
0x116d   :  { %8261 = vpow2.f32 %v5720_v51 }
0x116e   :  { %8263 = vpow2.f32 %v5726_v40 }
0x116f   :  { %8265 = vpow2.f32 %v5722_v26 }
0x1176   :  { %v9286_v34 = vpop.eup %8259 }
0x1177   :  { %v5746_v39 = vsel %vm3483_vm4, %v9286_v34, 0.0  ;;  %v9290_v57 = vpop.eup %8261 }
0x1178   :  { %5747 = vadd.xlane.f32.xlu0 %v5746_v39  ;;  %v5740_v20 = vsel %vm3483_vm4, %v9290_v57, 0.0  ;;  %v8264_v14 = vpop.eup %8263 }
0x1179   :  { %v5749_v52 = vsel %vm3483_vm4, %v8264_v14, 0.0  ;;  %v8266_v21 = vpop.eup %8265 }
0x117a   :  { %v5743_v42 = vsel %vm3483_vm4, %v8266_v21, 0.0 }
0x117c   :  { %5741 = vadd.xlane.f32.xlu0 %v5740_v20 }
0x1189   :  { %5750 = vadd.xlane.f32.xlu1 %v5749_v52 }
0x118d   :  { %5744 = vadd.xlane.f32.xlu1 %v5743_v42 }
0x1192   :  { %5890 = vrot.lane.b32.xlu0 %v8591_v23, %s8410_s1 }
0x1196   :  { %5884 = vrot.lane.b32.xlu0 %v9592_v17, %s8410_s1 }
0x119a   :  { %5886 = vrot.lane.b32.xlu0 %v9595_v4, %s8410_s1 }
0x119e   :  { %5892 = vrot.lane.b32.xlu1 %v9593_v63, %s8410_s1 }
0x11a2   :  { %5965 = vrot.lane.b32.xlu1 %v9599_v29, %s8410_s1 }
0x11a6   :  { %5957 = vrot.lane.b32.xlu1 %v9598_v7, %s8410_s1 }
0x11aa   :  { %5959 = vrot.lane.b32.xlu1 %v9601_v61, %s8410_s1 }
0x11db   :  { %v5736_v44 = vpop.xlane.xlu0 %5735 }
0x11dd   :  { %v5739_v23 = vpop.xlane.xlu1 %5738 }
0x11de   :  { %8267 = vrcp.f32 %v5739_v23 }
0x11df   :  { %v5730_v22 = vpop.xlane.xlu0 %5729 }
0x11e0   :  { %8269 = vrcp.f32 %v5730_v22 }
0x11e1   :  { %8271 = vrcp.f32 %v5736_v44  ;;  %v5733_v17 = vpop.xlane.xlu1 %5732 }
0x11e2   :  { %8273 = vrcp.f32 %v5733_v17 }
0x11e5   :  { %v5964_v4 = vpop.permute.xlu1 %5963 }
0x11e6   :  { %7446 = vmatprep.subr.msk.bf16.mxu1 %vm3344_vm0, %v5964_v4 }
0x11e8   :  { %v8268_v63 = vpop.eup %8267 }
0x11e9   :  { %v5763_v51 = vmul.f32 %v8268_v63, %v8254_v55 }
0x11ea   :  { %v8270_v5 = vpop.eup %8269 }
0x11eb   :  { %v8272_v29 = vpop.eup %8271  ;;  %v5760_v7 = vmul.f32 %v8270_v5, %v8256_v31 }
0x11ec   :  { %v8274_v53 = vpop.eup %8273  ;;  %v5762_v61 = vmul.f32 %v8272_v29, %v9277_v56 }
0x11ed   :  { %v5761_v0 = vmul.f32 %v8274_v53, %v8258_v58 }
0x11ee   :  { %v5769_v35 = vpack.c.bf16 %v5763_v51, %v5762_v61 }
0x11ef   :  { %v5768_v15 = vpack.c.bf16 %v5761_v0, %v5760_v7  ;;  %v5974_v0 = vsel %vm3344_vm0, %v5964_v4, 0 }
0x11f1   :  { %7276 = vmatprep.mubr.msk.bf16.mxu0 %vm3483_vm4, %v5768_v15 }
0x11f2   :  { %7277 = vmatmul.mubr.msk.bf16.vlgmr.msra.gmra.mrb[100].mxu0 %vm3483_vm4, %v5769_v35 }
0x1205   :  { %v5748_v40 = vpop.xlane.xlu0 %5747 }
0x1209   :  { %v5742_v6 = vpop.xlane.xlu0 %5741 }
0x120d   :  { %v5891_v39 = vpop.permute.xlu0 %5890 }
0x120e   :  { %v5901_v26 = vsel %vm3344_vm0, %v5891_v39, 0  ;;  %7444 = vmatprep.subr.msk.bf16.mxu0 %vm3344_vm0, %v5891_v39 }
0x120f   :  { %7289 = vmatpush3.bf16.xpose.msra.mxu0 %v5901_v26 }
0x1211   :  { %v5885_v20 = vpop.permute.xlu0 %5884 }
0x1212   :  { %7292 = vmatprep.mubr.msk.bf16.mxu0 %vm3344_vm0, %v5885_v20 }
0x1215   :  { %v5887_v63 = vpop.permute.xlu0 %5886 }
0x1216   :  { %v5751_v55 = vpop.xlane.xlu1 %5750 }
0x1217   :  { %8275 = vrcp.f32 %v5751_v55 }
0x1218   :  { %8277 = vrcp.f32 %v5742_v6 }
0x1219   :  { %8279 = vrcp.f32 %v5748_v40 }
0x121a   :  { %v5745_v56 = vpop.xlane.xlu1 %5744 }
0x121b   :  { %8281 = vrcp.f32 %v5745_v56 }
0x121e   :  { %v5893_v31 = vpop.permute.xlu1 %5892 }
0x121f   :  { %v5904_v58 = vsel %vm3344_vm0, %v5893_v31, 0  ;;  %7445 = vmatprep.subr.msk.bf16.mxu0 %vm3344_vm0, %v5893_v31 }
0x1220   :  { %7291 = vmatpush3.bf16.xpose.msra.mxu0 %v5904_v58 }
0x1221   :  { %v8276_v52 = vpop.eup %8275 }
0x1222   :  { %v8278_v42 = vpop.eup %8277  ;;  %v5767_v22 = vmul.f32 %v8276_v52, %v8264_v14  ;;  %v5966_v17 = vpop.permute.xlu1 %5965 }
0x1223   :  { %v8280_v44 = vpop.eup %8279  ;;  %v5764_v5 = vmul.f32 %v8278_v42, %v9290_v57  ;;  %v5977_v57 = vsel %vm3344_vm0, %v5966_v17, 0 }
0x1224   :  { %v5766_v53 = vmul.f32 %v8280_v44, %v9286_v34 }
0x1225   :  { %v8282_v23 = vpop.eup %8281 }
0x1226   :  { %v5765_v29 = vmul.f32 %v8282_v23, %v8266_v21  ;;  %v5771_v7 = vpack.c.bf16 %v5767_v22, %v5766_v53  ;;  %v5958_v61 = vpop.permute.xlu1 %5957 }
0x1227   :  { %7293 = vmatmul.mubr.msk.bf16.vlgmr.msra.gmra.mrb[104].mxu0 %vm3344_vm0, %v5887_v63 }
0x1228   :  { %v5770_v51 = vpack.c.bf16 %v5765_v29, %v5764_v5 }
0x122a   :  { %7284 = vmatprep.mubr.msk.bf16.mxu1 %vm3483_vm4, %v5770_v51  ;;  %v5960_v34 = vpop.permute.xlu1 %5959 }
0x122b   :  { %7285 = vmatmul.mubr.msk.bf16.vlgmr.msra.gmra.mrb[100].mxu1 %vm3483_vm4, %v5771_v7 }
0x122c   :  { %7297 = vmatpush3.bf16.xpose.msra.mxu1 %v5974_v0  ;;  %7300 = vmatprep.mubr.msk.bf16.mxu1 %vm3344_vm0, %v5958_v61 }
0x122d   :  { %7447 = vmatprep.subr.msk.bf16.mxu1 %vm3344_vm0, %v5966_v17 }
0x1234   :  { %7299 = vmatpush3.bf16.xpose.msra.mxu1 %v5977_v57 }
0x123b   :  { %7301 = vmatmul.mubr.msk.bf16.vlgmr.msra.gmra.mrb[104].mxu1 %vm3344_vm0, %v5960_v34 }
0x12c5   :  { %v9329_v14 = vpop.f32.mrb[100].mxu0 }
0x12c6   :  { %v9331_v21 = vpop.f32.mrb[101].mxu0 }
0x12c7   :  { %v9333_v15 = vpop.f32.mrb[102].mxu0 }
0x12c8   :  { %v9335_v4 = vpop.f32.mrb[103].mxu0 }
0x12fa   :  { %v7294_v35 = vpop.f32.mrb[104].mxu0 }
0x12fb   :  { %v6030_v40 = vmul.f32 0.125, %v7294_v35  ;;  %v5940_v6 = vpop.f32.mrb[105].mxu0 }
0x12fc   :  { %v6028_v39 = vmul.f32 0.125, %v5940_v6  ;;  %v7295_v26 = vpop.f32.mrb[106].mxu0 }
0x12fd   :  { %v6038_v20 = vadd.f32 %v6030_v40, %v8677_v27  ;;  %v6031_v55 = vmul.f32 0.125, %v7295_v26  ;;  %v5943_v56 = vpop.f32.mrb[107].mxu0 }
0x12fe   :  { %v6029_v31 = vmul.f32 0.125, %v5943_v56  ;;  %v9338_v58 = vpop.f32.mrb[100].mxu1  ;;  %v6036_v52 = vadd.f32 %v6028_v39, %v8681_v10 }
0x12ff   :  { %v6039_v42 = vadd.f32 %v6031_v55, %v8679_v9  ;;  %v9342_v44 = vpop.f32.mrb[101].mxu1  ;;  %v6050_v23 = vsel %vm3483_vm4, %v6038_v20, -inf }
0x1300   :  { %v9345_v22 = vpop.f32.mrb[102].mxu1  ;;  %6051 = vmax.xlane.f32.xlu0 %v6050_v23  ;;  %v6037_v17 = vadd.f32 %v6029_v31, %v8687_v3  ;;  %v6044_v29 = vsel %vm3483_vm4, %v6036_v52, -inf }
0x1301   :  { %v9348_v63 = vpop.f32.mrb[103].mxu1  ;;  %v6053_v5 = vsel %vm3483_vm4, %v6039_v42, -inf }
0x1302   :  { %6054 = vmax.xlane.f32.xlu1 %v6053_v5  ;;  %v6047_v53 = vsel %vm3483_vm4, %v6037_v17, -inf }
0x1304   :  { %6045 = vmax.xlane.f32.xlu0 %v6044_v29 }
0x1306   :  { %6048 = vmax.xlane.f32.xlu1 %v6047_v53 }
0x130e   :  { %v7302_v51 = vpop.f32.mrb[104].mxu1 }
0x130f   :  { %v6013_v7 = vpop.f32.mrb[105].mxu1  ;;  %v6034_v39 = vmul.f32 0.125, %v7302_v51 }
0x1310   :  { %v6032_v0 = vmul.f32 0.125, %v6013_v7  ;;  %v7303_v61 = vpop.f32.mrb[106].mxu1 }
0x1311   :  { %v6035_v57 = vmul.f32 0.125, %v7303_v61  ;;  %v6016_v34 = vpop.f32.mrb[107].mxu1  ;;  %v6042_v31 = vadd.f32 %v6034_v39, %v8677_v27 }
0x1312   :  { %v6040_v35 = vadd.f32 %v6032_v0, %v8681_v10  ;;  %v6033_v40 = vmul.f32 0.125, %v6016_v34 }
0x1313   :  { %v6043_v6 = vadd.f32 %v6035_v57, %v8679_v9  ;;  %v6062_v5 = vsel %vm3483_vm4, %v6042_v31, -inf }
0x1314   :  { %v6041_v26 = vadd.f32 %v6033_v40, %v8687_v3  ;;  %v6056_v55 = vsel %vm3483_vm4, %v6040_v35, -inf }
0x1315   :  { %6057 = vmax.xlane.f32.xlu0 %v6056_v55  ;;  %v6065_v56 = vsel %vm3483_vm4, %v6043_v6, -inf }
0x1316   :  { %6066 = vmax.xlane.f32.xlu1 %v6065_v56  ;;  %v6059_v23 = vsel %vm3483_vm4, %v6041_v26, -inf }
0x1319   :  { %6060 = vmax.xlane.f32.xlu0 %v6059_v23 }
0x131d   :  { %6063 = vmax.xlane.f32.xlu0 %v6062_v5 }
0x138d   :  { %v6052_v10 = vpop.xlane.xlu0 %6051 }
0x138e   :  { %v6070_v29 = vsub.f32 %v6038_v20, %v6052_v10 }
0x138f   :  { %v6055_v9 = vpop.xlane.xlu1 %6054 }
0x1390   :  { %v6080_v53 = vmul.f32 1.442695, %v6070_v29  ;;  %v6071_v51 = vsub.f32 %v6039_v42, %v6055_v9 }
0x1391   :  { %v6046_v3 = vpop.xlane.xlu0 %6045 }
0x1392   :  { %8283 = vpow2.f32 %v6080_v53  ;;  %v6082_v7 = vmul.f32 1.442695, %v6071_v51  ;;  %v6068_v0 = vsub.f32 %v6036_v52, %v6046_v3 }
0x1393   :  { %v6049_v61 = vpop.xlane.xlu1 %6048 }
0x1394   :  { %8285 = vpow2.f32 %v6082_v7  ;;  %v6076_v57 = vmul.f32 1.442695, %v6068_v0  ;;  %v6069_v34 = vsub.f32 %v6037_v17, %v6049_v61 }
0x1396   :  { %8287 = vpow2.f32 %v6076_v57  ;;  %v6078_v27 = vmul.f32 1.442695, %v6069_v34 }
0x1398   :  { %8289 = vpow2.f32 %v6078_v27 }
0x139c   :  { %v9361_v40 = vpop.eup %8283 }
0x139d   :  { %v6098_v39 = vsel %vm3483_vm4, %v9361_v40, 0.0 }
0x139e   :  { %v9365_v20 = vpop.eup %8285  ;;  %6099 = vadd.xlane.f32.xlu0 %v6098_v39 }
0x139f   :  { %v6101_v42 = vsel %vm3483_vm4, %v9365_v20, 0.0 }
0x13a0   :  { %v9369_v55 = vpop.eup %8287  ;;  %6102 = vadd.xlane.f32.xlu1 %v6101_v42  ;;  %v9605_v42 = vld [vmem:[#allocation29_spill] sm:$0xff] }
0x13a1   :  { %v6092_v52 = vsel %vm3483_vm4, %v9369_v55, 0.0 }
0x13a2   :  { %v9373_v17 = vpop.eup %8289  ;;  %v6058_v56 = vpop.xlane.xlu0 %6057  ;;  %6093 = vadd.xlane.f32.xlu0 %v6092_v52 }
0x13a3   :  { %v6095_v23 = vsel %vm3483_vm4, %v9373_v17, 0.0  ;;  %v6072_v10 = vsub.f32 %v6040_v35, %v6058_v56 }
0x13a4   :  { %6096 = vadd.xlane.f32.xlu1 %v6095_v23 }
0x13a5   :  { %v6084_v53 = vmul.f32 1.442695, %v6072_v10 }
0x13a6   :  { %v6061_v5 = vpop.xlane.xlu0 %6060 }
0x13a7   :  { %v6073_v34 = vsub.f32 %v6041_v26, %v6061_v5  ;;  %v9607_v5 = vld [vmem:[#allocation33_spill] sm:$0xff] }
0x13aa   :  { %v6064_v29 = vpop.xlane.xlu0 %6063 }
0x13ab   :  { %v6074_v9 = vsub.f32 %v6042_v31, %v6064_v29  ;;  %v6067_v31 = vpop.xlane.xlu1 %6066 }
0x13ac   :  { %v6075_v61 = vsub.f32 %v6043_v6, %v6067_v31  ;;  %v9609_v31 = vld [vmem:[#allocation37_spill] sm:$0xff] }
0x13ad   :  { %v6088_v51 = vmul.f32 1.442695, %v6074_v9 }
0x13ae   :  { %v6090_v57 = vmul.f32 1.442695, %v6075_v61 }
0x13af   :  { %8291 = vpow2.f32 %v6088_v51 }
0x13b0   :  { %8293 = vpow2.f32 %v6084_v53  ;;  %v9608_v53 = vld [vmem:[#allocation32_spill] sm:$0xff] }
0x13b1   :  { %8295 = vpow2.f32 %v6090_v57 }
0x13b5   :  { %6201 = vrot.lane.b32.xlu1 %v9600_v2, %s8410_s1  ;;  %v6086_v2 = vmul.f32 1.442695, %v6073_v34 }
0x13b7   :  { %8297 = vpow2.f32 %v6086_v2 }
0x13b9   :  { %v9379_v3 = vpop.eup %8291  ;;  %6140 = vrot.lane.b32.xlu1 %v9596_v54, %s8410_s1 }
0x13ba   :  { %v6110_v7 = vsel %vm3483_vm4, %v9379_v3, 0.0  ;;  %v9385_v0 = vpop.eup %8293 }
0x13bb   :  { %6111 = vadd.xlane.f32.xlu0 %v6110_v7  ;;  %v6104_v35 = vsel %vm3483_vm4, %v9385_v0, 0.0  ;;  %v9391_v54 = vpop.eup %8295 }
0x13bc   :  { %v6113_v27 = vsel %vm3483_vm4, %v9391_v54, 0.0 }
0x13bf   :  { %6105 = vadd.xlane.f32.xlu0 %v6104_v35 }
0x13c1   :  { %v9397_v39 = vpop.eup %8297 }
0x13c2   :  { %v6107_v6 = vsel %vm3483_vm4, %v9397_v39, 0.0 }
0x13d5   :  { %6138 = vrot.lane.b32.xlu0 %v9594_v28, %s8410_s1 }
0x13d9   :  { %6270 = vrot.lane.b32.xlu0 %v8863_v18, %s8410_s1 }
0x13dd   :  { %6274 = vrot.lane.b32.xlu0 %v8861_v13, %s8410_s1  ;;  %6114 = vadd.xlane.f32.xlu1 %v6113_v27  ;;  %v9610_v27 = vld [vmem:[#allocation23_spill] sm:$0xff] }
0x13e1   :  { %6278 = vrot.lane.b32.xlu0 %v8879_v62, %s8410_s1  ;;  %6108 = vadd.xlane.f32.xlu1 %v6107_v6 }
0x13e5   :  { %6282 = vrot.lane.b32.xlu0 %v8877_v8, %s8410_s1 }
0x13e9   :  { %6302 = vrot.lane.b32.xlu0 %v9055_v37, %s8410_s1 }
0x13ed   :  { %6306 = vrot.lane.b32.xlu0 %v9053_v11, %s8410_s1 }
0x13f1   :  { %6310 = vrot.lane.b32.xlu0 %v9071_v33, %s8410_s1 }
0x13f2   :  { %6203 = vrot.lane.b32.xlu1 %v9602_v45, %s8410_s1 }
0x13f5   :  { %6314 = vrot.lane.b32.xlu0 %v9069_v46, %s8410_s1 }
0x13f6   :  { %6272 = vrot.lane.b32.xlu1 %v8867_v36, %s8410_s1 }
0x13f9   :  { %6334 = vrot.lane.b32.xlu0 %v9247_v1, %s8410_s1 }
0x13fa   :  { %6276 = vrot.lane.b32.xlu1 %v8865_v48, %s8410_s1 }
0x13fd   :  { %6338 = vrot.lane.b32.xlu0 %v9245_v30, %s8410_s1 }
0x13fe   :  { %6280 = vrot.lane.b32.xlu1 %v8883_v16, %s8410_s1 }
0x1401   :  { %6342 = vrot.lane.b32.xlu0 %v9263_v12, %s8410_s1 }
0x1402   :  { %6284 = vrot.lane.b32.xlu1 %v8881_v47, %s8410_s1 }
0x1405   :  { %6346 = vrot.lane.b32.xlu0 %v9261_v50, %s8410_s1 }
0x1406   :  { %6304 = vrot.lane.b32.xlu1 %v9059_v59, %s8410_s1 }
0x140a   :  { %6308 = vrot.lane.b32.xlu1 %v9057_v19, %s8410_s1 }
0x140e   :  { %6312 = vrot.lane.b32.xlu1 %v9075_v41, %s8410_s1 }
0x1412   :  { %6316 = vrot.lane.b32.xlu1 %v9073_v43, %s8410_s1 }
0x1416   :  { %6336 = vrot.lane.b32.xlu1 %v9251_v49, %s8410_s1 }
0x141a   :  { %6340 = vrot.lane.b32.xlu1 %v9249_v25, %s8410_s1 }
0x141e   :  { %6344 = vrot.lane.b32.xlu1 %v9267_v60, %s8410_s1 }
0x1422   :  { %6348 = vrot.lane.b32.xlu1 %v9265_v24, %s8410_s1  ;;  %v9603_v24 = vld [vmem:[#allocation25_spill] sm:$0xff] }
0x142b   :  { %v6100_v13 = vpop.xlane.xlu0 %6099 }
0x142d   :  { %v6103_v18 = vpop.xlane.xlu1 %6102 }
0x142f   :  { %v6094_v48 = vpop.xlane.xlu0 %6093 }
0x1430   :  { %8299 = vrcp.f32 %v6094_v48 }
0x1431   :  { %v6097_v36 = vpop.xlane.xlu1 %6096 }
0x1432   :  { %8301 = vrcp.f32 %v6097_v36 }
0x1433   :  { %8303 = vrcp.f32 %v6103_v18 }
0x1434   :  { %8305 = vrcp.f32 %v6100_v13 }
0x1435   :  { %v6202_v8 = vpop.permute.xlu1 %6201 }
0x1436   :  { %7312 = vmatprep.subr.bf16.mxu1 %v6202_v8 }
0x1437   :  { %7313 = vmatpush3.bf16.msra.mxu1 %v6202_v8  ;;  %v9611_v8 = vld [vmem:[#allocation36_spill] sm:$0xff] }
0x1439   :  { %v6141_v41 = vpop.permute.xlu1 %6140 }
0x143a   :  { %v8300_v62 = vpop.eup %8299 }
0x143b   :  { %v6124_v16 = vmul.f32 %v8300_v62, %v9369_v55 }
0x143c   :  { %v8302_v47 = vpop.eup %8301 }
0x143d   :  { %v6125_v11 = vmul.f32 %v8302_v47, %v9373_v17  ;;  %v8304_v46 = vpop.eup %8303 }
0x143e   :  { %v8306_v43 = vpop.eup %8305  ;;  %v6127_v28 = vmul.f32 %v8304_v46, %v9365_v20 }
0x143f   :  { %v6132_v37 = vpack.c.bf16 %v6125_v11, %v6124_v16  ;;  %v6126_v30 = vmul.f32 %v8306_v43, %v9361_v40  ;;  %v9604_v40 = vld [vmem:[#allocation24_spill] sm:$0xff]  ;;  %v9613_v43 = vld [vmem:[#allocation41_spill] sm:$0xff] }
0x1441   :  { %7308 = vmatprep.mubr.msk.bf16.mxu0 %vm3483_vm4, %v6132_v37  ;;  %v6133_v25 = vpack.c.bf16 %v6127_v28, %v6126_v30 }
0x1448   :  { %v6112_v19 = vpop.xlane.xlu0 %6111 }
0x144c   :  { %v6106_v59 = vpop.xlane.xlu0 %6105 }
0x1450   :  { %v6139_v33 = vpop.permute.xlu0 %6138 }
0x1451   :  { %7304 = vmatprep.subr.bf16.mxu0 %v6139_v33 }
0x1452   :  { %7305 = vmatpush3.bf16.msra.mxu0 %v6139_v33 }
0x1453   :  { %7306 = vmatprep.subr.bf16.mxu0 %v6141_v41 }
0x1454   :  { %v6271_v45 = vpop.permute.xlu0 %6270 }
0x1455   :  { %v6390_v1 = vsel %vm3344_vm0, %v8755_v38, %v6271_v45  ;;  %v9614_v45 = vld [vmem:[#allocation27_spill] sm:$0xff] }
0x1456   :  { %6422 = vst [vmem:[#allocation7] sm:$0xff] %v6390_v1  ;;  %7307 = vmatpush3.bf16.msra.mxu0 %v6141_v41 }
0x1458   :  { %v6275_v49 = vpop.permute.xlu0 %6274 }
0x1459   :  { %v6392_v50 = vsel %vm3344_vm0, %v8753_v32, %v6275_v49  ;;  %7309 = vmatmul.mubr.msk.bf16.vlgmr.msra.gmra.mrb[108].mxu0 %vm3483_vm4, %v6133_v25  ;;  %v9606_v32 = vld [vmem:[#allocation28_spill] sm:$0xff]  ;;  %v9616_v25 = vld [vmem:[#allocation26_spill] sm:$0xff] }
0x145a   :  { %6430 = vst [vmem:[#allocation7 + $0x40] sm:$0xff] %v6392_v50 }
0x145c   :  { %v6279_v12 = vpop.permute.xlu0 %6278 }
0x145d   :  { %v6394_v60 = vsel %vm3344_vm0, %v9603_v24, %v6279_v12  ;;  %v9617_v12 = vld [vmem:[#allocation31_spill] sm:$0xff] }
0x145e   :  { %6438 = vst [vmem:[#allocation7 + $0x80] sm:$0xff] %v6394_v60 }
0x1460   :  { %v6283_v26 = vpop.permute.xlu0 %6282 }
0x1461   :  { %v6396_v20 = vsel %vm3344_vm0, %v9604_v40, %v6283_v26  ;;  %v9618_v26 = vld [vmem:[#allocation30_spill] sm:$0xff] }
0x1462   :  { %6446 = vst [vmem:[#allocation7 + $0xc0] sm:$0xff] %v6396_v20 }
0x1464   :  { %v6303_v38 = vpop.permute.xlu0 %6302 }
0x1465   :  { %v6398_v55 = vsel %vm3344_vm0, %v9605_v42, %v6303_v38  ;;  %v9619_v38 = vld [vmem:[#allocation35_spill] sm:$0xff] }
0x1466   :  { %6423 = vst [vmem:[#allocation7 + $0x8] sm:$0xff] %v6398_v55 }
0x1468   :  { %v6307_v52 = vpop.permute.xlu0 %6306 }
0x1469   :  { %v6400_v17 = vsel %vm3344_vm0, %v9606_v32, %v6307_v52  ;;  %v9620_v52 = vld [vmem:[#allocation34_spill] sm:$0xff] }
0x146a   :  { %6431 = vst [vmem:[#allocation7 + $0x48] sm:$0xff] %v6400_v17  ;;  %v6115_v56 = vpop.xlane.xlu1 %6114 }
0x146b   :  { %8307 = vrcp.f32 %v6115_v56  ;;  %v9621_v56 = vld [vmem:[#allocation39_spill] sm:$0xff] }
0x146c   :  { %v6311_v23 = vpop.permute.xlu0 %6310  ;;  %8309 = vrcp.f32 %v6106_v59 }
0x146d   :  { %v6402_v10 = vsel %vm3344_vm0, %v9607_v5, %v6311_v23  ;;  %8311 = vrcp.f32 %v6112_v19  ;;  %v9612_v19 = vld [vmem:[#allocation22_spill] sm:$0xff] }
0x146e   :  { %6439 = vst [vmem:[#allocation7 + $0x88] sm:$0xff] %v6402_v10  ;;  %v6109_v29 = vpop.xlane.xlu1 %6108  ;;  %v9622_v10 = vld [vmem:[#allocation38_spill] sm:$0xff] }
0x146f   :  { %8313 = vrcp.f32 %v6109_v29 }
0x1470   :  { %v6315_v9 = vpop.permute.xlu0 %6314 }
0x1471   :  { %v6404_v51 = vsel %vm3344_vm0, %v9608_v53, %v6315_v9  ;;  %v9623_v53 = vld [vmem:[#allocation43_spill] sm:$0xff] }
0x1472   :  { %6447 = vst [vmem:[#allocation7 + $0xc8] sm:$0xff] %v6404_v51  ;;  %v6204_v7 = vpop.permute.xlu1 %6203 }
0x1473   :  { %7314 = vmatprep.subr.bf16.mxu1 %v6204_v7 }
0x1474   :  { %v6335_v35 = vpop.permute.xlu0 %6334  ;;  %7315 = vmatpush3.bf16.msra.mxu1 %v6204_v7 }
0x1475   :  { %v6406_v61 = vsel %vm3344_vm0, %v9609_v31, %v6335_v35  ;;  %v8308_v57 = vpop.eup %8307  ;;  %v9624_v35 = vld [vmem:[#allocation42_spill] sm:$0xff] }
0x1476   :  { %6424 = vst [vmem:[#allocation7 + $0x10] sm:$0xff] %v6406_v61  ;;  %v6273_v34 = vpop.permute.xlu1 %6272  ;;  %v8310_v2 = vpop.eup %8309  ;;  %v6131_v36 = vmul.f32 %v8308_v57, %v9391_v54 }
0x1477   :  { %v6391_v6 = vsel %vm3344_vm0, %v9610_v27, %v6273_v34  ;;  %v8312_v13 = vpop.eup %8311  ;;  %v6128_v16 = vmul.f32 %v8310_v2, %v9385_v0 }
0x1478   :  { %6426 = vst [vmem:[#allocation7 + $0x20] sm:$0xff] %v6391_v6  ;;  %v6339_v18 = vpop.permute.xlu0 %6338  ;;  %v6130_v37 = vmul.f32 %v8312_v13, %v9379_v3 }
0x1479   :  { %v8314_v48 = vpop.eup %8313  ;;  %v6408_v62 = vsel %vm3344_vm0, %v9611_v8, %v6339_v18 }
0x147a   :  { %6432 = vst [vmem:[#allocation7 + $0x50] sm:$0xff] %v6408_v62  ;;  %v6277_v47 = vpop.permute.xlu1 %6276  ;;  %v6129_v11 = vmul.f32 %v8314_v48, %v9397_v39  ;;  %v6135_v41 = vpack.c.bf16 %v6131_v36, %v6130_v37  ;;  %v9615_v39 = vld [vmem:[#allocation40_spill] sm:$0xff] }
0x147b   :  { %v6393_v59 = vsel %vm3344_vm0, %v9612_v19, %v6277_v47 }
0x147c   :  { %6434 = vst [vmem:[#allocation7 + $0x60] sm:$0xff] %v6393_v59  ;;  %v6343_v46 = vpop.permute.xlu0 %6342  ;;  %v6134_v33 = vpack.c.bf16 %v6129_v11, %v6128_v16 }
0x147d   :  { %v6410_v54 = vsel %vm3344_vm0, %v9613_v43, %v6343_v46 }
0x147e   :  { %6440 = vst [vmem:[#allocation7 + $0x90] sm:$0xff] %v6410_v54  ;;  %7316 = vmatprep.mubr.msk.bf16.mxu1 %vm3483_vm4, %v6134_v33  ;;  %v6281_v28 = vpop.permute.xlu1 %6280 }
0x147f   :  { %v6395_v0 = vsel %vm3344_vm0, %v9614_v45, %v6281_v28  ;;  %7317 = vmatmul.mubr.msk.bf16.vlgmr.msra.gmra.mrb[108].mxu1 %vm3483_vm4, %v6135_v41 }
0x1480   :  { %6442 = vst [vmem:[#allocation7 + $0xa0] sm:$0xff] %v6395_v0  ;;  %v6347_v3 = vpop.permute.xlu0 %6346 }
0x1481   :  { %v6412_v30 = vsel %vm3344_vm0, %v9615_v39, %v6347_v3 }
0x1482   :  { %6448 = vst [vmem:[#allocation7 + $0xd0] sm:$0xff] %v6412_v30  ;;  %v6285_v1 = vpop.permute.xlu1 %6284 }
0x1483   :  { %v6397_v49 = vsel %vm3344_vm0, %v9616_v25, %v6285_v1 }
0x1484   :  { %6450 = vst [vmem:[#allocation7 + $0xe0] sm:$0xff] %v6397_v49 }
0x1486   :  { %v6305_v50 = vpop.permute.xlu1 %6304 }
0x1487   :  { %v6399_v24 = vsel %vm3344_vm0, %v9617_v12, %v6305_v50 }
0x1488   :  { %6427 = vst [vmem:[#allocation7 + $0x28] sm:$0xff] %v6399_v24 }
0x148a   :  { %v6309_v60 = vpop.permute.xlu1 %6308 }
0x148b   :  { %v6401_v40 = vsel %vm3344_vm0, %v9618_v26, %v6309_v60 }
0x148c   :  { %6435 = vst [vmem:[#allocation7 + $0x68] sm:$0xff] %v6401_v40 }
0x148e   :  { %v6313_v20 = vpop.permute.xlu1 %6312 }
0x148f   :  { %v6403_v42 = vsel %vm3344_vm0, %v9619_v38, %v6313_v20 }
0x1490   :  { %6443 = vst [vmem:[#allocation7 + $0xa8] sm:$0xff] %v6403_v42 }
0x1492   :  { %v6317_v55 = vpop.permute.xlu1 %6316 }
0x1493   :  { %v6405_v32 = vsel %vm3344_vm0, %v9620_v52, %v6317_v55 }
0x1494   :  { %6451 = vst [vmem:[#allocation7 + $0xe8] sm:$0xff] %v6405_v32 }
0x1496   :  { %v6337_v17 = vpop.permute.xlu1 %6336 }
0x1497   :  { %v6407_v23 = vsel %vm3344_vm0, %v9621_v56, %v6337_v17 }
0x1498   :  { %6428 = vst [vmem:[#allocation7 + $0x30] sm:$0xff] %v6407_v23 }
0x149a   :  { %v6341_v5 = vpop.permute.xlu1 %6340 }
0x149b   :  { %v6409_v29 = vsel %vm3344_vm0, %v9622_v10, %v6341_v5 }
0x149c   :  { %6436 = vst [vmem:[#allocation7 + $0x70] sm:$0xff] %v6409_v29 }
0x149e   :  { %v6345_v9 = vpop.permute.xlu1 %6344 }
0x149f   :  { %v6411_v51 = vsel %vm3344_vm0, %v9623_v53, %v6345_v9 }
0x14a0   :  { %6444 = vst [vmem:[#allocation7 + $0xb0] sm:$0xff] %v6411_v51 }
0x14a2   :  { %v6349_v7 = vpop.permute.xlu1 %6348 }
0x14a3   :  { %v6413_v31 = vsel %vm3344_vm0, %v9624_v35, %v6349_v7 }
0x14a4   :  { %6452 = vst [vmem:[#allocation7 + $0xf0] sm:$0xff] %v6413_v31 }
0x152c   :  { %v7310_v61 = vpop.f32.mrb[108].mxu0 }
0x152d   :  { %6370 = vrot.lane.b32.xlu0 %v7310_v61, %s8410_s1  ;;  %v6184_v57 = vpop.f32.mrb[109].mxu0 }
0x152e   :  { %v7311_v34 = vpop.f32.mrb[110].mxu0 }
0x152f   :  { %6372 = vrot.lane.b32.xlu1 %v7311_v34, %s8410_s1  ;;  %v6187_v2 = vpop.f32.mrb[111].mxu0 }
0x1531   :  { %6366 = vrot.lane.b32.xlu0 %v6184_v57, %s8410_s1 }
0x1533   :  { %6368 = vrot.lane.b32.xlu1 %v6187_v2, %s8410_s1 }
0x1552   :  { %v7318_v27 = vpop.f32.mrb[108].mxu1 }
0x1553   :  { %v6247_v6 = vpop.f32.mrb[109].mxu1 }
0x1554   :  { %6374 = vrot.lane.b32.xlu0 %v6247_v6, %s8410_s1  ;;  %v7319_v13 = vpop.f32.mrb[110].mxu1 }
0x1555   :  { %v6250_v18 = vpop.f32.mrb[111].mxu1 }
0x1556   :  { %6376 = vrot.lane.b32.xlu1 %v6250_v18, %s8410_s1 }
0x1558   :  { %6378 = vrot.lane.b32.xlu0 %v7318_v27, %s8410_s1 }
0x155a   :  { %6380 = vrot.lane.b32.xlu1 %v7319_v13, %s8410_s1 }
0x159f   :  { %v6371_v48 = vpop.permute.xlu0 %6370 }
0x15a0   :  { %v6416_v36 = vsel %vm3344_vm0, %v9329_v14, %v6371_v48 }
0x15a1   :  { %6433 = vst [vmem:[#allocation7 + $0x58] sm:$0xff] %v6416_v36  ;;  %v6373_v8 = vpop.permute.xlu1 %6372 }
0x15a2   :  { %v6417_v62 = vsel %vm3344_vm0, %v9333_v15, %v6373_v8 }
0x15a3   :  { %6437 = vst [vmem:[#allocation7 + $0x78] sm:$0xff] %v6417_v62  ;;  %v6367_v47 = vpop.permute.xlu0 %6366 }
0x15a4   :  { %v6414_v16 = vsel %vm3344_vm0, %v9331_v21, %v6367_v47 }
0x15a5   :  { %6425 = vst [vmem:[#allocation7 + $0x18] sm:$0xff] %v6414_v16  ;;  %v6369_v11 = vpop.permute.xlu1 %6368 }
0x15a6   :  { %v6415_v37 = vsel %vm3344_vm0, %v9335_v4, %v6369_v11 }
0x15a7   :  { %6429 = vst [vmem:[#allocation7 + $0x38] sm:$0xff] %v6415_v37 }
0x15c6   :  { %v6375_v19 = vpop.permute.xlu0 %6374 }
0x15c7   :  { %v6418_v14 = vsel %vm3344_vm0, %v9342_v44, %v6375_v19 }
0x15c8   :  { %6441 = vst [vmem:[#allocation7 + $0x98] sm:$0xff] %v6418_v14  ;;  %v6377_v59 = vpop.permute.xlu1 %6376 }
0x15c9   :  { %v6419_v15 = vsel %vm3344_vm0, %v9348_v63, %v6377_v59 }
0x15ca   :  { %6445 = vst [vmem:[#allocation7 + $0xb8] sm:$0xff] %v6419_v15  ;;  %v6379_v46 = vpop.permute.xlu0 %6378 }
0x15cb   :  { %v6420_v21 = vsel %vm3344_vm0, %v9338_v58, %v6379_v46 }
0x15cc   :  { %6449 = vst [vmem:[#allocation7 + $0xd8] sm:$0xff] %v6420_v21  ;;  %v6381_v33 = vpop.permute.xlu1 %6380 }
0x15cd   :  { %v6421_v4 = vsel %vm3344_vm0, %v9345_v22, %v6381_v33 }
0x15ce   :  { %6453 = vst [vmem:[#allocation7 + $0xf8] sm:$0xff] %v6421_v4 }
0x15cf   :  { %8386 = shalt.err (!%p8383_p6)
}
0x15d0   :  { %s8387_s13 = scalar_lea.hbm %s9547_s2, 4096 }
0x15d1   :  { %p8388_p7 = scmp.ne.s32.totalorder %s9547_s2, %s8387_s13  ;;  %p8391_p8 = scmp.lt.u32.totalorder %s8387_s13, %s9547_s2 }
0x15d3   :  { %p8393_p9 = pnand %p8391_p8, %p8388_p7 }
0x15d5   :  { %8396 = shalt.err (!%p8393_p9)
}
0x15d6   :  { %s8412_s18 = smov 512   ;;  %s8413_s19 = smov 32  }
0x15d7   :  { %6465 = dma.vmem_to_hbm [thread:$0]  %s6460_s9, 4096, %s9547_s2, [#allocation4], %s8412_s18, %s8412_s18, %s8413_s19  }
0x15d8   :  { %8401 = dma.done.wait [#allocation4], 4096  }
0x15d9   :  { %8402 = vsyncadd [#allocation4], 4294963200 }
0x15da   :  { %6469 = vsyncpa [#allocation3], 1 }
0x15db   :  { %6470 = vsyncpa [#allocation6], 1 }
0x15dc   :  { %6471 = vsyncpa [#allocation4], 1 }

</bundles_post_ra>
